<compile_context>
chip_gen: v5e
topology: v5e:2x2
jax: 0.10.0
libtpu: 0.0.40
codegen_flags: <defaults>
</compile_context>

<pallas_src>
import math
from functools import partial

import jax
import jax.numpy as jnp
from jax import lax
from jax.experimental import pallas as pl
from jax.experimental.pallas import tpu as pltpu


# ----------------------------------------------------------------------------
# Kernel: one grid step == one batch element; the (S, D) activation slab and
# all parameters live in VMEM, so the whole layer is fused.
# ----------------------------------------------------------------------------
def _transformer_layer_kernel(
    x_ref,                        # (S, D)  current batch row (batch squeezed)
    wqkv_ref, bqkv_ref,           # (D, 3D), (1, 3D)  fused Q/K/V projection
    wo_ref, bo_ref,               # (D, D),  (1, D)
    w1_ref, b1_ref,               # (D, F),  (1, F)
    w2_ref, b2_ref,               # (F, D),  (1, D)
    g1_ref, beta1_ref,            # LayerNorm1 gamma/beta (1, D)
    g2_ref, beta2_ref,            # LayerNorm2 gamma/beta (1, D)
    o_ref,                        # (S, D)
    k_scr, v_scr,                 # (H, S, hd) bf16 scratch  (K / V slabs)
    m_scr, l_scr, acc_scr,        # online-softmax scratch (f32)
    *, num_heads: int, kv_tile: int, ff_tile: int, compute_dtype,
):
    f32 = jnp.float32
    cd = compute_dtype
    x = x_ref[...].astype(f32)                          # (S, D)
    S, D = x.shape
    H = num_heads
    hd = D // H
    F = w1_ref.shape[1]
    inv_sqrt_hd = 1.0 / math.sqrt(hd)
    num_kv = S // kv_tile

    def layernorm(v, g_ref, b_ref):
        mu = jnp.mean(v, axis=-1, keepdims=True)
        var = jnp.mean((v - mu) ** 2, axis=-1, keepdims=True)
        return ((v - mu) * lax.rsqrt(var + 1e-5)
                * g_ref[...].astype(f32) + b_ref[...].astype(f32))

    # ---- self-attention on norm1(x) ----------------------------------------
    xn1 = layernorm(x, g1_ref, beta1_ref)

    # Single fused QKV projection: (S, D) @ (D, 3D) -> (S, 3D), f32 accum.
    qkv = (jnp.dot(xn1.astype(cd), wqkv_ref[...], preferred_element_type=f32)
           + bqkv_ref[...])

    # One cast pass, then one reshape + one transpose to head-major layout.
    qkv_c = qkv.astype(cd)                              # (S, 3D) bf16
    qkv_h = jnp.transpose(qkv_c.reshape(S, 3 * H, hd), (1, 0, 2))   # (3H, S, hd)
    q_h = qkv_h[:H]                                     # (H, S, hd) value
    k_scr[...] = qkv_h[H:2 * H]                         # bf16 K slab
    v_scr[...] = qkv_h[2 * H:]                          # bf16 V slab

    # Online-softmax state (re-initialized every grid step -> no stale data).
    m_scr[...] = jnp.full_like(m_scr, -jnp.inf)
    l_scr[...] = jnp.zeros_like(l_scr)
    acc_scr[...] = jnp.zeros_like(acc_scr)

    # Flash-style loop over KV tiles: only (H, S, kv_tile) scores live at once.
    @pl.loop(0, num_kv)
    def _(t):
        start = pl.multiple_of(t * kv_tile, kv_tile)
        ks = k_scr[:, pl.ds(start, kv_tile), :]         # (H, tk, hd) bf16
        vs = v_scr[:, pl.ds(start, kv_tile), :]
        s = jnp.einsum("hqd,hkd->hqk", q_h, ks,
                       preferred_element_type=f32) * inv_sqrt_hd
        m_prev = m_scr[...]
        m_new = jnp.maximum(m_prev, jnp.max(s, axis=-1, keepdims=True))
        alpha = jnp.exp(m_prev - m_new)
        p = jnp.exp(s - m_new)                          # unnormalized probs
        l_scr[...] = alpha * l_scr[...] + jnp.sum(p, axis=-1, keepdims=True)
        acc_scr[...] = alpha * acc_scr[...] + jnp.einsum(
            "hqk,hkd->hqd", p.astype(cd), vs, preferred_element_type=f32)
        m_scr[...] = m_new

    # Deferred softmax normalization: one multiply by the EUP reciprocal.
    ctx = acc_scr[...] * pl.reciprocal(l_scr[...], approx=True)     # (H, S, hd)
    # Merge heads in registers (torch transpose(1,2).view order).
    context = jnp.transpose(ctx, (1, 0, 2)).reshape(S, D)

    attn_out = (jnp.dot(context.astype(cd), wo_ref[...],
                        preferred_element_type=f32) + bo_ref[...])
    x2 = x + attn_out                                   # residual 1

    # ---- feed-forward on norm2(x2), accumulated over F tiles ---------------
    xn2 = layernorm(x2, g2_ref, beta2_ref)
    xn2_c = xn2.astype(cd)
    ff = jnp.zeros((S, D), f32)
    for t in range(F // ff_tile):                       # static slices
        lo, hi = t * ff_tile, (t + 1) * ff_tile
        h = jnp.maximum(
            jnp.dot(xn2_c, w1_ref[:, lo:hi], preferred_element_type=f32)
            + b1_ref[:, lo:hi], 0.0)                    # ReLU, f32
        ff = ff + jnp.dot(h.astype(cd), w2_ref[lo:hi, :],
                          preferred_element_type=f32)
    ff = ff + b2_ref[...]

    o_ref[...] = (x2 + ff).astype(o_ref.dtype)          # residual 2


# ----------------------------------------------------------------------------
# Wrapper
# ----------------------------------------------------------------------------
def interpretable_transformer_layer(x, params, num_heads, *,
                                    compute_dtype=jnp.bfloat16,
                                    single_buffer_weights=True):
    B, S, D = x.shape
    F = params["w1"].shape[1]
    assert D % num_heads == 0
    hd = D // num_heads

    kv_tile = S if S <= 512 else 512
    assert S % kv_tile == 0, "choose S as a multiple of the kv tile"
    ff_tile = F if F <= 512 else 512
    assert F % ff_tile == 0, "choose F as a multiple of the ff tile"

    # Fuse the Q/K/V projection into a single (D, 3D) weight / (1, 3D) bias.
    wqkv = jnp.concatenate([params["wq"], params["wk"], params["wv"]],
                           axis=1).astype(compute_dtype)
    bqkv = jnp.concatenate([params["bq"], params["bk"], params["bv"]],
                           axis=1).astype(jnp.float32)
    wo = params["wo"].astype(compute_dtype)
    w1 = params["w1"].astype(compute_dtype)
    w2 = params["w2"].astype(compute_dtype)

    cd_b = jnp.dtype(compute_dtype).itemsize

    # Generation-aware VMEM cap: ~85% of physical (headroom on v7x's 64 MiB,
    # raised well above the 32 MiB default scoped limit on v5e/v6e's 128 MiB).
    try:
        phys_vmem = pltpu.get_tpu_info().vmem_capacity_bytes
    except Exception:
        phys_vmem = 128 * 1024 * 1024
    vmem_cap = int(phys_vmem * 0.85)

    def run(single_buffer):
        wb = 1 if single_buffer else 2   # weight buffer count

        def resident(shape):
            # Full block, constant index -> VMEM-resident across the batch
            # grid; single-buffered when supported (no 2x VMEM for weights).
            if single_buffer:
                return pl.BlockSpec(shape, lambda b: (0,) * len(shape),
                                    pipeline_mode=pl.Buffered(1))
            return pl.BlockSpec(shape, lambda b: (0,) * len(shape))

        in_specs = [
            pl.BlockSpec((None, S, D), lambda b: (b, 0, 0)),   # x (batch squeezed)
            resident((D, 3 * D)), resident((1, 3 * D)),        # fused qkv
            resident((D, D)), resident((1, D)),                # wo, bo
            resident((D, F)), resident((1, F)),                # w1, b1
            resident((F, D)), resident((1, D)),                # w2, b2
            resident((1, D)), resident((1, D)),                # ln1 gamma/beta
            resident((1, D)), resident((1, D)),                # ln2 gamma/beta
        ]

        # VMEM footprint (buffer counts accounted, small slack, no 4x fudge).
        lane = 128
        weight_bytes = wb * cd_b * (3 * D * D + D * D + D * F + F * D)
        small_bytes = wb * 4 * (3 * D + D + F + D + 4 * D)
        io_bytes = 2 * (2 * 4 * S * D)                         # x/out, double-buffered
        kv_scr = 2 * cd_b * num_heads * S * max(hd, lane)
        ml_scr = 2 * 4 * num_heads * S * lane                  # (H,S,1) lane-padded
        acc_scr = 4 * num_heads * S * max(hd, lane)
        attn_tmp = 2 * 4 * num_heads * S * kv_tile             # scores + probs (one tile)
        act_tmp = 4 * S * (3 * D + ff_tile + 8 * D)            # qkv, hidden tile, misc f32 temps
        footprint = (weight_bytes + small_bytes + io_bytes + kv_scr + ml_scr
                     + acc_scr + attn_tmp + act_tmp)
        vmem_limit = int(min(vmem_cap,
                             max(32 * 1024 * 1024, footprint + 2 * 1024 * 1024)))

        kernel = partial(_transformer_layer_kernel,
                         num_heads=num_heads, kv_tile=kv_tile,
                         ff_tile=ff_tile, compute_dtype=compute_dtype)

        return pl.pallas_call(
            kernel,
            out_shape=jax.ShapeDtypeStruct((B, S, D), x.dtype),
            grid_spec=pltpu.PrefetchScalarGridSpec(
                num_scalar_prefetch=0,
                grid=(B,),
                in_specs=in_specs,
                out_specs=pl.BlockSpec((None, S, D), lambda b: (b, 0, 0)),
                scratch_shapes=[
                    pltpu.VMEM((num_heads, S, hd), compute_dtype),   # K
                    pltpu.VMEM((num_heads, S, hd), compute_dtype),   # V
                    pltpu.VMEM((num_heads, S, 1), jnp.float32),      # m
                    pltpu.VMEM((num_heads, S, 1), jnp.float32),      # l
                    pltpu.VMEM((num_heads, S, hd), jnp.float32),     # acc
                ],
            ),
            compiler_params=pltpu.CompilerParams(
                dimension_semantics=("parallel",),
                vmem_limit_bytes=vmem_limit,
            ),
        )(
            x,
            wqkv, bqkv,
            wo, params["bo"],
            w1, params["b1"],
            w2, params["b2"],
            params["g1"], params["beta1"],
            params["g2"], params["beta2"],
        )

    if single_buffer_weights:
        try:
            return run(True)
        except Exception:
            # pl.Buffered(1) not supported by this JAX build -> default
            # double-buffered weight specs (correct, just more VMEM).
            return run(False)
    return run(False)


# ----------------------------------------------------------------------------
# Pure-JAX reference (mirrors the PyTorch forward, eval mode) using the same
# mixed precision policy as the kernel (bf16 matmul operands, f32 accumulation,
# f32 LayerNorm/softmax) so the comparison isolates kernel correctness.
# Note: vs a true f32 PyTorch layer the error would be ~1e-2 scale (bf16 MXU
# operands) — intended trade-off for MXU throughput and halved weight DMA.
# ----------------------------------------------------------------------------
def _reference(x, p, num_heads, compute_dtype=jnp.bfloat16):
    B, S, D = x.shape
    hd = D // num_heads
    cd = compute_dtype
    f32 = jnp.float32

    def ln(v, g, b):
        mu = jnp.mean(v, axis=-1, keepdims=True)
        var = jnp.mean((v - mu) ** 2, axis=-1, keepdims=True)
        return (v - mu) * lax.rsqrt(var + 1e-5) * g + b

    def mm(a, w, b):
        return jnp.dot(a.astype(cd), w.astype(cd),
                       preferred_element_type=f32) + b

    xn1 = ln(x, p["g1"], p["beta1"])
    q = mm(xn1, p["wq"], p["bq"])
    k = mm(xn1, p["wk"], p["bk"])
    v = mm(xn1, p["wv"], p["bv"])
    q = q.reshape(B, S, num_heads, hd).transpose(0, 2, 1, 3)
    k = k.reshape(B, S, num_heads, hd).transpose(0, 2, 1, 3)
    v = v.reshape(B, S, num_heads, hd).transpose(0, 2, 1, 3)
    scores = jnp.einsum("bhqd,bhkd->bhqk", q.astype(cd), k.astype(cd),
                        preferred_element_type=f32) / math.sqrt(hd)
    scores = scores - jnp.max(scores, axis=-1, keepdims=True)
    e = jnp.exp(scores)
    attn = e / jnp.sum(e, axis=-1, keepdims=True)
    ctx = jnp.einsum("bhqk,bhkd->bhqd", attn.astype(cd), v.astype(cd),
                     preferred_element_type=f32)
    ctx = ctx.transpose(0, 2, 1, 3).reshape(B, S, D)
    attn_out = mm(ctx, p["wo"], p["bo"])
    x2 = x + attn_out
    xn2 = ln(x2, p["g2"], p["beta2"])
    ff = mm(jnp.maximum(mm(xn2, p["w1"], p["b1"]), 0.0), p["w2"], p["b2"])
    return x2 + ff


# ----------------------------------------------------------------------------
if __name__ == "__main__":
    B, S, D, H, F = 2, 8, 32, 4, 64   # batch, seq, d_model, num_heads, ffn

    key = jax.random.PRNGKey(0)
    ks = jax.random.split(key, 13)

    def init_w(k, shape, fan_in):
        return jax.random.normal(k, shape, jnp.float32) / math.sqrt(fan_in)

    params = {
        "wq": init_w(ks[0], (D, D), D), "bq": init_w(ks[1], (1, D), D),
        "wk": init_w(ks[2], (D, D), D), "bk": init_w(ks[3], (1, D), D),
        "wv": init_w(ks[4], (D, D), D), "bv": init_w(ks[5], (1, D), D),
        "wo": init_w(ks[6], (D, D), D), "bo": init_w(ks[7], (1, D), D),
        "w1": init_w(ks[8], (D, F), D), "b1": init_w(ks[9], (1, F), D),
        "w2": init_w(ks[10], (F, D), F), "b2": init_w(ks[11], (1, D), F),
        # LayerNorm affine params: PyTorch default init (ones / zeros)
        "g1": jnp.ones((1, D), jnp.float32), "beta1": jnp.zeros((1, D), jnp.float32),
        "g2": jnp.ones((1, D), jnp.float32), "beta2": jnp.zeros((1, D), jnp.float32),
    }

    x = jax.random.normal(ks[12], (B, S, D), jnp.float32)

    out = interpretable_transformer_layer(x, params, num_heads=H)
    out = jax.block_until_ready(out)

    ref = _reference(x, params, H)
    assert out.shape == (B, S, D)
    max_err = float(jnp.max(jnp.abs(out - ref)))
    # bf16 MXU operands -> compare against the matched mixed-precision
    # reference with a bf16-appropriate tolerance.
    assert jnp.allclose(out, ref, atol=2e-2, rtol=2e-2), (
        f"max abs err = {max_err}")

    print("KERNEL_OK")
</pallas_src>

<mosaic_0001>
module attributes {stable_mosaic.version = 11 : i64} {
  func.func @_transformer_layer_kernel(%arg0: i32, %arg1: memref<1x8x32xf32, #tpu.memory_space<vmem>>, %arg2: memref<32x96xbf16, #tpu.memory_space<vmem>>, %arg3: memref<1x96xf32, #tpu.memory_space<vmem>>, %arg4: memref<32x32xbf16, #tpu.memory_space<vmem>>, %arg5: memref<1x32xf32, #tpu.memory_space<vmem>>, %arg6: memref<32x64xbf16, #tpu.memory_space<vmem>>, %arg7: memref<1x64xf32, #tpu.memory_space<vmem>>, %arg8: memref<64x32xbf16, #tpu.memory_space<vmem>>, %arg9: memref<1x32xf32, #tpu.memory_space<vmem>>, %arg10: memref<1x32xf32, #tpu.memory_space<vmem>>, %arg11: memref<1x32xf32, #tpu.memory_space<vmem>>, %arg12: memref<1x32xf32, #tpu.memory_space<vmem>>, %arg13: memref<1x32xf32, #tpu.memory_space<vmem>>, %arg14: memref<1x8x32xf32, #tpu.memory_space<vmem>>, %arg15: memref<4x8x8xbf16, #tpu.memory_space<vmem>>, %arg16: memref<4x8x8xbf16, #tpu.memory_space<vmem>>, %arg17: memref<4x8x1xf32, #tpu.memory_space<vmem>>, %arg18: memref<4x8x1xf32, #tpu.memory_space<vmem>>, %arg19: memref<4x8x8xf32, #tpu.memory_space<vmem>>) attributes {dimension_semantics = [#tpu.dimension_semantics<parallel>], iteration_bounds = array<i64: 2>, scalar_prefetch = 0 : i64, scratch_operands = 5 : i64, tpu.core_type = #tpu.core_type<tc>, window_params = [{transform_indices = @transform_0, window_bounds = array<i64: 1, 8, 32>}, {pipeline_mode = #tpu.pipeline_mode<synchronous>, transform_indices = @transform_1, window_bounds = array<i64: 32, 96>}, {pipeline_mode = #tpu.pipeline_mode<synchronous>, transform_indices = @transform_2, window_bounds = array<i64: 1, 96>}, {pipeline_mode = #tpu.pipeline_mode<synchronous>, transform_indices = @transform_3, window_bounds = array<i64: 32, 32>}, {pipeline_mode = #tpu.pipeline_mode<synchronous>, transform_indices = @transform_4, window_bounds = array<i64: 1, 32>}, {pipeline_mode = #tpu.pipeline_mode<synchronous>, transform_indices = @transform_5, window_bounds = array<i64: 32, 64>}, {pipeline_mode = #tpu.pipeline_mode<synchronous>, transform_indices = @transform_6, window_bounds = array<i64: 1, 64>}, {pipeline_mode = #tpu.pipeline_mode<synchronous>, transform_indices = @transform_7, window_bounds = array<i64: 64, 32>}, {pipeline_mode = #tpu.pipeline_mode<synchronous>, transform_indices = @transform_8, window_bounds = array<i64: 1, 32>}, {pipeline_mode = #tpu.pipeline_mode<synchronous>, transform_indices = @transform_9, window_bounds = array<i64: 1, 32>}, {pipeline_mode = #tpu.pipeline_mode<synchronous>, transform_indices = @transform_10, window_bounds = array<i64: 1, 32>}, {pipeline_mode = #tpu.pipeline_mode<synchronous>, transform_indices = @transform_11, window_bounds = array<i64: 1, 32>}, {pipeline_mode = #tpu.pipeline_mode<synchronous>, transform_indices = @transform_12, window_bounds = array<i64: 1, 32>}, {transform_indices = @transform_13, window_bounds = array<i64: 1, 8, 32>}]} {
    %c0 = arith.constant 0 : index
    %c0_0 = arith.constant 0 : index
    %c0_1 = arith.constant 0 : index
    %0 = vector.load %arg1[%c0, %c0_0, %c0_1] : memref<1x8x32xf32, #tpu.memory_space<vmem>>, vector<1x8x32xf32>
    %1 = vector.shape_cast %0 : vector<1x8x32xf32> to vector<8x32xf32>
    %cst = arith.constant dense<0.000000e+00> : vector<8xf32>
    %2 = vector.multi_reduction <add>, %1, %cst [1] : vector<8x32xf32> to vector<8xf32>
    %3 = vector.shape_cast %2 : vector<8xf32> to vector<8x1xf32>
    %cst_2 = arith.constant 3.200000e+01 : f32
    %4 = vector.broadcast %cst_2 : f32 to vector<8x1xf32>
    %5 = arith.divf %3, %4 : vector<8x1xf32>
    %6 = vector.broadcast %5 : vector<8x1xf32> to vector<8x32xf32>
    %7 = arith.subf %1, %6 : vector<8x32xf32>
    %8 = arith.mulf %7, %7 : vector<8x32xf32>
    %cst_3 = arith.constant dense<0.000000e+00> : vector<8xf32>
    %9 = vector.multi_reduction <add>, %8, %cst_3 [1] : vector<8x32xf32> to vector<8xf32>
    %10 = vector.shape_cast %9 : vector<8xf32> to vector<8x1xf32>
    %cst_4 = arith.constant 3.200000e+01 : f32
    %11 = vector.broadcast %cst_4 : f32 to vector<8x1xf32>
    %12 = arith.divf %10, %11 : vector<8x1xf32>
    %13 = vector.broadcast %5 : vector<8x1xf32> to vector<8x32xf32>
    %14 = arith.subf %1, %13 : vector<8x32xf32>
    %cst_5 = arith.constant 9.99999974E-6 : f32
    %15 = vector.broadcast %cst_5 : f32 to vector<8x1xf32>
    %16 = arith.addf %12, %15 : vector<8x1xf32>
    %17 = math.rsqrt %16 : vector<8x1xf32>
    %18 = vector.broadcast %17 : vector<8x1xf32> to vector<8x32xf32>
    %19 = arith.mulf %14, %18 : vector<8x32xf32>
    %c0_6 = arith.constant 0 : index
    %c0_7 = arith.constant 0 : index
    %20 = vector.load %arg10[%c0_6, %c0_7] : memref<1x32xf32, #tpu.memory_space<vmem>>, vector<1x32xf32>
    %21 = vector.broadcast %20 : vector<1x32xf32> to vector<8x32xf32>
    %22 = arith.mulf %19, %21 : vector<8x32xf32>
    %c0_8 = arith.constant 0 : index
    %c0_9 = arith.constant 0 : index
    %23 = vector.load %arg11[%c0_8, %c0_9] : memref<1x32xf32, #tpu.memory_space<vmem>>, vector<1x32xf32>
    %24 = vector.broadcast %23 : vector<1x32xf32> to vector<8x32xf32>
    %25 = arith.addf %22, %24 : vector<8x32xf32>
    %26 = arith.truncf %25 : vector<8x32xf32> to vector<8x32xbf16>
    %c0_10 = arith.constant 0 : index
    %c0_11 = arith.constant 0 : index
    %27 = vector.load %arg2[%c0_10, %c0_11] : memref<32x96xbf16, #tpu.memory_space<vmem>>, vector<32x96xbf16>
    %cst_12 = arith.constant dense<0.000000e+00> : vector<8x96xf32>
    %28 = tpu.matmul %26, %27, %cst_12 {dimension_numbers = #tpu.dot_dimension_numbers<[1], [0], [0], [1], [0, 0, 1, 1], [], []>} : vector<8x32xbf16>, vector<32x96xbf16>, vector<8x96xf32> -> vector<8x96xf32>
    %c0_13 = arith.constant 0 : index
    %c0_14 = arith.constant 0 : index
    %29 = vector.load %arg3[%c0_13, %c0_14] : memref<1x96xf32, #tpu.memory_space<vmem>>, vector<1x96xf32>
    %30 = vector.broadcast %29 : vector<1x96xf32> to vector<8x96xf32>
    %31 = arith.addf %28, %30 : vector<8x96xf32>
    %32 = arith.truncf %31 : vector<8x96xf32> to vector<8x96xbf16>
    %33 = vector.shape_cast %32 : vector<8x96xbf16> to vector<8x12x8xbf16>
    %34 = tpu.transpose %33, [1, 0, 2] : vector<8x12x8xbf16> -> vector<12x8x8xbf16>
    %35 = vector.extract_strided_slice %34 {offsets = [0, 0, 0], sizes = [4, 8, 8], strides = [1, 1, 1]} : vector<12x8x8xbf16> to vector<4x8x8xbf16>
    %36 = vector.extract_strided_slice %34 {offsets = [4, 0, 0], sizes = [4, 8, 8], strides = [1, 1, 1]} : vector<12x8x8xbf16> to vector<4x8x8xbf16>
    %c0_15 = arith.constant 0 : index
    %c0_16 = arith.constant 0 : index
    %c0_17 = arith.constant 0 : index
    %37 = vector.load %arg15[%c0_15, %c0_16, %c0_17] : memref<4x8x8xbf16, #tpu.memory_space<vmem>>, vector<4x8x8xbf16>
    tpu.vector_store %arg15[%c0_15, %c0_16, %c0_17], %36 {strides = array<i32>} : memref<4x8x8xbf16, #tpu.memory_space<vmem>>, vector<4x8x8xbf16>,
    %38 = vector.extract_strided_slice %34 {offsets = [8, 0, 0], sizes = [4, 8, 8], strides = [1, 1, 1]} : vector<12x8x8xbf16> to vector<4x8x8xbf16>
    %c0_18 = arith.constant 0 : index
    %c0_19 = arith.constant 0 : index
    %c0_20 = arith.constant 0 : index
    %39 = vector.load %arg16[%c0_18, %c0_19, %c0_20] : memref<4x8x8xbf16, #tpu.memory_space<vmem>>, vector<4x8x8xbf16>
    tpu.vector_store %arg16[%c0_18, %c0_19, %c0_20], %38 {strides = array<i32>} : memref<4x8x8xbf16, #tpu.memory_space<vmem>>, vector<4x8x8xbf16>,
    %cst_21 = arith.constant 0xFF800000 : f32
    %40 = vector.broadcast %cst_21 : f32 to vector<4x8x1xf32>
    %c0_22 = arith.constant 0 : index
    %c0_23 = arith.constant 0 : index
    %c0_24 = arith.constant 0 : index
    %41 = vector.load %arg17[%c0_22, %c0_23, %c0_24] : memref<4x8x1xf32, #tpu.memory_space<vmem>>, vector<4x8x1xf32>
    tpu.vector_store %arg17[%c0_22, %c0_23, %c0_24], %40 {strides = array<i32>} : memref<4x8x1xf32, #tpu.memory_space<vmem>>, vector<4x8x1xf32>,
    %cst_25 = arith.constant 0.000000e+00 : f32
    %42 = vector.broadcast %cst_25 : f32 to vector<4x8x1xf32>
    %c0_26 = arith.constant 0 : index
    %c0_27 = arith.constant 0 : index
    %c0_28 = arith.constant 0 : index
    %43 = vector.load %arg18[%c0_26, %c0_27, %c0_28] : memref<4x8x1xf32, #tpu.memory_space<vmem>>, vector<4x8x1xf32>
    tpu.vector_store %arg18[%c0_26, %c0_27, %c0_28], %42 {strides = array<i32>} : memref<4x8x1xf32, #tpu.memory_space<vmem>>, vector<4x8x1xf32>,
    %cst_29 = arith.constant 0.000000e+00 : f32
    %44 = vector.broadcast %cst_29 : f32 to vector<4x8x8xf32>
    %c0_30 = arith.constant 0 : index
    %c0_31 = arith.constant 0 : index
    %c0_32 = arith.constant 0 : index
    %45 = vector.load %arg19[%c0_30, %c0_31, %c0_32] : memref<4x8x8xf32, #tpu.memory_space<vmem>>, vector<4x8x8xf32>
    tpu.vector_store %arg19[%c0_30, %c0_31, %c0_32], %44 {strides = array<i32>} : memref<4x8x8xf32, #tpu.memory_space<vmem>>, vector<4x8x8xf32>,
    %c0_i32 = arith.constant 0 : i32
    %c1_i32 = arith.constant 1 : i32
    %46 = arith.muli %c0_i32, %c1_i32 : i32
    %c0_i32_33 = arith.constant 0 : i32
    %47 = arith.addi %c0_i32_33, %46 : i32
    %c8_i32 = arith.constant 8 : i32
    %48 = arith.muli %47, %c8_i32 : i32
    %49 = tpu.assume_multiple %48, 8 : i32
    %c0_34 = arith.constant 0 : index
    %50 = arith.index_cast %49 : i32 to index
    %c0_35 = arith.constant 0 : index
    %51 = vector.load %arg15[%c0_34, %50, %c0_35] : memref<4x8x8xbf16, #tpu.memory_space<vmem>>, vector<4x8x8xbf16>
    %c0_36 = arith.constant 0 : index
    %52 = arith.index_cast %49 : i32 to index
    %c0_37 = arith.constant 0 : index
    %53 = vector.load %arg16[%c0_36, %52, %c0_37] : memref<4x8x8xbf16, #tpu.memory_space<vmem>>, vector<4x8x8xbf16>
    "tpu.trace_start"() <{level = 10 : i32, message = "hqd,hkd->hqk"}> : () -> ()
    %cst_38 = arith.constant dense<0.000000e+00> : vector<4x8x8xf32>
    %54 = tpu.matmul %35, %51, %cst_38 {dimension_numbers = #tpu.dot_dimension_numbers<[2], [2], [1], [1], [0, 0, 0, 1, 1, 1], [0], [0]>} : vector<4x8x8xbf16>, vector<4x8x8xbf16>, vector<4x8x8xf32> -> vector<4x8x8xf32>
    "tpu.trace_stop"() : () -> ()
    %cst_39 = arith.constant 0.353553385 : f32
    %55 = vector.broadcast %cst_39 : f32 to vector<4x8x8xf32>
    %56 = arith.mulf %54, %55 : vector<4x8x8xf32>
    %c0_40 = arith.constant 0 : index
    %c0_41 = arith.constant 0 : index
    %c0_42 = arith.constant 0 : index
    %57 = vector.load %arg17[%c0_40, %c0_41, %c0_42] : memref<4x8x1xf32, #tpu.memory_space<vmem>>, vector<4x8x1xf32>
    %cst_43 = arith.constant dense<0xFF800000> : vector<4x8xf32>
    %58 = vector.multi_reduction <maximumf>, %56, %cst_43 [2] : vector<4x8x8xf32> to vector<4x8xf32>
    %59 = vector.shape_cast %58 : vector<4x8xf32> to vector<4x8x1xf32>
    %60 = arith.maximumf %57, %59 : vector<4x8x1xf32>
    %61 = arith.subf %57, %60 : vector<4x8x1xf32>
    %62 = math.exp %61 : vector<4x8x1xf32>
    %63 = vector.broadcast %60 : vector<4x8x1xf32> to vector<4x8x8xf32>
    %64 = arith.subf %56, %63 : vector<4x8x8xf32>
    %65 = math.exp %64 : vector<4x8x8xf32>
    %c0_44 = arith.constant 0 : index
    %c0_45 = arith.constant 0 : index
    %c0_46 = arith.constant 0 : index
    %66 = vector.load %arg18[%c0_44, %c0_45, %c0_46] : memref<4x8x1xf32, #tpu.memory_space<vmem>>, vector<4x8x1xf32>
    %67 = arith.mulf %62, %66 : vector<4x8x1xf32>
    %cst_47 = arith.constant dense<0.000000e+00> : vector<4x8xf32>
    %68 = vector.multi_reduction <add>, %65, %cst_47 [2] : vector<4x8x8xf32> to vector<4x8xf32>
    %69 = vector.shape_cast %68 : vector<4x8xf32> to vector<4x8x1xf32>
    %70 = arith.addf %67, %69 : vector<4x8x1xf32>
    %c0_48 = arith.constant 0 : index
    %c0_49 = arith.constant 0 : index
    %c0_50 = arith.constant 0 : index
    %71 = vector.load %arg18[%c0_48, %c0_49, %c0_50] : memref<4x8x1xf32, #tpu.memory_space<vmem>>, vector<4x8x1xf32>
    tpu.vector_store %arg18[%c0_48, %c0_49, %c0_50], %70 {strides = array<i32>} : memref<4x8x1xf32, #tpu.memory_space<vmem>>, vector<4x8x1xf32>,
    %c0_51 = arith.constant 0 : index
    %c0_52 = arith.constant 0 : index
    %c0_53 = arith.constant 0 : index
    %72 = vector.load %arg19[%c0_51, %c0_52, %c0_53] : memref<4x8x8xf32, #tpu.memory_space<vmem>>, vector<4x8x8xf32>
    %73 = vector.broadcast %62 : vector<4x8x1xf32> to vector<4x8x8xf32>
    %74 = arith.mulf %73, %72 : vector<4x8x8xf32>
    %75 = arith.truncf %65 : vector<4x8x8xf32> to vector<4x8x8xbf16>
    "tpu.trace_start"() <{level = 10 : i32, message = "hqk,hkd->hqd"}> : () -> ()
    %cst_54 = arith.constant dense<0.000000e+00> : vector<4x8x8xf32>
    %76 = tpu.matmul %75, %53, %cst_54 {dimension_numbers = #tpu.dot_dimension_numbers<[2], [1], [1], [2], [0, 0, 0, 1, 1, 2], [0], [0]>} : vector<4x8x8xbf16>, vector<4x8x8xbf16>, vector<4x8x8xf32> -> vector<4x8x8xf32>
    "tpu.trace_stop"() : () -> ()
    %77 = arith.addf %74, %76 : vector<4x8x8xf32>
    %c0_55 = arith.constant 0 : index
    %c0_56 = arith.constant 0 : index
    %c0_57 = arith.constant 0 : index
    %78 = vector.load %arg19[%c0_55, %c0_56, %c0_57] : memref<4x8x8xf32, #tpu.memory_space<vmem>>, vector<4x8x8xf32>
    tpu.vector_store %arg19[%c0_55, %c0_56, %c0_57], %77 {strides = array<i32>} : memref<4x8x8xf32, #tpu.memory_space<vmem>>, vector<4x8x8xf32>,
    %c0_58 = arith.constant 0 : index
    %c0_59 = arith.constant 0 : index
    %c0_60 = arith.constant 0 : index
    %79 = vector.load %arg17[%c0_58, %c0_59, %c0_60] : memref<4x8x1xf32, #tpu.memory_space<vmem>>, vector<4x8x1xf32>
    tpu.vector_store %arg17[%c0_58, %c0_59, %c0_60], %60 {strides = array<i32>} : memref<4x8x1xf32, #tpu.memory_space<vmem>>, vector<4x8x1xf32>,
    %c1_i32_61 = arith.constant 1 : i32
    %c0_62 = arith.constant 0 : index
    %c0_63 = arith.constant 0 : index
    %c0_64 = arith.constant 0 : index
    %80 = vector.load %arg19[%c0_62, %c0_63, %c0_64] : memref<4x8x8xf32, #tpu.memory_space<vmem>>, vector<4x8x8xf32>
    %c0_65 = arith.constant 0 : index
    %c0_66 = arith.constant 0 : index
    %c0_67 = arith.constant 0 : index
    %81 = vector.load %arg18[%c0_65, %c0_66, %c0_67] : memref<4x8x1xf32, #tpu.memory_space<vmem>>, vector<4x8x1xf32>
    %82 = tpu.reciprocal %81 {approx = true} : vector<4x8x1xf32> -> vector<4x8x1xf32>
    %83 = vector.broadcast %82 : vector<4x8x1xf32> to vector<4x8x8xf32>
    %84 = arith.mulf %80, %83 : vector<4x8x8xf32>
    %85 = tpu.transpose %84, [1, 0, 2] : vector<4x8x8xf32> -> vector<8x4x8xf32>
    %86 = vector.shape_cast %85 : vector<8x4x8xf32> to vector<8x32xf32>
    %87 = arith.truncf %86 : vector<8x32xf32> to vector<8x32xbf16>
    %c0_68 = arith.constant 0 : index
    %c0_69 = arith.constant 0 : index
    %88 = vector.load %arg4[%c0_68, %c0_69] : memref<32x32xbf16, #tpu.memory_space<vmem>>, vector<32x32xbf16>
    %cst_70 = arith.constant dense<0.000000e+00> : vector<8x32xf32>
    %89 = tpu.matmul %87, %88, %cst_70 {dimension_numbers = #tpu.dot_dimension_numbers<[1], [0], [0], [1], [0, 0, 1, 1], [], []>} : vector<8x32xbf16>, vector<32x32xbf16>, vector<8x32xf32> -> vector<8x32xf32>
    %c0_71 = arith.constant 0 : index
    %c0_72 = arith.constant 0 : index
    %90 = vector.load %arg5[%c0_71, %c0_72] : memref<1x32xf32, #tpu.memory_space<vmem>>, vector<1x32xf32>
    %91 = vector.broadcast %90 : vector<1x32xf32> to vector<8x32xf32>
    %92 = arith.addf %89, %91 : vector<8x32xf32>
    %93 = arith.addf %1, %92 : vector<8x32xf32>
    %cst_73 = arith.constant dense<0.000000e+00> : vector<8xf32>
    %94 = vector.multi_reduction <add>, %93, %cst_73 [1] : vector<8x32xf32> to vector<8xf32>
    %95 = vector.shape_cast %94 : vector<8xf32> to vector<8x1xf32>
    %cst_74 = arith.constant 3.200000e+01 : f32
    %96 = vector.broadcast %cst_74 : f32 to vector<8x1xf32>
    %97 = arith.divf %95, %96 : vector<8x1xf32>
    %98 = vector.broadcast %97 : vector<8x1xf32> to vector<8x32xf32>
    %99 = arith.subf %93, %98 : vector<8x32xf32>
    %100 = arith.mulf %99, %99 : vector<8x32xf32>
    %cst_75 = arith.constant dense<0.000000e+00> : vector<8xf32>
    %101 = vector.multi_reduction <add>, %100, %cst_75 [1] : vector<8x32xf32> to vector<8xf32>
    %102 = vector.shape_cast %101 : vector<8xf32> to vector<8x1xf32>
    %cst_76 = arith.constant 3.200000e+01 : f32
    %103 = vector.broadcast %cst_76 : f32 to vector<8x1xf32>
    %104 = arith.divf %102, %103 : vector<8x1xf32>
    %105 = vector.broadcast %97 : vector<8x1xf32> to vector<8x32xf32>
    %106 = arith.subf %93, %105 : vector<8x32xf32>
    %cst_77 = arith.constant 9.99999974E-6 : f32
    %107 = vector.broadcast %cst_77 : f32 to vector<8x1xf32>
    %108 = arith.addf %104, %107 : vector<8x1xf32>
    %109 = math.rsqrt %108 : vector<8x1xf32>
    %110 = vector.broadcast %109 : vector<8x1xf32> to vector<8x32xf32>
    %111 = arith.mulf %106, %110 : vector<8x32xf32>
    %c0_78 = arith.constant 0 : index
    %c0_79 = arith.constant 0 : index
    %112 = vector.load %arg12[%c0_78, %c0_79] : memref<1x32xf32, #tpu.memory_space<vmem>>, vector<1x32xf32>
    %113 = vector.broadcast %112 : vector<1x32xf32> to vector<8x32xf32>
    %114 = arith.mulf %111, %113 : vector<8x32xf32>
    %c0_80 = arith.constant 0 : index
    %c0_81 = arith.constant 0 : index
    %115 = vector.load %arg13[%c0_80, %c0_81] : memref<1x32xf32, #tpu.memory_space<vmem>>, vector<1x32xf32>
    %116 = vector.broadcast %115 : vector<1x32xf32> to vector<8x32xf32>
    %117 = arith.addf %114, %116 : vector<8x32xf32>
    %118 = arith.truncf %117 : vector<8x32xf32> to vector<8x32xbf16>
    %cst_82 = arith.constant 0.000000e+00 : f32
    %119 = vector.broadcast %cst_82 : f32 to vector<8x32xf32>
    %c0_83 = arith.constant 0 : index
    %c0_84 = arith.constant 0 : index
    %120 = vector.load %arg6[%c0_83, %c0_84] : memref<32x64xbf16, #tpu.memory_space<vmem>>, vector<32x64xbf16>
    %cst_85 = arith.constant dense<0.000000e+00> : vector<8x64xf32>
    %121 = tpu.matmul %118, %120, %cst_85 {dimension_numbers = #tpu.dot_dimension_numbers<[1], [0], [0], [1], [0, 0, 1, 1], [], []>} : vector<8x32xbf16>, vector<32x64xbf16>, vector<8x64xf32> -> vector<8x64xf32>
    %c0_86 = arith.constant 0 : index
    %c0_87 = arith.constant 0 : index
    %122 = vector.load %arg7[%c0_86, %c0_87] : memref<1x64xf32, #tpu.memory_space<vmem>>, vector<1x64xf32>
    %123 = vector.broadcast %122 : vector<1x64xf32> to vector<8x64xf32>
    %124 = arith.addf %121, %123 : vector<8x64xf32>
    %cst_88 = arith.constant 0.000000e+00 : f32
    %125 = vector.broadcast %cst_88 : f32 to vector<8x64xf32>
    %126 = arith.maximumf %124, %125 : vector<8x64xf32>
    %127 = arith.truncf %126 : vector<8x64xf32> to vector<8x64xbf16>
    %c0_89 = arith.constant 0 : index
    %c0_90 = arith.constant 0 : index
    %128 = vector.load %arg8[%c0_89, %c0_90] : memref<64x32xbf16, #tpu.memory_space<vmem>>, vector<64x32xbf16>
    %cst_91 = arith.constant dense<0.000000e+00> : vector<8x32xf32>
    %129 = tpu.matmul %127, %128, %cst_91 {dimension_numbers = #tpu.dot_dimension_numbers<[1], [0], [0], [1], [0, 0, 1, 1], [], []>} : vector<8x64xbf16>, vector<64x32xbf16>, vector<8x32xf32> -> vector<8x32xf32>
    %130 = arith.addf %119, %129 : vector<8x32xf32>
    %c0_92 = arith.constant 0 : index
    %c0_93 = arith.constant 0 : index
    %131 = vector.load %arg9[%c0_92, %c0_93] : memref<1x32xf32, #tpu.memory_space<vmem>>, vector<1x32xf32>
    %132 = vector.broadcast %131 : vector<1x32xf32> to vector<8x32xf32>
    %133 = arith.addf %130, %132 : vector<8x32xf32>
    %134 = arith.addf %93, %133 : vector<8x32xf32>
    %c0_94 = arith.constant 0 : index
    %c0_95 = arith.constant 0 : index
    %c0_96 = arith.constant 0 : index
    %135 = vector.load %arg14[%c0_94, %c0_95, %c0_96] : memref<1x8x32xf32, #tpu.memory_space<vmem>>, vector<1x8x32xf32>
    %136 = vector.shape_cast %135 : vector<1x8x32xf32> to vector<8x32xf32>
    %137 = vector.shape_cast %134 : vector<8x32xf32> to vector<1x8x32xf32>
    tpu.vector_store %arg14[%c0_94, %c0_95, %c0_96], %137 {strides = array<i32>} : memref<1x8x32xf32, #tpu.memory_space<vmem>>, vector<1x8x32xf32>,
    return
  }
  func.func @transform_0(%arg0: i32) -> (i32, i32, i32) {
    %c0_i32 = arith.constant 0 : i32
    %c0_i32_0 = arith.constant 0 : i32
    %c0_i32_1 = arith.constant 0 : i32
    return %arg0, %c0_i32, %c0_i32_0 : i32, i32, i32
  }
  func.func @transform_1(%arg0: i32) -> (i32, i32) {
    %c0_i32 = arith.constant 0 : i32
    %c0_i32_0 = arith.constant 0 : i32
    %c0_i32_1 = arith.constant 0 : i32
    return %c0_i32, %c0_i32_0 : i32, i32
  }
  func.func @transform_2(%arg0: i32) -> (i32, i32) {
    %c0_i32 = arith.constant 0 : i32
    %c0_i32_0 = arith.constant 0 : i32
    %c0_i32_1 = arith.constant 0 : i32
    return %c0_i32, %c0_i32_0 : i32, i32
  }
  func.func @transform_3(%arg0: i32) -> (i32, i32) {
    %c0_i32 = arith.constant 0 : i32
    %c0_i32_0 = arith.constant 0 : i32
    %c0_i32_1 = arith.constant 0 : i32
    return %c0_i32, %c0_i32_0 : i32, i32
  }
  func.func @transform_4(%arg0: i32) -> (i32, i32) {
    %c0_i32 = arith.constant 0 : i32
    %c0_i32_0 = arith.constant 0 : i32
    %c0_i32_1 = arith.constant 0 : i32
    return %c0_i32, %c0_i32_0 : i32, i32
  }
  func.func @transform_5(%arg0: i32) -> (i32, i32) {
    %c0_i32 = arith.constant 0 : i32
    %c0_i32_0 = arith.constant 0 : i32
    %c0_i32_1 = arith.constant 0 : i32
    return %c0_i32, %c0_i32_0 : i32, i32
  }
  func.func @transform_6(%arg0: i32) -> (i32, i32) {
    %c0_i32 = arith.constant 0 : i32
    %c0_i32_0 = arith.constant 0 : i32
    %c0_i32_1 = arith.constant 0 : i32
    return %c0_i32, %c0_i32_0 : i32, i32
  }
  func.func @transform_7(%arg0: i32) -> (i32, i32) {
    %c0_i32 = arith.constant 0 : i32
    %c0_i32_0 = arith.constant 0 : i32
    %c0_i32_1 = arith.constant 0 : i32
    return %c0_i32, %c0_i32_0 : i32, i32
  }
  func.func @transform_8(%arg0: i32) -> (i32, i32) {
    %c0_i32 = arith.constant 0 : i32
    %c0_i32_0 = arith.constant 0 : i32
    %c0_i32_1 = arith.constant 0 : i32
    return %c0_i32, %c0_i32_0 : i32, i32
  }
  func.func @transform_9(%arg0: i32) -> (i32, i32) {
    %c0_i32 = arith.constant 0 : i32
    %c0_i32_0 = arith.constant 0 : i32
    %c0_i32_1 = arith.constant 0 : i32
    return %c0_i32, %c0_i32_0 : i32, i32
  }
  func.func @transform_10(%arg0: i32) -> (i32, i32) {
    %c0_i32 = arith.constant 0 : i32
    %c0_i32_0 = arith.constant 0 : i32
    %c0_i32_1 = arith.constant 0 : i32
    return %c0_i32, %c0_i32_0 : i32, i32
  }
  func.func @transform_11(%arg0: i32) -> (i32, i32) {
    %c0_i32 = arith.constant 0 : i32
    %c0_i32_0 = arith.constant 0 : i32
    %c0_i32_1 = arith.constant 0 : i32
    return %c0_i32, %c0_i32_0 : i32, i32
  }
  func.func @transform_12(%arg0: i32) -> (i32, i32) {
    %c0_i32 = arith.constant 0 : i32
    %c0_i32_0 = arith.constant 0 : i32
    %c0_i32_1 = arith.constant 0 : i32
    return %c0_i32, %c0_i32_0 : i32, i32
  }
  func.func @transform_13(%arg0: i32) -> (i32, i32, i32) {
    %c0_i32 = arith.constant 0 : i32
    %c0_i32_0 = arith.constant 0 : i32
    %c0_i32_1 = arith.constant 0 : i32
    return %arg0, %c0_i32, %c0_i32_0 : i32, i32, i32
  }
}

module attributes {stable_mosaic.version = 11 : i64} {
  func.func @_transformer_layer_kernel(%arg0: i32, %arg1: memref<1x8x32xf32, #tpu.memory_space<vmem>>, %arg2: memref<32x96xbf16, #tpu.memory_space<vmem>>, %arg3: memref<1x96xf32, #tpu.memory_space<vmem>>, %arg4: memref<32x32xbf16, #tpu.memory_space<vmem>>, %arg5: memref<1x32xf32, #tpu.memory_space<vmem>>, %arg6: memref<32x64xbf16, #tpu.memory_space<vmem>>, %arg7: memref<1x64xf32, #tpu.memory_space<vmem>>, %arg8: memref<64x32xbf16, #tpu.memory_space<vmem>>, %arg9: memref<1x32xf32, #tpu.memory_space<vmem>>, %arg10: memref<1x32xf32, #tpu.memory_space<vmem>>, %arg11: memref<1x32xf32, #tpu.memory_space<vmem>>, %arg12: memref<1x32xf32, #tpu.memory_space<vmem>>, %arg13: memref<1x32xf32, #tpu.memory_space<vmem>>, %arg14: memref<1x8x32xf32, #tpu.memory_space<vmem>>, %arg15: memref<4x8x8xbf16, #tpu.memory_space<vmem>>, %arg16: memref<4x8x8xbf16, #tpu.memory_space<vmem>>, %arg17: memref<4x8x1xf32, #tpu.memory_space<vmem>>, %arg18: memref<4x8x1xf32, #tpu.memory_space<vmem>>, %arg19: memref<4x8x8xf32, #tpu.memory_space<vmem>>) attributes {dimension_semantics = [#tpu.dimension_semantics<parallel>], iteration_bounds = array<i64: 2>, scalar_prefetch = 0 : i64, scratch_operands = 5 : i64, tpu.core_type = #tpu.core_type<tc>, window_params = [{transform_indices = @transform_0, window_bounds = array<i64: 1, 8, 32>}, {pipeline_mode = #tpu.pipeline_mode<synchronous>, transform_indices = @transform_1, window_bounds = array<i64: 32, 96>}, {pipeline_mode = #tpu.pipeline_mode<synchronous>, transform_indices = @transform_2, window_bounds = array<i64: 1, 96>}, {pipeline_mode = #tpu.pipeline_mode<synchronous>, transform_indices = @transform_3, window_bounds = array<i64: 32, 32>}, {pipeline_mode = #tpu.pipeline_mode<synchronous>, transform_indices = @transform_4, window_bounds = array<i64: 1, 32>}, {pipeline_mode = #tpu.pipeline_mode<synchronous>, transform_indices = @transform_5, window_bounds = array<i64: 32, 64>}, {pipeline_mode = #tpu.pipeline_mode<synchronous>, transform_indices = @transform_6, window_bounds = array<i64: 1, 64>}, {pipeline_mode = #tpu.pipeline_mode<synchronous>, transform_indices = @transform_7, window_bounds = array<i64: 64, 32>}, {pipeline_mode = #tpu.pipeline_mode<synchronous>, transform_indices = @transform_8, window_bounds = array<i64: 1, 32>}, {pipeline_mode = #tpu.pipeline_mode<synchronous>, transform_indices = @transform_9, window_bounds = array<i64: 1, 32>}, {pipeline_mode = #tpu.pipeline_mode<synchronous>, transform_indices = @transform_10, window_bounds = array<i64: 1, 32>}, {pipeline_mode = #tpu.pipeline_mode<synchronous>, transform_indices = @transform_11, window_bounds = array<i64: 1, 32>}, {pipeline_mode = #tpu.pipeline_mode<synchronous>, transform_indices = @transform_12, window_bounds = array<i64: 1, 32>}, {transform_indices = @transform_13, window_bounds = array<i64: 1, 8, 32>}]} {
    %c0 = arith.constant 0 : index
    %c0_0 = arith.constant 0 : index
    %c0_1 = arith.constant 0 : index
    %0 = vector.load %arg1[%c0, %c0_0, %c0_1] : memref<1x8x32xf32, #tpu.memory_space<vmem>>, vector<1x8x32xf32>
    %1 = vector.shape_cast %0 : vector<1x8x32xf32> to vector<8x32xf32>
    %cst = arith.constant dense<0.000000e+00> : vector<8xf32>
    %2 = vector.multi_reduction <add>, %1, %cst [1] : vector<8x32xf32> to vector<8xf32>
    %3 = vector.shape_cast %2 : vector<8xf32> to vector<8x1xf32>
    %cst_2 = arith.constant 3.200000e+01 : f32
    %4 = vector.broadcast %cst_2 : f32 to vector<8x1xf32>
    %5 = arith.divf %3, %4 : vector<8x1xf32>
    %6 = vector.broadcast %5 : vector<8x1xf32> to vector<8x32xf32>
    %7 = arith.subf %1, %6 : vector<8x32xf32>
    %8 = arith.mulf %7, %7 : vector<8x32xf32>
    %cst_3 = arith.constant dense<0.000000e+00> : vector<8xf32>
    %9 = vector.multi_reduction <add>, %8, %cst_3 [1] : vector<8x32xf32> to vector<8xf32>
    %10 = vector.shape_cast %9 : vector<8xf32> to vector<8x1xf32>
    %cst_4 = arith.constant 3.200000e+01 : f32
    %11 = vector.broadcast %cst_4 : f32 to vector<8x1xf32>
    %12 = arith.divf %10, %11 : vector<8x1xf32>
    %13 = vector.broadcast %5 : vector<8x1xf32> to vector<8x32xf32>
    %14 = arith.subf %1, %13 : vector<8x32xf32>
    %cst_5 = arith.constant 9.99999974E-6 : f32
    %15 = vector.broadcast %cst_5 : f32 to vector<8x1xf32>
    %16 = arith.addf %12, %15 : vector<8x1xf32>
    %17 = math.rsqrt %16 : vector<8x1xf32>
    %18 = vector.broadcast %17 : vector<8x1xf32> to vector<8x32xf32>
    %19 = arith.mulf %14, %18 : vector<8x32xf32>
    %c0_6 = arith.constant 0 : index
    %c0_7 = arith.constant 0 : index
    %20 = vector.load %arg10[%c0_6, %c0_7] : memref<1x32xf32, #tpu.memory_space<vmem>>, vector<1x32xf32>
    %21 = vector.broadcast %20 : vector<1x32xf32> to vector<8x32xf32>
    %22 = arith.mulf %19, %21 : vector<8x32xf32>
    %c0_8 = arith.constant 0 : index
    %c0_9 = arith.constant 0 : index
    %23 = vector.load %arg11[%c0_8, %c0_9] : memref<1x32xf32, #tpu.memory_space<vmem>>, vector<1x32xf32>
    %24 = vector.broadcast %23 : vector<1x32xf32> to vector<8x32xf32>
    %25 = arith.addf %22, %24 : vector<8x32xf32>
    %26 = arith.truncf %25 : vector<8x32xf32> to vector<8x32xbf16>
    %c0_10 = arith.constant 0 : index
    %c0_11 = arith.constant 0 : index
    %27 = vector.load %arg2[%c0_10, %c0_11] : memref<32x96xbf16, #tpu.memory_space<vmem>>, vector<32x96xbf16>
    %cst_12 = arith.constant dense<0.000000e+00> : vector<8x96xf32>
    %28 = tpu.matmul %26, %27, %cst_12 {dimension_numbers = #tpu.dot_dimension_numbers<[1], [0], [0], [1], [0, 0, 1, 1], [], []>} : vector<8x32xbf16>, vector<32x96xbf16>, vector<8x96xf32> -> vector<8x96xf32>
    %c0_13 = arith.constant 0 : index
    %c0_14 = arith.constant 0 : index
    %29 = vector.load %arg3[%c0_13, %c0_14] : memref<1x96xf32, #tpu.memory_space<vmem>>, vector<1x96xf32>
    %30 = vector.broadcast %29 : vector<1x96xf32> to vector<8x96xf32>
    %31 = arith.addf %28, %30 : vector<8x96xf32>
    %32 = arith.truncf %31 : vector<8x96xf32> to vector<8x96xbf16>
    %33 = vector.shape_cast %32 : vector<8x96xbf16> to vector<8x12x8xbf16>
    %34 = tpu.transpose %33, [1, 0, 2] : vector<8x12x8xbf16> -> vector<12x8x8xbf16>
    %35 = vector.extract_strided_slice %34 {offsets = [0, 0, 0], sizes = [4, 8, 8], strides = [1, 1, 1]} : vector<12x8x8xbf16> to vector<4x8x8xbf16>
    %36 = vector.extract_strided_slice %34 {offsets = [4, 0, 0], sizes = [4, 8, 8], strides = [1, 1, 1]} : vector<12x8x8xbf16> to vector<4x8x8xbf16>
    %c0_15 = arith.constant 0 : index
    %c0_16 = arith.constant 0 : index
    %c0_17 = arith.constant 0 : index
    %37 = vector.load %arg15[%c0_15, %c0_16, %c0_17] : memref<4x8x8xbf16, #tpu.memory_space<vmem>>, vector<4x8x8xbf16>
    tpu.vector_store %arg15[%c0_15, %c0_16, %c0_17], %36 {strides = array<i32>} : memref<4x8x8xbf16, #tpu.memory_space<vmem>>, vector<4x8x8xbf16>,
    %38 = vector.extract_strided_slice %34 {offsets = [8, 0, 0], sizes = [4, 8, 8], strides = [1, 1, 1]} : vector<12x8x8xbf16> to vector<4x8x8xbf16>
    %c0_18 = arith.constant 0 : index
    %c0_19 = arith.constant 0 : index
    %c0_20 = arith.constant 0 : index
    %39 = vector.load %arg16[%c0_18, %c0_19, %c0_20] : memref<4x8x8xbf16, #tpu.memory_space<vmem>>, vector<4x8x8xbf16>
    tpu.vector_store %arg16[%c0_18, %c0_19, %c0_20], %38 {strides = array<i32>} : memref<4x8x8xbf16, #tpu.memory_space<vmem>>, vector<4x8x8xbf16>,
    %cst_21 = arith.constant 0xFF800000 : f32
    %40 = vector.broadcast %cst_21 : f32 to vector<4x8x1xf32>
    %c0_22 = arith.constant 0 : index
    %c0_23 = arith.constant 0 : index
    %c0_24 = arith.constant 0 : index
    %41 = vector.load %arg17[%c0_22, %c0_23, %c0_24] : memref<4x8x1xf32, #tpu.memory_space<vmem>>, vector<4x8x1xf32>
    tpu.vector_store %arg17[%c0_22, %c0_23, %c0_24], %40 {strides = array<i32>} : memref<4x8x1xf32, #tpu.memory_space<vmem>>, vector<4x8x1xf32>,
    %cst_25 = arith.constant 0.000000e+00 : f32
    %42 = vector.broadcast %cst_25 : f32 to vector<4x8x1xf32>
    %c0_26 = arith.constant 0 : index
    %c0_27 = arith.constant 0 : index
    %c0_28 = arith.constant 0 : index
    %43 = vector.load %arg18[%c0_26, %c0_27, %c0_28] : memref<4x8x1xf32, #tpu.memory_space<vmem>>, vector<4x8x1xf32>
    tpu.vector_store %arg18[%c0_26, %c0_27, %c0_28], %42 {strides = array<i32>} : memref<4x8x1xf32, #tpu.memory_space<vmem>>, vector<4x8x1xf32>,
    %cst_29 = arith.constant 0.000000e+00 : f32
    %44 = vector.broadcast %cst_29 : f32 to vector<4x8x8xf32>
    %c0_30 = arith.constant 0 : index
    %c0_31 = arith.constant 0 : index
    %c0_32 = arith.constant 0 : index
    %45 = vector.load %arg19[%c0_30, %c0_31, %c0_32] : memref<4x8x8xf32, #tpu.memory_space<vmem>>, vector<4x8x8xf32>
    tpu.vector_store %arg19[%c0_30, %c0_31, %c0_32], %44 {strides = array<i32>} : memref<4x8x8xf32, #tpu.memory_space<vmem>>, vector<4x8x8xf32>,
    %c0_i32 = arith.constant 0 : i32
    %c1_i32 = arith.constant 1 : i32
    %46 = arith.muli %c0_i32, %c1_i32 : i32
    %c0_i32_33 = arith.constant 0 : i32
    %47 = arith.addi %c0_i32_33, %46 : i32
    %c8_i32 = arith.constant 8 : i32
    %48 = arith.muli %47, %c8_i32 : i32
    %49 = tpu.assume_multiple %48, 8 : i32
    %c0_34 = arith.constant 0 : index
    %50 = arith.index_cast %49 : i32 to index
    %c0_35 = arith.constant 0 : index
    %51 = vector.load %arg15[%c0_34, %50, %c0_35] : memref<4x8x8xbf16, #tpu.memory_space<vmem>>, vector<4x8x8xbf16>
    %c0_36 = arith.constant 0 : index
    %52 = arith.index_cast %49 : i32 to index
    %c0_37 = arith.constant 0 : index
    %53 = vector.load %arg16[%c0_36, %52, %c0_37] : memref<4x8x8xbf16, #tpu.memory_space<vmem>>, vector<4x8x8xbf16>
    "tpu.trace_start"() <{level = 10 : i32, message = "hqd,hkd->hqk"}> : () -> ()
    %cst_38 = arith.constant dense<0.000000e+00> : vector<4x8x8xf32>
    %54 = tpu.matmul %35, %51, %cst_38 {dimension_numbers = #tpu.dot_dimension_numbers<[2], [2], [1], [1], [0, 0, 0, 1, 1, 1], [0], [0]>} : vector<4x8x8xbf16>, vector<4x8x8xbf16>, vector<4x8x8xf32> -> vector<4x8x8xf32>
    "tpu.trace_stop"() : () -> ()
    %cst_39 = arith.constant 0.353553385 : f32
    %55 = vector.broadcast %cst_39 : f32 to vector<4x8x8xf32>
    %56 = arith.mulf %54, %55 : vector<4x8x8xf32>
    %c0_40 = arith.constant 0 : index
    %c0_41 = arith.constant 0 : index
    %c0_42 = arith.constant 0 : index
    %57 = vector.load %arg17[%c0_40, %c0_41, %c0_42] : memref<4x8x1xf32, #tpu.memory_space<vmem>>, vector<4x8x1xf32>
    %cst_43 = arith.constant dense<0xFF800000> : vector<4x8xf32>
    %58 = vector.multi_reduction <maximumf>, %56, %cst_43 [2] : vector<4x8x8xf32> to vector<4x8xf32>
    %59 = vector.shape_cast %58 : vector<4x8xf32> to vector<4x8x1xf32>
    %60 = arith.maximumf %57, %59 : vector<4x8x1xf32>
    %61 = arith.subf %57, %60 : vector<4x8x1xf32>
    %62 = math.exp %61 : vector<4x8x1xf32>
    %63 = vector.broadcast %60 : vector<4x8x1xf32> to vector<4x8x8xf32>
    %64 = arith.subf %56, %63 : vector<4x8x8xf32>
    %65 = math.exp %64 : vector<4x8x8xf32>
    %c0_44 = arith.constant 0 : index
    %c0_45 = arith.constant 0 : index
    %c0_46 = arith.constant 0 : index
    %66 = vector.load %arg18[%c0_44, %c0_45, %c0_46] : memref<4x8x1xf32, #tpu.memory_space<vmem>>, vector<4x8x1xf32>
    %67 = arith.mulf %62, %66 : vector<4x8x1xf32>
    %cst_47 = arith.constant dense<0.000000e+00> : vector<4x8xf32>
    %68 = vector.multi_reduction <add>, %65, %cst_47 [2] : vector<4x8x8xf32> to vector<4x8xf32>
    %69 = vector.shape_cast %68 : vector<4x8xf32> to vector<4x8x1xf32>
    %70 = arith.addf %67, %69 : vector<4x8x1xf32>
    %c0_48 = arith.constant 0 : index
    %c0_49 = arith.constant 0 : index
    %c0_50 = arith.constant 0 : index
    %71 = vector.load %arg18[%c0_48, %c0_49, %c0_50] : memref<4x8x1xf32, #tpu.memory_space<vmem>>, vector<4x8x1xf32>
    tpu.vector_store %arg18[%c0_48, %c0_49, %c0_50], %70 {strides = array<i32>} : memref<4x8x1xf32, #tpu.memory_space<vmem>>, vector<4x8x1xf32>,
    %c0_51 = arith.constant 0 : index
    %c0_52 = arith.constant 0 : index
    %c0_53 = arith.constant 0 : index
    %72 = vector.load %arg19[%c0_51, %c0_52, %c0_53] : memref<4x8x8xf32, #tpu.memory_space<vmem>>, vector<4x8x8xf32>
    %73 = vector.broadcast %62 : vector<4x8x1xf32> to vector<4x8x8xf32>
    %74 = arith.mulf %73, %72 : vector<4x8x8xf32>
    %75 = arith.truncf %65 : vector<4x8x8xf32> to vector<4x8x8xbf16>
    "tpu.trace_start"() <{level = 10 : i32, message = "hqk,hkd->hqd"}> : () -> ()
    %cst_54 = arith.constant dense<0.000000e+00> : vector<4x8x8xf32>
    %76 = tpu.matmul %75, %53, %cst_54 {dimension_numbers = #tpu.dot_dimension_numbers<[2], [1], [1], [2], [0, 0, 0, 1, 1, 2], [0], [0]>} : vector<4x8x8xbf16>, vector<4x8x8xbf16>, vector<4x8x8xf32> -> vector<4x8x8xf32>
    "tpu.trace_stop"() : () -> ()
    %77 = arith.addf %74, %76 : vector<4x8x8xf32>
    %c0_55 = arith.constant 0 : index
    %c0_56 = arith.constant 0 : index
    %c0_57 = arith.constant 0 : index
    %78 = vector.load %arg19[%c0_55, %c0_56, %c0_57] : memref<4x8x8xf32, #tpu.memory_space<vmem>>, vector<4x8x8xf32>
    tpu.vector_store %arg19[%c0_55, %c0_56, %c0_57], %77 {strides = array<i32>} : memref<4x8x8xf32, #tpu.memory_space<vmem>>, vector<4x8x8xf32>,
    %c0_58 = arith.constant 0 : index
    %c0_59 = arith.constant 0 : index
    %c0_60 = arith.constant 0 : index
    %79 = vector.load %arg17[%c0_58, %c0_59, %c0_60] : memref<4x8x1xf32, #tpu.memory_space<vmem>>, vector<4x8x1xf32>
    tpu.vector_store %arg17[%c0_58, %c0_59, %c0_60], %60 {strides = array<i32>} : memref<4x8x1xf32, #tpu.memory_space<vmem>>, vector<4x8x1xf32>,
    %c1_i32_61 = arith.constant 1 : i32
    %c0_62 = arith.constant 0 : index
    %c0_63 = arith.constant 0 : index
    %c0_64 = arith.constant 0 : index
    %80 = vector.load %arg19[%c0_62, %c0_63, %c0_64] : memref<4x8x8xf32, #tpu.memory_space<vmem>>, vector<4x8x8xf32>
    %c0_65 = arith.constant 0 : index
    %c0_66 = arith.constant 0 : index
    %c0_67 = arith.constant 0 : index
    %81 = vector.load %arg18[%c0_65, %c0_66, %c0_67] : memref<4x8x1xf32, #tpu.memory_space<vmem>>, vector<4x8x1xf32>
    %82 = tpu.reciprocal %81 {approx = true} : vector<4x8x1xf32> -> vector<4x8x1xf32>
    %83 = vector.broadcast %82 : vector<4x8x1xf32> to vector<4x8x8xf32>
    %84 = arith.mulf %80, %83 : vector<4x8x8xf32>
    %85 = tpu.transpose %84, [1, 0, 2] : vector<4x8x8xf32> -> vector<8x4x8xf32>
    %86 = vector.shape_cast %85 : vector<8x4x8xf32> to vector<8x32xf32>
    %87 = arith.truncf %86 : vector<8x32xf32> to vector<8x32xbf16>
    %c0_68 = arith.constant 0 : index
    %c0_69 = arith.constant 0 : index
    %88 = vector.load %arg4[%c0_68, %c0_69] : memref<32x32xbf16, #tpu.memory_space<vmem>>, vector<32x32xbf16>
    %cst_70 = arith.constant dense<0.000000e+00> : vector<8x32xf32>
    %89 = tpu.matmul %87, %88, %cst_70 {dimension_numbers = #tpu.dot_dimension_numbers<[1], [0], [0], [1], [0, 0, 1, 1], [], []>} : vector<8x32xbf16>, vector<32x32xbf16>, vector<8x32xf32> -> vector<8x32xf32>
    %c0_71 = arith.constant 0 : index
    %c0_72 = arith.constant 0 : index
    %90 = vector.load %arg5[%c0_71, %c0_72] : memref<1x32xf32, #tpu.memory_space<vmem>>, vector<1x32xf32>
    %91 = vector.broadcast %90 : vector<1x32xf32> to vector<8x32xf32>
    %92 = arith.addf %89, %91 : vector<8x32xf32>
    %93 = arith.addf %1, %92 : vector<8x32xf32>
    %cst_73 = arith.constant dense<0.000000e+00> : vector<8xf32>
    %94 = vector.multi_reduction <add>, %93, %cst_73 [1] : vector<8x32xf32> to vector<8xf32>
    %95 = vector.shape_cast %94 : vector<8xf32> to vector<8x1xf32>
    %cst_74 = arith.constant 3.200000e+01 : f32
    %96 = vector.broadcast %cst_74 : f32 to vector<8x1xf32>
    %97 = arith.divf %95, %96 : vector<8x1xf32>
    %98 = vector.broadcast %97 : vector<8x1xf32> to vector<8x32xf32>
    %99 = arith.subf %93, %98 : vector<8x32xf32>
    %100 = arith.mulf %99, %99 : vector<8x32xf32>
    %cst_75 = arith.constant dense<0.000000e+00> : vector<8xf32>
    %101 = vector.multi_reduction <add>, %100, %cst_75 [1] : vector<8x32xf32> to vector<8xf32>
    %102 = vector.shape_cast %101 : vector<8xf32> to vector<8x1xf32>
    %cst_76 = arith.constant 3.200000e+01 : f32
    %103 = vector.broadcast %cst_76 : f32 to vector<8x1xf32>
    %104 = arith.divf %102, %103 : vector<8x1xf32>
    %105 = vector.broadcast %97 : vector<8x1xf32> to vector<8x32xf32>
    %106 = arith.subf %93, %105 : vector<8x32xf32>
    %cst_77 = arith.constant 9.99999974E-6 : f32
    %107 = vector.broadcast %cst_77 : f32 to vector<8x1xf32>
    %108 = arith.addf %104, %107 : vector<8x1xf32>
    %109 = math.rsqrt %108 : vector<8x1xf32>
    %110 = vector.broadcast %109 : vector<8x1xf32> to vector<8x32xf32>
    %111 = arith.mulf %106, %110 : vector<8x32xf32>
    %c0_78 = arith.constant 0 : index
    %c0_79 = arith.constant 0 : index
    %112 = vector.load %arg12[%c0_78, %c0_79] : memref<1x32xf32, #tpu.memory_space<vmem>>, vector<1x32xf32>
    %113 = vector.broadcast %112 : vector<1x32xf32> to vector<8x32xf32>
    %114 = arith.mulf %111, %113 : vector<8x32xf32>
    %c0_80 = arith.constant 0 : index
    %c0_81 = arith.constant 0 : index
    %115 = vector.load %arg13[%c0_80, %c0_81] : memref<1x32xf32, #tpu.memory_space<vmem>>, vector<1x32xf32>
    %116 = vector.broadcast %115 : vector<1x32xf32> to vector<8x32xf32>
    %117 = arith.addf %114, %116 : vector<8x32xf32>
    %118 = arith.truncf %117 : vector<8x32xf32> to vector<8x32xbf16>
    %cst_82 = arith.constant 0.000000e+00 : f32
    %119 = vector.broadcast %cst_82 : f32 to vector<8x32xf32>
    %c0_83 = arith.constant 0 : index
    %c0_84 = arith.constant 0 : index
    %120 = vector.load %arg6[%c0_83, %c0_84] : memref<32x64xbf16, #tpu.memory_space<vmem>>, vector<32x64xbf16>
    %cst_85 = arith.constant dense<0.000000e+00> : vector<8x64xf32>
    %121 = tpu.matmul %118, %120, %cst_85 {dimension_numbers = #tpu.dot_dimension_numbers<[1], [0], [0], [1], [0, 0, 1, 1], [], []>} : vector<8x32xbf16>, vector<32x64xbf16>, vector<8x64xf32> -> vector<8x64xf32>
    %c0_86 = arith.constant 0 : index
    %c0_87 = arith.constant 0 : index
    %122 = vector.load %arg7[%c0_86, %c0_87] : memref<1x64xf32, #tpu.memory_space<vmem>>, vector<1x64xf32>
    %123 = vector.broadcast %122 : vector<1x64xf32> to vector<8x64xf32>
    %124 = arith.addf %121, %123 : vector<8x64xf32>
    %cst_88 = arith.constant 0.000000e+00 : f32
    %125 = vector.broadcast %cst_88 : f32 to vector<8x64xf32>
    %126 = arith.maximumf %124, %125 : vector<8x64xf32>
    %127 = arith.truncf %126 : vector<8x64xf32> to vector<8x64xbf16>
    %c0_89 = arith.constant 0 : index
    %c0_90 = arith.constant 0 : index
    %128 = vector.load %arg8[%c0_89, %c0_90] : memref<64x32xbf16, #tpu.memory_space<vmem>>, vector<64x32xbf16>
    %cst_91 = arith.constant dense<0.000000e+00> : vector<8x32xf32>
    %129 = tpu.matmul %127, %128, %cst_91 {dimension_numbers = #tpu.dot_dimension_numbers<[1], [0], [0], [1], [0, 0, 1, 1], [], []>} : vector<8x64xbf16>, vector<64x32xbf16>, vector<8x32xf32> -> vector<8x32xf32>
    %130 = arith.addf %119, %129 : vector<8x32xf32>
    %c0_92 = arith.constant 0 : index
    %c0_93 = arith.constant 0 : index
    %131 = vector.load %arg9[%c0_92, %c0_93] : memref<1x32xf32, #tpu.memory_space<vmem>>, vector<1x32xf32>
    %132 = vector.broadcast %131 : vector<1x32xf32> to vector<8x32xf32>
    %133 = arith.addf %130, %132 : vector<8x32xf32>
    %134 = arith.addf %93, %133 : vector<8x32xf32>
    %c0_94 = arith.constant 0 : index
    %c0_95 = arith.constant 0 : index
    %c0_96 = arith.constant 0 : index
    %135 = vector.load %arg14[%c0_94, %c0_95, %c0_96] : memref<1x8x32xf32, #tpu.memory_space<vmem>>, vector<1x8x32xf32>
    %136 = vector.shape_cast %135 : vector<1x8x32xf32> to vector<8x32xf32>
    %137 = vector.shape_cast %134 : vector<8x32xf32> to vector<1x8x32xf32>
    tpu.vector_store %arg14[%c0_94, %c0_95, %c0_96], %137 {strides = array<i32>} : memref<1x8x32xf32, #tpu.memory_space<vmem>>, vector<1x8x32xf32>,
    return
  }
  func.func @transform_0(%arg0: i32) -> (i32, i32, i32) {
    %c0_i32 = arith.constant 0 : i32
    %c0_i32_0 = arith.constant 0 : i32
    %c0_i32_1 = arith.constant 0 : i32
    return %arg0, %c0_i32, %c0_i32_0 : i32, i32, i32
  }
  func.func @transform_1(%arg0: i32) -> (i32, i32) {
    %c0_i32 = arith.constant 0 : i32
    %c0_i32_0 = arith.constant 0 : i32
    %c0_i32_1 = arith.constant 0 : i32
    return %c0_i32, %c0_i32_0 : i32, i32
  }
  func.func @transform_2(%arg0: i32) -> (i32, i32) {
    %c0_i32 = arith.constant 0 : i32
    %c0_i32_0 = arith.constant 0 : i32
    %c0_i32_1 = arith.constant 0 : i32
    return %c0_i32, %c0_i32_0 : i32, i32
  }
  func.func @transform_3(%arg0: i32) -> (i32, i32) {
    %c0_i32 = arith.constant 0 : i32
    %c0_i32_0 = arith.constant 0 : i32
    %c0_i32_1 = arith.constant 0 : i32
    return %c0_i32, %c0_i32_0 : i32, i32
  }
  func.func @transform_4(%arg0: i32) -> (i32, i32) {
    %c0_i32 = arith.constant 0 : i32
    %c0_i32_0 = arith.constant 0 : i32
    %c0_i32_1 = arith.constant 0 : i32
    return %c0_i32, %c0_i32_0 : i32, i32
  }
  func.func @transform_5(%arg0: i32) -> (i32, i32) {
    %c0_i32 = arith.constant 0 : i32
    %c0_i32_0 = arith.constant 0 : i32
    %c0_i32_1 = arith.constant 0 : i32
    return %c0_i32, %c0_i32_0 : i32, i32
  }
  func.func @transform_6(%arg0: i32) -> (i32, i32) {
    %c0_i32 = arith.constant 0 : i32
    %c0_i32_0 = arith.constant 0 : i32
    %c0_i32_1 = arith.constant 0 : i32
    return %c0_i32, %c0_i32_0 : i32, i32
  }
  func.func @transform_7(%arg0: i32) -> (i32, i32) {
    %c0_i32 = arith.constant 0 : i32
    %c0_i32_0 = arith.constant 0 : i32
    %c0_i32_1 = arith.constant 0 : i32
    return %c0_i32, %c0_i32_0 : i32, i32
  }
  func.func @transform_8(%arg0: i32) -> (i32, i32) {
    %c0_i32 = arith.constant 0 : i32
    %c0_i32_0 = arith.constant 0 : i32
    %c0_i32_1 = arith.constant 0 : i32
    return %c0_i32, %c0_i32_0 : i32, i32
  }
  func.func @transform_9(%arg0: i32) -> (i32, i32) {
    %c0_i32 = arith.constant 0 : i32
    %c0_i32_0 = arith.constant 0 : i32
    %c0_i32_1 = arith.constant 0 : i32
    return %c0_i32, %c0_i32_0 : i32, i32
  }
  func.func @transform_10(%arg0: i32) -> (i32, i32) {
    %c0_i32 = arith.constant 0 : i32
    %c0_i32_0 = arith.constant 0 : i32
    %c0_i32_1 = arith.constant 0 : i32
    return %c0_i32, %c0_i32_0 : i32, i32
  }
  func.func @transform_11(%arg0: i32) -> (i32, i32) {
    %c0_i32 = arith.constant 0 : i32
    %c0_i32_0 = arith.constant 0 : i32
    %c0_i32_1 = arith.constant 0 : i32
    return %c0_i32, %c0_i32_0 : i32, i32
  }
  func.func @transform_12(%arg0: i32) -> (i32, i32) {
    %c0_i32 = arith.constant 0 : i32
    %c0_i32_0 = arith.constant 0 : i32
    %c0_i32_1 = arith.constant 0 : i32
    return %c0_i32, %c0_i32_0 : i32, i32
  }
  func.func @transform_13(%arg0: i32) -> (i32, i32, i32) {
    %c0_i32 = arith.constant 0 : i32
    %c0_i32_0 = arith.constant 0 : i32
    %c0_i32_1 = arith.constant 0 : i32
    return %arg0, %c0_i32, %c0_i32_0 : i32, i32, i32
  }
}

</mosaic_0001>

<bundles_post_ra>
// kernel: tpu_custom_call.1
= control target key start
LH: loop header
LB: loop body
LE: loop exit
PB: predicated region body
PF: predicated region fallthrough
CT: control target
= control target key end

     0   :  { %s2370_s0 = inlined_call_operand.vmem [shape: f32[2,8,32], index: 0, kind: input, shape index: {}]   ;;  %s2371_s1 = inlined_call_operand.vmem [shape: bf16[32,96], index: 1, kind: input, shape index: {}]   ;;  %s2372_s2 = inlined_call_operand.vmem [shape: f32[1,96], index: 2, kind: input, shape index: {}]   ;;  %s2373_s3 = inlined_call_operand.vmem [shape: bf16[32,32], index: 3, kind: input, shape index: {}]   ;;  %s2374_s4 = inlined_call_operand.vmem [shape: f32[1,32], index: 4, kind: input, shape index: {}]   ;;  %s2375_s5 = inlined_call_operand.hbm [shape: bf16[32,64], index: 5, kind: input, shape index: {}]   ;;  %s2376_s6 = inlined_call_operand.vmem [shape: f32[1,64], index: 6, kind: input, shape index: {}]   ;;  %s2377_s7 = inlined_call_operand.vmem [shape: bf16[64,32], index: 7, kind: input, shape index: {}]   ;;  %s2378_s8 = inlined_call_operand.vmem [shape: f32[1,32], index: 8, kind: input, shape index: {}]   ;;  %s2379_s9 = inlined_call_operand.vmem [shape: f32[1,32], index: 9, kind: input, shape index: {}]   ;;  %s2380_s10 = inlined_call_operand.vmem [shape: f32[1,32], index: 10, kind: input, shape index: {}]   ;;  %s2381_s11 = inlined_call_operand.vmem [shape: f32[1,32], index: 11, kind: input, shape index: {}]   ;;  %s2382_s12 = inlined_call_operand.vmem [shape: f32[1,32], index: 12, kind: input, shape index: {}]   ;;  %s2383_s13 = inlined_call_operand.hbm [shape: f32[2,8,32], index: 13, kind: output, shape index: {}]  }
   0x1   :  { %2384 = sst [smem:[#allocation13_spill]] %s2370_s0 }
   0x2   :  { %2385 = sst [smem:[#allocation14_spill]] %s2371_s1 }
   0x3   :  { %2386 = sst [smem:[#allocation15_spill]] %s2372_s2 }
   0x4   :  { %2387 = sst [smem:[#allocation16_spill]] %s2375_s5 }
   0x5   :  { %18 = vsyncpa [#allocation8], 0 }
   0x6   :  { %19 = vsyncpa [#allocation9], 0 }
   0x7   :  { %21 = vsyncpa [#allocation9 + $0x1], 0  ;;  %s1963_s25 = smov 0   ;;  %s1965_s26 = smov 0  }
   0x8   :  { %s1967_s27 = smov 0   ;;  %s1969_s28 = smov 0  }
   0x9 LB: > { %s1984_s29 = sadd.s32 4294967295, %s1868_s28   ;;  %s1584_s30 = sadd.s32 4294967294, %s1868_s28   ;;  %s1868_s28 = sphi %s1969_s28, %s2397_s28   ;;  %s1864_s27 = sphi %s1967_s27, %s2396_s27   ;;  %s1860_s26 = sphi %s1965_s26, %s2395_s26   ;;  %s1856_s25 = sphi %s1963_s25, %s2394_s25  }
   0xa   : > { %s1988_s14 = sadd.s32 1, %s1868_s28   ;;  %s312_s15 = sadd.s32 1, %s1864_s27 }
   0xb   : > { %s309_s16 = ssub.s32 %s1868_s28, %s1988_s14  ;;  %p322_p0 = scmp.ne.s32.totalorder %s1864_s27, %s1860_s26 }
   0xc   : > { %p310_p1 = scmp.eq.s32.totalorder %s309_s16, 0  ;;  %p323_p2 = scmp.eq.s32.totalorder %s1984_s29, 1 }
   0xd   : > { %p328_p3 = scmp.ne.s32.totalorder %s1860_s26, %s1856_s25  ;;  %p329_p4 = scmp.eq.s32.totalorder %s1584_s30, 1 }
   0xe   : > { %s1999_s17 = scalar_select %p310_p1, %s1864_s27, %s312_s15  }
   0xf   : > { %p2001_p5 = por %p323_p2, %p322_p0  ;;  %p2005_p6 = por %p329_p4, %p328_p3 }
  0x10   : > { %p1585_p7 = scmp.ge.s32.totalorder %s1868_s28, 1  ;;  %p336_p8 = scmp.lt.s32.totalorder %s1868_s28, 3 }
  0x11   : > { %p1672_p9 = scmp.eq.s32.totalorder %s1984_s29, 0  ;;  %s2390_s5 = sld [smem:[#allocation16_spill]] }
  0x12   : > { %p337_p10 = pnand %p1585_p7, %p336_p8  ;;  %s1870_s23 = smov [#allocation7]  }
  0x13   : > { %s361_s24 = sshll.u32 %s1870_s23, 4  ;;  %s1871_s30 = smov 64   ;;  %s362_s24 = int_to_ptr.vmem [resolvable:$true] %s361_s24 }
  0x14   : > { %p1664_p11 = pneg %p337_p10  ;;  %s1872_s15 = smov 4  }
  0x15   : > { %405 = sbr.rel (%p337_p10) target bundleno = 2052 (0x804), region = 72 }
  0x16   : > { %p1665_p12 = pnand %p1672_p9, %p1664_p11 }
  0x17   : > { %s359_s22 = sshll.u32 %s2390_s5, 4  ;;  %s360_s22 = int_to_ptr.hbm [resolvable:$true] %s359_s22 }
  0x18   : > { %1667 = dma.hbm_to_vmem [thread:$0]  (!%p1665_p12), %s360_s22, 256, %s362_s24, [#allocation8], %s1871_s30, %s1871_s30, %s1872_s15  }
  0x1a   : > { %1847 = dma.done.wait (%p1672_p9), [#allocation8], 256  }
  0x1b   : > { %1849 = vsyncadd (%p1672_p9), [#allocation8], 4294967040  ;;  %p449_p13 = scmp.lt.s32.totalorder %s1984_s29, 1  ;;  %s2391_s0 = sld [smem:[#allocation13_spill]]  ;;  %vm455_vm0 = vcmask 261120   ;;  %v1873_v2 = vmov 32.0  }
  0x1c   : > { %1741 = vrcp.f32 %v1873_v2  ;;  %s2392_s1 = sld [smem:[#allocation14_spill]]  ;;  %v1733_v25 = vld [vmem:[%s2379_s9] ss:$0 sm:$0xff]  ;;  %s1874_s30 = smov 72   ;;  %v1884_v42 = vmov 1983009808  }
  0x1d   : > { %s450_s16 = scalar_select %p449_p13, %s1984_s29, 1  ;;  %v1734_v28 = vld [vmem:[%s2380_s10] ss:$0 sm:$0xff]  ;;  %v604_v43 = vunpack.c.l.s4 %v1884_v42  ;;  %vm601_vm5 = vcmask 1047556   ;;  %v1885_v62 = vmov 1934713408  }
  0x1e   : > { %s2393_s2 = sld [smem:[#allocation15_spill]]  ;;  %s1875_s15 = smov 120   ;;  %v618_v63 = vunpack.c.l.s4 %v1885_v62  ;;  %vm845_vm6 = vcmask 60416   ;;  %vm863_vm7 = vcmask 64512   ;;  %vm854_vm8 = vcmask 7168  }
  0x1f   : > { %s1591_s20 = sshll.u32 %s450_s16, 3  ;;  %s1876_s16 = smov 96   ;;  %v2065_v54 = vunpack.c.0.s8 %v604_v43  ;;  %vm1083_vm9 = vcmask 1043456   ;;  %vm1329_vm10 = vcmask 130048   ;;  %vm1331_vm11 = vcmask 195584  }
  0x20   : > { %s1878_s21 = smov 80   ;;  %s1879_s23 = smov 88   ;;  %vm1478_vm15 = vcmask 523264  }
  0x21   : > { %s2026_s5 = scalar_lea.vmem %s2391_s0, %s1591_s20  ;;  %s1877_s20 = smov 48  }
  0x22   : > { %v454_v0 = vld [vmem:[%s2026_s5] sm:$0xff]  ;;  %v1742_v3 = vpop.eup %1741  ;;  %v1649_v14 = vld [vmem:[%s2392_s1 + $0x8] sm:$0xff]  ;;  %s1880_s22 = smov 104   ;;  %s1881_s24 = smov 112  }
  0x23   : > { %v456_v1 = vsel %vm455_vm0, %v454_v0, 0.0  ;;  %v460_v4 = vmul.f32 32.0, %v1742_v3  ;;  %vm464_vm1 = vweird.f32 %v1742_v3  ;;  %525 = vmatpush.bf16.msra.mxu0 %v1649_v14  ;;  %v1648_v15 = vld [vmem:[%s2392_s1] sm:$0xff] }
  0x24   : > { %457 = vadd.xlane.f32.xlu0 %v456_v1  ;;  %v1735_v32 = vld [vmem:[%s2393_s2] ss:$0 sm:$0xff] }
  0x25   : > { %v461_v5 = vsub.f32 1.0, %v460_v4 }
  0x27   : > { %v462_v6 = vmul.f32 %v1742_v3, %v461_v5  ;;  %526 = vmatpush.bf16.msra.mxu0 %v1648_v15 }
  0x29   : > { %v463_v7 = vadd.f32 %v1742_v3, %v462_v6 }
  0x2b   : > { %v2030_v8 = vsel %vm464_vm1, %v1742_v3, %v463_v7 }
  0x97   : > { %v458_v9 = vpop.xlane.xlu0 %457 }
  0x98   : > { %v466_v10 = vmul.f32 %v2030_v8, %v458_v9  ;;  %v2071_v9 = vunpack.c.0.s8 %v618_v63 }
  0x9a   : > { %v467_v11 = vsub.f32 %v454_v0, %v466_v10 }
  0x9c   : > { %v468_v12 = vmul.f32 %v467_v11, %v467_v11 }
  0x9e   : > { %v469_v13 = vsel %vm455_vm0, %v468_v12, 0.0 }
  0x9f   : > { %470 = vadd.xlane.f32.xlu0 %v469_v13 }
 0x112   : > { %v471_v16 = vpop.xlane.xlu0 %470 }
 0x113   : > { %v472_v17 = vmul.f32 %v471_v16, %v2030_v8 }
 0x115   : > { %v473_v18 = vadd.f32 1e-05, %v472_v17 }
 0x117   : > { %1743 = vrsqrt.f32 %v473_v18  ;;  %vm480_vm3 = vweird.f32 %v473_v18 }
 0x11d   : > { %v1744_v19 = vpop.eup %1743 }
 0x11e   : > { %v475_v20 = vmul.f32 %v1744_v19, %v473_v18  ;;  %vm481_vm2 = vweird.f32 %v1744_v19 }
 0x11f   : > { %vm482_vm4 = vmor %vm480_vm3, %vm481_vm2 }
 0x120   : > { %v476_v21 = vmul.f32 %v1744_v19, %v475_v20 }
 0x122   : > { %v477_v22 = vmul.f32 0.5, %v476_v21 }
 0x124   : > { %v478_v23 = vsub.f32 1.5, %v477_v22 }
 0x126   : > { %v479_v24 = vmul.f32 %v1744_v19, %v478_v23 }
 0x128   : > { %v483_v26 = vsel %vm482_vm4, %v1744_v19, %v479_v24 }
 0x129   : > { %v484_v27 = vmul.f32 %v483_v26, %v467_v11 }
 0x12b   : > { %v489_v29 = vmul.f32 %v1733_v25, %v484_v27 }
 0x12d   : > { %v494_v30 = vadd.f32 %v1734_v28, %v489_v29 }
 0x12f   : > { %v495_v31 = vpack.c.bf16 %v494_v30, %v494_v30 }
 0x131   : > { %1600 = vmatmul.msk.bf16.vlgmr.msra.gmra.mxu0 %vm455_vm0, %v495_v31 }
 0x1ae   : > { %v528_v33 = vpop.f32.mrf.mxu0 }
 0x1af   : > { %v529_v34 = vadd.f32 %v1735_v32, %v528_v33 }
 0x1b1   : > { %v2051_v35 = vpack.c.bf16 %v529_v34, %v529_v34 }
 0x1b3   : > { %546 = vrot.lane.b32.xlu0 %v2051_v35, %s1874_s30  ;;  %534 = vrot.lane.b32.xlu2 %v2051_v35, %s1875_s15  ;;  %s1882_s30 = smov 56   ;;  %s1883_s15 = smov 64   ;;  %v560_v48 = vshrl.u32 %v2051_v35, 16 }
 0x1b4   : > { %540 = vrot.lane.b32.xlu1 %v2051_v35, %s1876_s16  ;;  %s1887_s16 = smov 40  }
 0x1b6   : > { %v530_v36 = vpop.f32.mrf.mxu0 }
 0x1bb   : > { %552 = vrot.lane.b32.xlu0 %v2051_v35, %s1877_s20  ;;  %544 = vrot.lane.b32.xlu2 %v2051_v35, %s1878_s21  ;;  %s1890_s20 = smov 24   ;;  %s1891_s21 = smov 16  }
 0x1bc   : > { %542 = vrot.lane.b32.xlu1 %v2051_v35, %s1879_s23  ;;  %s1892_s23 = smov 8  }
 0x1c3   : > { %538 = vrot.lane.b32.xlu2 %v2051_v35, %s1880_s22 }
 0x1c4   : > { %536 = vrot.lane.b32.xlu1 %v2051_v35, %s1881_s24 }
 0x1cb   : > { %550 = vrot.lane.b32.xlu2 %v2051_v35, %s1882_s30  ;;  %s446_s30 = sand.u32 1, %s1860_s26  }
 0x1cc   : > { %548 = vrot.lane.b32.xlu1 %v2051_v35, %s1883_s15  ;;  %s1590_s15 = sshll.u32 %s446_s30, 3 }
 0x1cd   : > { %s448_s24 = scalar_lea.vmem [#allocation10], %s1590_s15  ;;  %s1822_s15 = scalar_lea.hbm %s2383_s13, 16 }
 0x1ce   : > { %s1510_s0 = sshll.u32 %s448_s24, 4  ;;  %s1511_s0 = int_to_ptr.vmem [resolvable:$true] %s1510_s0 }
 0x20d   : > { %v535_v37 = vpop.permute.xlu2 %534 }
 0x20e   : > { %v561_v40 = vshrl.u32 %v535_v37, 16  ;;  %v558_v49 = vpack.i.b16 %v535_v37, %v2051_v35 }
 0x210   : > { %v562_v53 = vpack.i.b16 %v561_v40, %v560_v48 }
 0x215   : > { %v545_v39 = vpop.permute.xlu2 %544 }
 0x216   : > { %v584_v55 = vshrl.u32 %v545_v39, 16 }
 0x21d   : > { %v539_v59 = vpop.permute.xlu2 %538 }
 0x21e   : > { %v569_v2 = vshrl.u32 %v539_v59, 16 }
 0x225   : > { %v547_v41 = vpop.permute.xlu0 %546 }
 0x226   : > { %v541_v38 = vpop.permute.xlu1 %540  ;;  %v585_v50 = vshrl.u32 %v547_v41, 16  ;;  %v582_v56 = vpack.i.b16 %v547_v41, %v545_v39 }
 0x227   : > { %v576_v45 = vshrl.u32 %v541_v38, 16 }
 0x228   : > { %v586_v60 = vpack.i.b16 %v585_v50, %v584_v55  ;;  %v607_v3 = vrot.slane %v582_v56, 4 }
 0x22a   : > { %v635_v7 = vrot.slane %v586_v60, 4 }
 0x22e   : > { %v543_v44 = vpop.permute.xlu1 %542 }
 0x22f   : > { %v574_v46 = vpack.i.b16 %v543_v44, %v541_v38  ;;  %v577_v47 = vshrl.u32 %v543_v44, 16 }
 0x231   : > { %v578_v51 = vpack.i.b16 %v577_v47, %v576_v45  ;;  %v600_v52 = vrot.slane %v574_v46, 4 }
 0x233   : > { %v602_v57 = vsel %vm601_vm5, %v600_v52, %v558_v49  ;;  %v629_v58 = vrot.slane %v578_v51, 4 }
 0x234   : > { %v606_v0 = vperm.slane %v602_v57, %v2065_v54 }
 0x235   : > { %v630_v61 = vsel %vm601_vm5, %v629_v58, %v562_v53 }
 0x236   : > { %v537_v1 = vpop.permute.xlu1 %536  ;;  %v634_v6 = vperm.slane %v630_v61, %v2065_v54  ;;  %v615_v12 = vrot.slane %v606_v0, 4 }
 0x237   : > { %v566_v4 = vpack.i.b16 %v539_v59, %v537_v1  ;;  %v568_v5 = vshrl.u32 %v537_v1, 16 }
 0x238   : > { %v643_v15 = vrot.slane %v634_v6, 4 }
 0x239   : > { %v570_v10 = vpack.i.b16 %v569_v2, %v568_v5  ;;  %v608_v11 = vsel %vm601_vm5, %v607_v3, %v566_v4 }
 0x23a   : > { %v612_v13 = vperm.slane %v608_v11, %v2065_v54 }
 0x23b   : > { %v636_v14 = vsel %vm601_vm5, %v635_v7, %v570_v10 }
 0x23c   : > { %v613_v16 = vrot.slane %v612_v13, 4  ;;  %v616_v17 = vsel %vm601_vm5, %v612_v13, %v615_v12  ;;  %v640_v18 = vperm.slane %v636_v14, %v2065_v54 }
 0x23d   : > { %v624_v19 = vperm.slane %v616_v17, %v2071_v9 }
 0x23e   : > { %v614_v20 = vsel %vm601_vm5, %v613_v16, %v606_v0  ;;  %v641_v21 = vrot.slane %v640_v18, 4  ;;  %v644_v22 = vsel %vm601_vm5, %v640_v18, %v643_v15 }
 0x23f   : > { %v620_v23 = vperm.slane %v614_v20, %v2071_v9  ;;  %v627_v24 = vrot.slane %v624_v19, 4  ;;  %v652_v25 = vperm.slane %v644_v22, %v2071_v9 }
 0x240   : > { %v642_v26 = vsel %vm601_vm5, %v641_v21, %v634_v6 }
 0x241   : > { %v625_v27 = vrot.slane %v620_v23, 4  ;;  %v628_v28 = vsel %vm601_vm5, 0, %v627_v24  ;;  %v648_v29 = vperm.slane %v642_v26, %v2071_v9  ;;  %v655_v30 = vrot.slane %v652_v25, 4 }
 0x242   : > { %v709_v31 = vsel %vm601_vm5, %v627_v24, %v620_v23  ;;  %v714_v32 = vrot.slane %v628_v28, 4 }
 0x243   : > { %v626_v33 = vsel %vm601_vm5, 0, %v625_v27  ;;  %v653_v34 = vrot.slane %v648_v29, 4  ;;  %v656_v36 = vsel %vm601_vm5, 0, %v655_v30  ;;  %v713_v37 = vperm.slane %v709_v31, %v2065_v54 }
 0x244   : > { %v715_v38 = vsel %vm601_vm5, %v714_v32, %v626_v33  ;;  %v736_v39 = vsel %vm601_vm5, %v655_v30, %v648_v29  ;;  %v741_v40 = vrot.slane %v656_v36, 4 }
 0x245   : > { %v654_v41 = vsel %vm601_vm5, 0, %v653_v34  ;;  %v719_v42 = vperm.slane %v715_v38, %v2065_v54  ;;  %v722_v43 = vrot.slane %v713_v37, 4  ;;  %v740_v44 = vperm.slane %v736_v39, %v2065_v54 }
 0x246   : > { %v742_v45 = vsel %vm601_vm5, %v741_v40, %v654_v41  ;;  %v1886_v34 = vmov -inf  }
 0x247   : > { %v723_v46 = vsel %vm601_vm5, %v719_v42, %v722_v43  ;;  %v746_v47 = vperm.slane %v742_v45, %v2065_v54  ;;  %v749_v48 = vrot.slane %v740_v44, 4  ;;  %v720_v60 = vrot.slane %v719_v42, 4  ;;  %855 = vst.msk [vmem:[#allocation4] sm:$0xff] %vm854_vm8, %v1886_v34 }
 0x248   : > { %v731_v49 = vperm.slane %v723_v46, %v2071_v9  ;;  %856 = vst.msk [vmem:[#allocation4 + $0x8] sm:$0xff] %vm854_vm8, %v1886_v34 }
 0x249   : > { %v750_v50 = vsel %vm601_vm5, %v746_v47, %v749_v48  ;;  %v747_v55 = vrot.slane %v746_v47, 4  ;;  %v721_v4 = vsel %vm601_vm5, %v720_v60, %v713_v37  ;;  %857 = vst.msk [vmem:[#allocation4 + $0x10] sm:$0xff] %vm854_vm8, %v1886_v34  ;;  %v1888_v47 = vmov 0  }
 0x24a   : > { %v734_v51 = vrot.slane %v731_v49, 4  ;;  %v758_v52 = vperm.slane %v750_v50, %v2071_v9  ;;  %v817_v53 = vshrl.u32 %v731_v49, 16  ;;  %v727_v6 = vperm.slane %v721_v4, %v2071_v9  ;;  %858 = vst.msk [vmem:[#allocation4 + $0x18] sm:$0xff] %vm854_vm8, %v1886_v34  ;;  %1731 = vset.pattern.permute.xlu1 %v1888_v47  ;;  %1732 = vset.pattern.permute.xlu2 %v1888_v47 }
 0x24b   : > { %v748_v2 = vsel %vm601_vm5, %v747_v55, %v740_v44  ;;  %1730 = vset.pattern.permute.xlu0 %v1888_v47  ;;  %v1889_v48 = vmov 0.0  }
 0x24c   : > { %v735_v56 = vsel %vm601_vm5, 0, %v734_v51  ;;  %v761_v57 = vrot.slane %v758_v52, 4  ;;  %v815_v58 = vpack.i.b16 %v758_v52, %v731_v49  ;;  %v818_v59 = vshrl.u32 %v758_v52, 16  ;;  %861 = vst.msk [vmem:[#allocation5 + $0x10] sm:$0xff] %vm854_vm8, %v1889_v48  ;;  %v551_v49 = vpop.permute.xlu2 %550  ;;  %v549_v52 = vpop.permute.xlu1 %548 }
 0x24d   : > { %v825_v0 = vshrl.u32 %v735_v56, 16  ;;  %v754_v5 = vperm.slane %v748_v2, %v2071_v9  ;;  %v732_v15 = vrot.slane %v727_v6, 4  ;;  %v804_v22 = vshrl.u32 %v727_v6, 16  ;;  %859 = vst.msk [vmem:[#allocation5] sm:$0xff] %vm854_vm8, %v1889_v48 }
 0x24e   : > { %v762_v61 = vsel %vm601_vm5, 0, %v761_v57  ;;  %v819_v62 = vpack.i.b16 %v818_v59, %v817_v53  ;;  %846 = vst.msk [vmem:[#allocation2] sm:$0xf] %vm845_vm6, %v815_v58  ;;  %v2150_v50 = vld [vmem:[#allocation4] sm:$0xff]  ;;  %v591_v4 = vshrl.u32 %v549_v52, 16 }
 0x24f   : > { %v823_v63 = vpack.i.b16 %v762_v61, %v735_v56  ;;  %v826_v1 = vshrl.u32 %v762_v61, 16  ;;  %v759_v11 = vrot.slane %v754_v5, 4  ;;  %v805_v18 = vshrl.u32 %v754_v5, 16  ;;  %860 = vst.msk [vmem:[#allocation5 + $0x8] sm:$0xff] %vm854_vm8, %v1889_v48 }
 0x250   : > { %847 = vst.msk [vmem:[#allocation2 + $0x4] sm:$0xf] %vm845_vm6, %v819_v62  ;;  %v803_v21 = vpack.i.b16 %v754_v5, %v727_v6  ;;  %v733_v23 = vsel %vm601_vm5, 0, %v732_v15  ;;  %v2165_v59 = vld [vmem:[#allocation4 + $0x10] sm:$0xff]  ;;  %v592_v5 = vshrl.u32 %v551_v49, 16  ;;  %v590_v6 = vpack.i.b16 %v551_v49, %v549_v52 }
 0x251   : > { %v827_v3 = vpack.i.b16 %v826_v1, %v825_v0  ;;  %848 = vst.msk [vmem:[#allocation2 + $0x8] sm:$0xf] %vm845_vm6, %v823_v63  ;;  %v760_v19 = vsel %vm601_vm5, 0, %v759_v11  ;;  %v806_v25 = vpack.i.b16 %v805_v18, %v804_v22  ;;  %v810_v27 = vshrl.u32 %v733_v23, 16  ;;  %v2160_v56 = vld [vmem:[#allocation4 + $0x18] sm:$0xff]  ;;  %v2174_v63 = vld [vmem:[#allocation4 + $0x8] sm:$0xff] }
 0x252   : > { %v811_v24 = vshrl.u32 %v760_v19, 16  ;;  %v809_v26 = vpack.i.b16 %v760_v19, %v733_v23  ;;  %862 = vst.msk [vmem:[#allocation5 + $0x18] sm:$0xff] %vm854_vm8, %v1889_v48 }
 0x253   : > { %849 = vst.msk [vmem:[#allocation2 + $0xc] sm:$0xf] %vm845_vm6, %v827_v3 }
 0x254   : > { %v812_v28 = vpack.i.b16 %v811_v24, %v810_v27  ;;  %864 = vst.msk [vmem:[#allocation6] sm:$0xff] %vm863_vm7, %v1889_v48 }
 0x255   : > { %v868_v7 = vld [vmem:[#allocation2] sm:$0xf]  ;;  %865 = vst.msk [vmem:[#allocation6 + $0x8] sm:$0xff] %vm863_vm7, %v1889_v48 }
 0x256   : > { %v880_v10 = vsel %vm863_vm7, %v868_v7, 0  ;;  %866 = vst.msk [vmem:[#allocation6 + $0x10] sm:$0xff] %vm863_vm7, %v1889_v48  ;;  %v593_v7 = vpack.i.b16 %v592_v5, %v591_v4 }
 0x257   : > { %889 = vmatpush.bf16.xpose.msra.mxu1 %v880_v10  ;;  %v869_v12 = vld [vmem:[#allocation2 + $0x4] sm:$0xf]  ;;  %867 = vst.msk [vmem:[#allocation6 + $0x18] sm:$0xff] %vm863_vm7, %v1889_v48  ;;  %v661_v10 = vperm.slane %v590_v6, %v2065_v54 }
 0x258   : > { %v899_v13 = vsel %vm863_vm7, %v869_v12, 0  ;;  %v870_v14 = vld [vmem:[#allocation2 + $0x8] sm:$0xf] }
 0x259   : > { %908 = vmatpush.bf16.xpose.msra.mxu2 %v899_v13  ;;  %v918_v16 = vsel %vm863_vm7, %v870_v14, 0  ;;  %v687_v13 = vperm.slane %v593_v7, %v2065_v54 }
 0x25a   : > { %927 = vmatpush.bf16.xpose.msra.mxu3 %v918_v16  ;;  %v871_v17 = vld [vmem:[#allocation2 + $0xc] sm:$0xf]  ;;  %v669_v16 = vrot.slane %v661_v10, 4 }
 0x25b   : > { %v937_v20 = vsel %vm863_vm7, %v871_v17, 0  ;;  %v695_v19 = vrot.slane %v687_v13, 4 }
 0x25c   : > { %946 = vmatpush.bf16.xpose.msrb.mxu0 %v937_v20 }
 0x25e   : > { %1601 = vmatmul.msk.bf16.vlgmr.msra.gmra.mxu1 %vm863_vm7, %v803_v21 }
 0x260   : > { %1602 = vmatmul.msk.bf16.vlgmr.msra.gmra.mxu2 %vm863_vm7, %v806_v25 }
 0x261   : > { %1603 = vmatmul.msk.bf16.vlgmr.msra.gmra.mxu3 %vm863_vm7, %v809_v26 }
 0x263   : > { %1604 = vmatmul.msk.bf16.vlgmr.msrb.gmra.mxu0 %vm863_vm7, %v812_v28 }
 0x2db   : > { %v891_v29 = vpop.f32.mrf.mxu1 }
 0x2dc   : > { %v2121_v30 = vmul.f32 0.35355338, %v891_v29 }
 0x2de   : > { %v960_v31 = vsel %vm863_vm7, %v2121_v30, -inf }
 0x2df   : > { %961 = vmax.xlane.f32.xlu0 %v960_v31 }
 0x2e0   : > { %v948_v32 = vpop.f32.mrf.mxu0 }
 0x2e1   : > { %v2125_v33 = vmul.f32 0.35355338, %v948_v32 }
 0x2e3   : > { %v893_v36 = vpop.f32.mrf.mxu1  ;;  %v910_v37 = vpop.f32.mrf.mxu2  ;;  %v969_v38 = vsel %vm863_vm7, %v2125_v33, -inf }
 0x2e4   : > { %970 = vmax.xlane.f32.xlu2 %v969_v38  ;;  %v929_v39 = vpop.f32.mrf.mxu3  ;;  %v2135_v41 = vmul.f32 0.35355338, %v910_v37 }
 0x2e5   : > { %v2132_v40 = vmul.f32 0.35355338, %v929_v39 }
 0x2e6   : > { %v963_v45 = vsel %vm863_vm7, %v2135_v41, -inf }
 0x2e7   : > { %v966_v42 = vsel %vm863_vm7, %v2132_v40, -inf }
 0x2e8   : > { %v950_v43 = vpop.f32.mrf.mxu0  ;;  %967 = vmax.xlane.f32.xlu1 %v966_v42 }
 0x2eb   : > { %v912_v44 = vpop.f32.mrf.mxu2 }
 0x2ec   : > { %964 = vmax.xlane.f32.xlu2 %v963_v45  ;;  %v931_v46 = vpop.f32.mrf.mxu3 }
 0x301   : > { %554 = vrot.lane.b32.xlu1 %v2051_v35, %s1887_s16  ;;  %v553_v35 = vpop.permute.xlu0 %552  ;;  %s1645_s16 = sshll.u32 %s1984_s29, 3  ;;  %s1498_s29 = scalar_lea.sflag [#allocation9], %s446_s30 }
 0x302   : > { %v597_v12 = vshrl.u32 %v553_v35, 16  ;;  %s1508_s22 = scalar_lea.hbm %s2383_s13, %s1645_s16 }
 0x303   : > { %s1512_s1 = sshll.u32 %s1508_s22, 4  ;;  %s1513_s1 = int_to_ptr.hbm [resolvable:$true] %s1512_s1 }
 0x304   : > { %s1816_s2 = sshra.s32 %s1513_s1, 4  ;;  %s1817_s2 = int_to_ptr.hbm [resolvable:$true] %s1816_s2 }
 0x305   : > { %p1823_p3 = scmp.lt.s32.totalorder %s1817_s2, %s2383_s13 }
 0x352   : > { %v962_v51 = vpop.xlane.xlu0 %961 }
 0x353   : > { %v2153_v53 = vmax.f32 %v2150_v50, %v962_v51 }
 0x355   : > { %v976_v55 = vsub.f32 %v2150_v50, %v2153_v53  ;;  %1165 = vst.msk [vmem:[#allocation4] sm:$0xff] %vm854_vm8, %v2153_v53  ;;  %990 = vperm.xlu1 %1731, %v2153_v53  }
 0x357   : > { %v971_v57 = vpop.xlane.xlu2 %970 }
 0x358   : > { %v2163_v58 = vmax.f32 %v2160_v56, %v971_v57 }
 0x35a   : > { %v979_v60 = vsub.f32 %v2160_v56, %v2163_v58  ;;  %1168 = vst.msk [vmem:[#allocation4 + $0x18] sm:$0xff] %vm854_vm8, %v2163_v58 }
 0x35b   : > { %v968_v61 = vpop.xlane.xlu1 %967 }
 0x35c   : > { %v2172_v62 = vmax.f32 %v2165_v59, %v968_v61 }
 0x35e   : > { %v978_v0 = vsub.f32 %v2165_v59, %v2172_v62  ;;  %1167 = vst.msk [vmem:[#allocation4 + $0x10] sm:$0xff] %vm854_vm8, %v2172_v62  ;;  %1000 = vperm.xlu2 %1732, %v2172_v62  }
 0x35f   : > { %v965_v1 = vpop.xlane.xlu2 %964 }
 0x360   : > { %v2182_v2 = vmax.f32 %v2174_v63, %v965_v1 }
 0x362   : > { %v977_v3 = vsub.f32 %v2174_v63, %v2182_v2  ;;  %1166 = vst.msk [vmem:[#allocation4 + $0x8] sm:$0xff] %vm854_vm8, %v2182_v2  ;;  %995 = vperm.xlu0 %1730, %v2182_v2   ;;  %v1022_v2 = vld [vmem:[#allocation5 + $0x10] sm:$0xff] }
 0x366   : > { %1005 = vperm.xlu2 %1732, %v2163_v58  }
 0x373   : > { %v555_v11 = vpop.permute.xlu1 %554 }
 0x374   : > { %v596_v14 = vpack.i.b16 %v555_v11, %v553_v35  ;;  %v598_v15 = vshrl.u32 %v555_v11, 16 }
 0x376   : > { %v599_v17 = vpack.i.b16 %v598_v15, %v597_v12  ;;  %v666_v18 = vperm.slane %v596_v14, %v2065_v54 }
 0x378   : > { %v667_v20 = vrot.slane %v666_v18, 4  ;;  %v670_v21 = vsel %vm601_vm5, %v666_v18, %v669_v16  ;;  %v692_v22 = vperm.slane %v599_v17, %v2065_v54 }
 0x379   : > { %v678_v23 = vperm.slane %v670_v21, %v2071_v9 }
 0x37a   : > { %v668_v24 = vsel %vm601_vm5, %v667_v20, %v661_v10  ;;  %v693_v25 = vrot.slane %v692_v22, 4  ;;  %v696_v26 = vsel %vm601_vm5, %v692_v22, %v695_v19 }
 0x37b   : > { %v674_v27 = vperm.slane %v668_v24, %v2071_v9  ;;  %v681_v28 = vrot.slane %v678_v23, 4  ;;  %v704_v29 = vperm.slane %v696_v26, %v2071_v9 }
 0x37c   : > { %v694_v31 = vsel %vm601_vm5, %v693_v25, %v687_v13 }
 0x37d   : > { %v679_v32 = vrot.slane %v674_v27, 4  ;;  %v682_v34 = vsel %vm601_vm5, 0, %v681_v28  ;;  %v700_v36 = vperm.slane %v694_v31, %v2071_v9  ;;  %v707_v37 = vrot.slane %v704_v29, 4 }
 0x37e   : > { %v768_v38 = vrot.slane %v682_v34, 4  ;;  %v763_v44 = vsel %vm601_vm5, %v681_v28, %v674_v27 }
 0x37f   : > { %v680_v39 = vsel %vm601_vm5, 0, %v679_v32  ;;  %v705_v42 = vrot.slane %v700_v36, 4  ;;  %v708_v43 = vsel %vm601_vm5, 0, %v707_v37  ;;  %v782_v35 = vsel %vm601_vm5, %v707_v37, %v700_v36 }
 0x380   : > { %v769_v45 = vsel %vm601_vm5, %v768_v38, %v680_v39  ;;  %v787_v46 = vrot.slane %v708_v43, 4  ;;  %v767_v51 = vperm.slane %v763_v44, %v2065_v54  ;;  %v786_v1 = vperm.slane %v782_v35, %v2065_v54 }
 0x381   : > { %v706_v47 = vsel %vm601_vm5, 0, %v705_v42  ;;  %v773_v48 = vperm.slane %v769_v45, %v2065_v54 }
 0x382   : > { %v788_v49 = vsel %vm601_vm5, %v787_v46, %v706_v47 }
 0x383   : > { %v774_v52 = vrot.slane %v773_v48, 4  ;;  %v792_v57 = vperm.slane %v788_v49, %v2065_v54 }
 0x385   : > { %v775_v61 = vsel %vm601_vm5, %v774_v52, %v767_v51  ;;  %v793_v4 = vrot.slane %v792_v57, 4 }
 0x386   : > { %v779_v5 = vperm.slane %v775_v61, %v2071_v9  ;;  %v982_v61 = vmul.f32 1.442695, %v977_v3  ;;  %v1023_v3 = vld [vmem:[#allocation5 + $0x18] sm:$0xff] }
 0x387   : > { %v794_v6 = vsel %vm601_vm5, %v793_v4, %v786_v1 }
 0x388   : > { %v780_v7 = vrot.slane %v779_v5, 4  ;;  %v798_v10 = vperm.slane %v794_v6, %v2071_v9  ;;  %v833_v11 = vshrl.u32 %v779_v5, 16 }
 0x38a   : > { %v781_v12 = vsel %vm601_vm5, 0, %v780_v7  ;;  %v799_v13 = vrot.slane %v798_v10, 4  ;;  %v831_v14 = vpack.i.b16 %v798_v10, %v779_v5  ;;  %v834_v15 = vshrl.u32 %v798_v10, 16 }
 0x38b   : > { %v841_v19 = vshrl.u32 %v781_v12, 16 }
 0x38c   : > { %v800_v16 = vsel %vm601_vm5, 0, %v799_v13  ;;  %v835_v17 = vpack.i.b16 %v834_v15, %v833_v11  ;;  %850 = vst.msk [vmem:[#allocation3] sm:$0xf] %vm845_vm6, %v831_v14  ;;  %v1020_v13 = vld [vmem:[#allocation5] sm:$0xff] }
 0x38d   : > { %v839_v18 = vpack.i.b16 %v800_v16, %v781_v12  ;;  %v842_v20 = vshrl.u32 %v800_v16, 16 }
 0x38e   : > { %851 = vst.msk [vmem:[#allocation3 + $0x4] sm:$0xf] %vm845_vm6, %v835_v17 }
 0x38f   : > { %v843_v21 = vpack.i.b16 %v842_v20, %v841_v19  ;;  %852 = vst.msk [vmem:[#allocation3 + $0x8] sm:$0xf] %vm845_vm6, %v839_v18  ;;  %v1050_v18 = vld [vmem:[#allocation6 + $0x10] sm:$0xff] }
 0x391   : > { %853 = vst.msk [vmem:[#allocation3 + $0xc] sm:$0xf] %vm845_vm6, %v843_v21  ;;  %v1021_v21 = vld [vmem:[#allocation5 + $0x8] sm:$0xff] }
 0x393   : > { %v872_v22 = vld [vmem:[#allocation3] sm:$0xf] }
 0x394   : > { %v1085_v23 = vsel %vm1083_vm9, %v872_v22, 0 }
 0x395   : > { %1094 = vmatpush.bf16.msrb.mxu1 %v1085_v23  ;;  %v873_v24 = vld [vmem:[#allocation3 + $0x4] sm:$0xf] }
 0x396   : > { %v1104_v25 = vsel %vm1083_vm9, %v873_v24, 0  ;;  %v874_v26 = vld [vmem:[#allocation3 + $0x8] sm:$0xf]  ;;  %v1048_v24 = vld [vmem:[#allocation6] sm:$0xff] }
 0x397   : > { %1113 = vmatpush.bf16.msrb.mxu2 %v1104_v25  ;;  %v1123_v27 = vsel %vm1083_vm9, %v874_v26, 0 }
 0x398   : > { %1132 = vmatpush.bf16.msrb.mxu3 %v1123_v27  ;;  %v875_v28 = vld [vmem:[#allocation3 + $0xc] sm:$0xf] }
 0x399   : > { %v1142_v29 = vsel %vm1083_vm9, %v875_v28, 0 }
 0x39a   : > { %1151 = vmatpush.bf16.msra.mxu0 %v1142_v29 }
 0x3b8   : > { %v1001_v31 = vpop.permute.xlu2 %1000 }
 0x3b9   : > { %v1010_v32 = vsub.f32 %v2132_v40, %v1001_v31 }
 0x3bb   : > { %v1016_v34 = vmul.f32 1.442695, %v1010_v32 }
 0x3bd   : > { %1745 = vpow2.f32 %v1016_v34 }
 0x3c0   : > { %v1006_v36 = vpop.permute.xlu2 %1005 }
 0x3c1   : > { %v1011_v37 = vsub.f32 %v2125_v33, %v1006_v36 }
 0x3c3   : > { %v1746_v38 = vpop.eup %1745  ;;  %v1018_v39 = vmul.f32 1.442695, %v1011_v37 }
 0x3c4   : > { %v1034_v42 = vsel %vm863_vm7, %v1746_v38, 0.0  ;;  %v1078_v43 = vpack.c.bf16 %v1746_v38, %v1746_v38 }
 0x3c5   : > { %1747 = vpow2.f32 %v1018_v39  ;;  %1035 = vadd.xlane.f32.xlu1 %v1034_v42 }
 0x3c6   : > { %1607 = vmatmul.msk.bf16.vlgmr.msrb.gmra.mxu3 %vm863_vm7, %v1078_v43  ;;  %v1049_v43 = vld [vmem:[#allocation6 + $0x8] sm:$0xff] }
 0x3c7   : > { %v991_v44 = vpop.permute.xlu1 %990 }
 0x3c8   : > { %v1008_v45 = vsub.f32 %v2121_v30, %v991_v44  ;;  %v980_v30 = vmul.f32 1.442695, %v976_v55  ;;  %v986_v55 = vmul.f32 1.442695, %v979_v60 }
 0x3ca   : > { %v1012_v46 = vmul.f32 1.442695, %v1008_v45 }
 0x3cb   : > { %v1748_v47 = vpop.eup %1747 }
 0x3cc   : > { %v1079_v40 = vpack.c.bf16 %v1748_v47, %v1748_v47  ;;  %1749 = vpow2.f32 %v1012_v46  ;;  %v1037_v48 = vsel %vm863_vm7, %v1748_v47, 0.0 }
 0x3cd   : > { %1038 = vadd.xlane.f32.xlu0 %v1037_v48  ;;  %v1051_v48 = vld [vmem:[#allocation6 + $0x18] sm:$0xff] }
 0x3ce   : > { %1608 = vmatmul.msk.bf16.vlgmr.msra.gmra.mxu0 %vm863_vm7, %v1079_v40 }
 0x3d2   : > { %v1750_v33 = vpop.eup %1749 }
 0x3d3   : > { %v1028_v35 = vsel %vm863_vm7, %v1750_v33, 0.0  ;;  %v1076_v49 = vpack.c.bf16 %v1750_v33, %v1750_v33 }
 0x3d4   : > { %v996_v51 = vpop.permute.xlu0 %995  ;;  %1029 = vadd.xlane.f32.xlu2 %v1028_v35 }
 0x3d5   : > { %v1009_v52 = vsub.f32 %v2135_v41, %v996_v51  ;;  %1605 = vmatmul.msk.bf16.vlgmr.msrb.gmra.mxu1 %vm863_vm7, %v1076_v49  ;;  %v984_v41 = vmul.f32 1.442695, %v978_v0 }
 0x3d7   : > { %v1014_v57 = vmul.f32 1.442695, %v1009_v52 }
 0x3d9   : > { %1751 = vpow2.f32 %v1014_v57 }
 0x3da   : > { %1753 = vpow2.f32 %v980_v30 }
 0x3db   : > { %1755 = vpow2.f32 %v982_v61 }
 0x3dc   : > { %1757 = vpow2.f32 %v984_v41 }
 0x3dd   : > { %1759 = vpow2.f32 %v986_v55 }
 0x3df   : > { %v1752_v1 = vpop.eup %1751 }
 0x3e0   : > { %v1754_v4 = vpop.eup %1753  ;;  %v1031_v5 = vsel %vm863_vm7, %v1752_v1, 0.0  ;;  %v1077_v6 = vpack.c.bf16 %v1752_v1, %v1752_v1 }
 0x3e1   : > { %1032 = vadd.xlane.f32.xlu1 %v1031_v5  ;;  %1054 = vperm.xlu0 %1730, %v1754_v4   ;;  %v1756_v50 = vpop.eup %1755  ;;  %v1024_v56 = vmul.f32 %v1754_v4, %v1020_v13 }
 0x3e2   : > { %1606 = vmatmul.msk.bf16.vlgmr.msrb.gmra.mxu2 %vm863_vm7, %v1077_v6  ;;  %v1758_v53 = vpop.eup %1757  ;;  %v1025_v31 = vmul.f32 %v1756_v50, %v1021_v21 }
 0x3e3   : > { %v1760_v63 = vpop.eup %1759  ;;  %v1026_v59 = vmul.f32 %v1758_v53, %v1022_v2 }
 0x3e4   : > { %v1027_v7 = vmul.f32 %v1760_v63, %v1023_v3 }
 0x3e9   : > { %1059 = vperm.xlu0 %1730, %v1756_v50  }
 0x3ec   : > { %1064 = vperm.xlu2 %1732, %v1758_v53  }
 0x3fa   : > { %1069 = vperm.xlu1 %1731, %v1760_v63  }
 0x438   : > { %v1036_v62 = vpop.xlane.xlu1 %1035 }
 0x439   : > { %v1042_v0 = vadd.f32 %v1036_v62, %v1026_v59 }
 0x43b   : > { %1046 = vst.msk [vmem:[#allocation5 + $0x10] sm:$0xff] %vm854_vm8, %v1042_v0 }
 0x440   : > { %v1039_v10 = vpop.xlane.xlu0 %1038 }
 0x441   : > { %v1043_v11 = vadd.f32 %v1039_v10, %v1027_v7 }
 0x442   : > { %v1175_v12 = vld [vmem:[#allocation5 + $0x10] sm:$0xff] }
 0x443   : > { %1047 = vst.msk [vmem:[#allocation5 + $0x18] sm:$0xff] %vm854_vm8, %v1043_v11  ;;  %1761 = vrcp.f32 %v1175_v12 }
 0x447   : > { %v1030_v58 = vpop.xlane.xlu2 %1029 }
 0x448   : > { %v1040_v60 = vadd.f32 %v1030_v58, %v1024_v56 }
 0x449   : > { %v1762_v14 = vpop.eup %1761  ;;  %v1134_v15 = vpop.f32.mrf.mxu3 }
 0x44a   : > { %1044 = vst.msk [vmem:[#allocation5] sm:$0xff] %vm854_vm8, %v1040_v60  ;;  %1193 = vperm.xlu2 %1732, %v1762_v14   ;;  %v1176_v16 = vld [vmem:[#allocation5 + $0x18] sm:$0xff] }
 0x44b   : > { %v1153_v17 = vpop.f32.mrf.mxu0  ;;  %1763 = vrcp.f32 %v1176_v16 }
 0x44f   : > { %v1065_v19 = vpop.permute.xlu2 %1064 }
 0x450   : > { %v1074_v20 = vmul.f32 %v1065_v19, %v1050_v18 }
 0x451   : > { %v1764_v22 = vpop.eup %1763  ;;  %v1136_v23 = vpop.f32.mrf.mxu3  ;;  %v1173_v25 = vld [vmem:[#allocation5] sm:$0xff] }
 0x452   : > { %v1159_v26 = vadd.f32 %v1134_v15, %v1074_v20  ;;  %1198 = vperm.xlu0 %1730, %v1764_v22   ;;  %v1096_v27 = vpop.f32.mrf.mxu1  ;;  %1765 = vrcp.f32 %v1173_v25 }
 0x453   : > { %v1055_v28 = vpop.permute.xlu0 %1054  ;;  %v1155_v29 = vpop.f32.mrf.mxu0 }
 0x454   : > { %1163 = vst.msk [vmem:[#allocation6 + $0x10] sm:$0xff] %vm863_vm7, %v1159_v26  ;;  %v1072_v32 = vmul.f32 %v1055_v28, %v1048_v24  ;;  %v1033_v34 = vpop.xlane.xlu1 %1032 }
 0x455   : > { %v1041_v36 = vadd.f32 %v1033_v34, %v1025_v31 }
 0x456   : > { %v1157_v37 = vadd.f32 %v1096_v27, %v1072_v32 }
 0x457   : > { %1045 = vst.msk [vmem:[#allocation5 + $0x8] sm:$0xff] %vm854_vm8, %v1041_v36 }
 0x458   : > { %v1766_v38 = vpop.eup %1765  ;;  %1161 = vst.msk [vmem:[#allocation6] sm:$0xff] %vm863_vm7, %v1157_v37 }
 0x459   : > { %1183 = vperm.xlu1 %1731, %v1766_v38  }
 0x45a   : > { %v1098_v39 = vpop.f32.mrf.mxu1 }
 0x45b   : > { %v1060_v44 = vpop.permute.xlu0 %1059  ;;  %v1171_v6 = vld [vmem:[#allocation6 + $0x10] sm:$0xff] }
 0x45c   : > { %v1073_v45 = vmul.f32 %v1060_v44, %v1049_v43 }
 0x45e   : > { %v1174_v42 = vld [vmem:[#allocation5 + $0x8] sm:$0xff] }
 0x45f   : > { %1767 = vrcp.f32 %v1174_v42  ;;  %v1169_v59 = vld [vmem:[#allocation6] sm:$0xff] }
 0x465   : > { %v1768_v46 = vpop.eup %1767  ;;  %v1115_v47 = vpop.f32.mrf.mxu2 }
 0x466   : > { %v1158_v40 = vadd.f32 %v1115_v47, %v1073_v45  ;;  %1188 = vperm.xlu2 %1732, %v1768_v46  }
 0x468   : > { %1162 = vst.msk [vmem:[#allocation6 + $0x8] sm:$0xff] %vm863_vm7, %v1158_v40 }
 0x46c   : > { %v1070_v33 = vpop.permute.xlu1 %1069 }
 0x46d   : > { %v1075_v35 = vmul.f32 %v1070_v33, %v1051_v48  ;;  %v1117_v49 = vpop.f32.mrf.mxu2 }
 0x46f   : > { %v1160_v51 = vadd.f32 %v1153_v17, %v1075_v35  ;;  %v1170_v57 = vld [vmem:[#allocation6 + $0x8] sm:$0xff] }
 0x471   : > { %1164 = vst.msk [vmem:[#allocation6 + $0x18] sm:$0xff] %vm863_vm7, %v1160_v51 }
 0x478   : > { %v1172_v4 = vld [vmem:[#allocation6 + $0x18] sm:$0xff] }
 0x4a4   : > { %v1194_v52 = vpop.permute.xlu2 %1193 }
 0x4a5   : > { %v1203_v50 = vmul.f32 %v1194_v52, %v1171_v6 }
 0x4a7   : > { %v1205_v0 = vrot.slane %v1203_v50, 4 }
 0x4c0   : > { %v1189_v30 = vpop.permute.xlu2 %1188 }
 0x4c1   : > { %v1202_v61 = vmul.f32 %v1189_v30, %v1170_v57 }
 0x4c3   : > { %v1220_v53 = vrot.slane %v1202_v61, 4 }
 0x4c4   : > { %v1199_v1 = vpop.permute.xlu0 %1198 }
 0x4c5   : > { %v1204_v5 = vmul.f32 %v1199_v1, %v1172_v4 }
 0x4c7   : > { %v1218_v41 = vrot.slane %v1204_v5, 4  ;;  %v1221_v63 = vsel %vm601_vm5, %v1204_v5, %v1220_v53 }
 0x4c8   : > { %v1229_v7 = vperm.slane %v1221_v63, %v2065_v54  ;;  %v1651_v63 = vld [vmem:[%s2373_s3 + $0x8] sm:$0xff] }
 0x4c9   : > { %v1219_v55 = vsel %vm601_vm5, %v1218_v41, %v1202_v61  ;;  %1363 = vmatpush.bf16.msra.mxu1 %v1651_v63 }
 0x4ca   : > { %v1225_v2 = vperm.slane %v1219_v55, %v2065_v54  ;;  %v1242_v58 = vrot.slane %v1229_v7, 4 }
 0x4cb   : > { %v1184_v62 = vpop.permute.xlu1 %1183 }
 0x4cc   : > { %v1201_v3 = vmul.f32 %v1184_v62, %v1169_v59  ;;  %v1230_v12 = vrot.slane %v1225_v2, 4 }
 0x4ce   : > { %v1207_v10 = vsel %vm601_vm5, %v1205_v0, %v1201_v3  ;;  %v1208_v11 = vrot.slane %v1201_v3, 4 }
 0x4cf   : > { %v1213_v13 = vperm.slane %v1207_v10, %v2065_v54 }
 0x4d0   : > { %v1209_v56 = vsel %vm601_vm5, %v1203_v50, %v1208_v11  ;;  %v1736_v11 = vld [vmem:[%s2374_s4] ss:$0 sm:$0xff] }
 0x4d1   : > { %v1217_v60 = vperm.slane %v1209_v56, %v2065_v54  ;;  %v1231_v14 = vsel %vm601_vm5, %v1230_v12, %v1213_v13  ;;  %v1232_v15 = vrot.slane %v1213_v13, 4  ;;  %v1771_v56 = vld [vmem:[%s2026_s5] sm:$0xff] }
 0x4d2   : > { %v1237_v16 = vperm.slane %v1231_v14, %v2071_v9 }
 0x4d3   : > { %v1233_v17 = vsel %vm601_vm5, %v1225_v2, %v1232_v15  ;;  %v1243_v18 = vsel %vm601_vm5, %v1242_v58, %v1217_v60  ;;  %v1244_v19 = vrot.slane %v1217_v60, 4 }
 0x4d4   : > { %v1241_v20 = vperm.slane %v1233_v17, %v2071_v9  ;;  %v1249_v21 = vperm.slane %v1243_v18, %v2071_v9  ;;  %v1254_v24 = vrot.slane %v1237_v16, 4 }
 0x4d5   : > { %v1245_v22 = vsel %vm601_vm5, %v1229_v7, %v1244_v19 }
 0x4d6   : > { %v1253_v23 = vperm.slane %v1245_v22, %v2071_v9  ;;  %v1256_v25 = vrot.slane %v1241_v20, 4  ;;  %v1258_v27 = vrot.slane %v1249_v21, 4  ;;  %v1255_v34 = vsel %vm601_vm5, 0.0, %v1254_v24  ;;  %v1653_v20 = vld [vmem:[#allocation7 + $0x8] sm:$0xff]  ;;  %v1657_v22 = vld [vmem:[%s2377_s7 + $0x18] sm:$0xff] }
 0x4d7   : > { %1433 = vmatpush.bf16.msra.mxu2 %v1653_v20  ;;  %1486 = vmatpush.bf16.msra.mxu3 %v1657_v22 }
 0x4d8   : > { %v1257_v26 = vsel %vm601_vm5, 0.0, %v1256_v25  ;;  %v1260_v28 = vrot.slane %v1253_v23, 4  ;;  %v1262_v29 = vsel %vm601_vm5, %v1256_v25, %v1237_v16  ;;  %v1259_v44 = vsel %vm601_vm5, 0.0, %v1258_v27  ;;  %v1656_v25 = vld [vmem:[%s2377_s7 + $0x10] sm:$0xff]  ;;  %v1655_v27 = vld [vmem:[%s2377_s7 + $0x8] sm:$0xff] }
 0x4d9   : > { %v1267_v31 = vrot.slane %v1257_v26, 4  ;;  %v1266_v32 = vperm.slane %v1262_v29, %v2065_v54 }
 0x4da   : > { %v1261_v36 = vsel %vm601_vm5, 0.0, %v1260_v28  ;;  %v1273_v37 = vsel %vm601_vm5, %v1260_v28, %v1249_v21  ;;  %v1652_v21 = vld [vmem:[#allocation7] sm:$0xff] }
 0x4db   : > { %v1268_v38 = vsel %vm601_vm5, %v1267_v31, %v1255_v34  ;;  %v1277_v39 = vperm.slane %v1273_v37, %v2065_v54  ;;  %v1278_v42 = vrot.slane %v1261_v36, 4  ;;  %v1286_v43 = vrot.slane %v1266_v32, 4  ;;  %1434 = vmatpush.bf16.msra.mxu2 %v1652_v21  ;;  %1487 = vmatpush.bf16.msra.mxu3 %v1656_v25  ;;  %v1737_v36 = vld [vmem:[%s2381_s11] ss:$0 sm:$0xff] }
 0x4dc   : > { %v1272_v45 = vperm.slane %v1268_v38, %v2065_v54 }
 0x4dd   : > { %v1279_v46 = vsel %vm601_vm5, %v1278_v42, %v1259_v44  ;;  %v1298_v47 = vrot.slane %v1277_v39, 4 }
 0x4de   : > { %v1283_v40 = vperm.slane %v1279_v46, %v2065_v54  ;;  %v1287_v48 = vsel %vm601_vm5, %v1272_v45, %v1286_v43  ;;  %v1284_v33 = vrot.slane %v1272_v45, 4  ;;  %v1654_v45 = vld [vmem:[%s2377_s7] sm:$0xff] }
 0x4df   : > { %v1295_v35 = vperm.slane %v1287_v48, %v2071_v9  ;;  %1488 = vmatpush.bf16.msra.mxu3 %v1655_v27  ;;  %v1739_v46 = vld [vmem:[%s2376_s6] ss:$0 sm:$0xff] }
 0x4e0   : > { %v1299_v49 = vsel %vm601_vm5, %v1283_v40, %v1298_v47  ;;  %v1285_v51 = vsel %vm601_vm5, %v1284_v33, %v1266_v32  ;;  %v1296_v52 = vrot.slane %v1283_v40, 4 }
 0x4e1   : > { %v1307_v30 = vperm.slane %v1299_v49, %v2071_v9  ;;  %v1314_v57 = vrot.slane %v1295_v35, 4  ;;  %v1291_v61 = vperm.slane %v1285_v51, %v2071_v9  ;;  %v1740_v49 = vld [vmem:[%s2378_s8] ss:$0 sm:$0xff] }
 0x4e2   : > { %v1297_v1 = vsel %vm601_vm5, %v1296_v52, %v1277_v39  ;;  %v1738_v39 = vld [vmem:[%s2382_s12] ss:$0 sm:$0xff] }
 0x4e3   : > { %v1315_v4 = vsel %vm601_vm5, %v1307_v30, %v1314_v57  ;;  %v1312_v54 = vrot.slane %v1307_v30, 4  ;;  %v1303_v5 = vperm.slane %v1297_v1, %v2071_v9  ;;  %v1310_v6 = vrot.slane %v1291_v61, 4  ;;  %v1650_v9 = vld [vmem:[%s2373_s3] sm:$0xff]  ;;  %1489 = vmatpush.bf16.msra.mxu3 %v1654_v45 }
 0x4e4   : > { %1325 = vrot.lane.b32.xlu2 %v1315_v4, %s1890_s20  ;;  %1364 = vmatpush.bf16.msra.mxu1 %v1650_v9  ;;  %s1818_s20 = scalar_lea.hbm %s1817_s2, 8 }
 0x4e5   : > { %v1313_v41 = vsel %vm601_vm5, %v1312_v54, %v1295_v35  ;;  %v1308_v50 = vrot.slane %v1303_v5, 4  ;;  %v1311_v53 = vsel %vm601_vm5, %v1303_v5, %v1310_v6  ;;  %p1819_p0 = scmp.ne.s32.totalorder %s1817_s2, %s1818_s20  ;;  %p1824_p4 = scmp.lt.s32.totalorder %s1822_s15, %s1818_s20 }
 0x4e6   : > { %1321 = vrot.lane.b32.xlu0 %v1313_v41, %s1891_s21  ;;  %1317 = vrot.lane.b32.xlu1 %v1311_v53, %s1892_s23 }
 0x4e7   : > { %v1309_v55 = vsel %vm601_vm5, %v1308_v50, %v1291_v61  ;;  %p1820_p1 = pnand %p1819_p0, %p2001_p5  ;;  %p1825_p7 = por %p1824_p4, %p1823_p3 }
 0x4e9   : > { %p1821_p2 = pneg %p1820_p1 }
 0x4eb   : > { %p1826_p8 = pnand %p1825_p7, %p1821_p2 }
 0x53e   : > { %v1326_v0 = vpop.permute.xlu2 %1325 }
 0x558   : > { %v1322_v2 = vpop.permute.xlu0 %1321  ;;  %v1318_v59 = vpop.permute.xlu1 %1317 }
 0x559   : > { %v1328_v62 = vsel %vm863_vm7, %v1309_v55, %v1318_v59 }
 0x55a   : > { %v1330_v3 = vsel %vm1329_vm10, %v1328_v62, %v1322_v2 }
 0x55b   : > { %v1332_v7 = vsel %vm1331_vm11, %v1330_v3, %v1326_v0 }
 0x55c   : > { %v1333_v10 = vpack.c.bf16 %v1332_v7, %v1332_v7 }
 0x55e   : > { %1617 = vmatmul.msk.bf16.vlgmr.msra.gmra.mxu1 %vm455_vm0, %v1333_v10 }
 0x5db   : > { %v1366_v12 = vpop.f32.mrf.mxu1 }
 0x5dc   : > { %v1367_v13 = vadd.f32 %v1736_v11, %v1366_v12 }
 0x5de   : > { %v1370_v58 = vadd.f32 %v1771_v56, %v1367_v13 }
 0x5e0   : > { %v1371_v60 = vsel %vm455_vm0, %v1370_v58, 0.0 }
 0x5e1   : > { %1372 = vadd.xlane.f32.xlu1 %v1371_v60 }
 0x5e3   : > { %v1368_v14 = vpop.f32.mrf.mxu1 }
 0x654   : > { %v1373_v15 = vpop.xlane.xlu1 %1372 }
 0x655   : > { %v1374_v16 = vmul.f32 %v1373_v15, %v2030_v8 }
 0x657   : > { %v1375_v17 = vsub.f32 %v1370_v58, %v1374_v16 }
 0x659   : > { %v1376_v18 = vmul.f32 %v1375_v17, %v1375_v17 }
 0x65b   : > { %v1377_v19 = vsel %vm455_vm0, %v1376_v18, 0.0 }
 0x65c   : > { %1378 = vadd.xlane.f32.xlu0 %v1377_v19 }
 0x6cf   : > { %v1379_v23 = vpop.xlane.xlu0 %1378 }
 0x6d0   : > { %v1380_v24 = vmul.f32 %v1379_v23, %v2030_v8 }
 0x6d2   : > { %v1381_v26 = vadd.f32 1e-05, %v1380_v24 }
 0x6d4   : > { %1769 = vrsqrt.f32 %v1381_v26  ;;  %vm1388_vm13 = vweird.f32 %v1381_v26 }
 0x6da   : > { %v1770_v28 = vpop.eup %1769 }
 0x6db   : > { %v1383_v29 = vmul.f32 %v1770_v28, %v1381_v26  ;;  %vm1389_vm12 = vweird.f32 %v1770_v28 }
 0x6dc   : > { %vm1390_vm14 = vmor %vm1388_vm13, %vm1389_vm12 }
 0x6dd   : > { %v1384_v31 = vmul.f32 %v1770_v28, %v1383_v29 }
 0x6df   : > { %v1385_v32 = vmul.f32 0.5, %v1384_v31 }
 0x6e1   : > { %v1386_v34 = vsub.f32 1.5, %v1385_v32 }
 0x6e3   : > { %v1387_v8 = vmul.f32 %v1770_v28, %v1386_v34 }
 0x6e5   : > { %v1391_v37 = vsel %vm1390_vm14, %v1770_v28, %v1387_v8 }
 0x6e6   : > { %v1392_v38 = vmul.f32 %v1391_v37, %v1375_v17 }
 0x6e8   : > { %v1397_v42 = vmul.f32 %v1737_v36, %v1392_v38 }
 0x6ea   : > { %v1402_v43 = vadd.f32 %v1738_v39, %v1397_v42 }
 0x6ec   : > { %v1403_v44 = vpack.c.bf16 %v1402_v43, %v1402_v43 }
 0x6ee   : > { %1626 = vmatmul.msk.bf16.vlgmr.msra.gmra.mxu2 %vm455_vm0, %v1403_v44 }
 0x771   : > { %v1436_v47 = vpop.f32.mrf.mxu2 }
 0x772   : > { %v1437_v40 = vadd.f32 %v1739_v46, %v1436_v47 }
 0x774   : > { %v1440_v48 = vmax.f32 %v1437_v40, 0.0 }
 0x776   : > { %v1441_v33 = vpack.c.bf16 %v1440_v48, %v1440_v48 }
 0x778   : > { %1643 = vmatmul.msk.bf16.vlgmr.msra.gmra.mxu3 %vm1478_vm15, %v1441_v33 }
 0x779   : > { %v1438_v35 = vpop.f32.mrf.mxu2 }
 0x7fb   : > { %v1491_v51 = vpop.f32.mrf.mxu3 }
 0x7fc   : > { %v1492_v52 = vadd.f32 %v1740_v49, %v1491_v51 }
 0x7fe   : > { %v1495_v30 = vadd.f32 %v1492_v52, %v1370_v58 }
 0x800   : > { %1496 = vst.msk [vmem:[%s448_s24] sm:$0xff] %vm455_vm0, %v1495_v30 }
 0x801   : > { %1829 = shalt.err (!%p1826_p8)
}
 0x802   : > { %1662 = dma.vmem_to_hbm [thread:$0]  (%p2001_p5), %s1511_s0, 128, %s1513_s1, %s1498_s29  }
 0x803   : > { %v1493_v57 = vpop.f32.mrf.mxu3 }
 0x804 PF: > { %p1674_p9 = scmp.ge.s32.totalorder %s1868_s28, 2  ;;  %s1524_s30 = sand.u32 1, %s1856_s25  }
 0x805   : > { %s1525_s22 = scalar_lea.sflag [#allocation9], %s1524_s30 }
 0x806   : > { %p1669_p10 = pnand %p1674_p9, %p2005_p6 }
 0x808   : > { %p1670_p11 = pneg %p1669_p10 }
 0x80a   : > { %1851 = dma.done.wait (%p1670_p11), %s1525_s22, 128  }
 0x80b   : > { %1853 = vsyncadd (%p1670_p11), %s1525_s22, 4294967168  ;;  %p24_p12 = scmp.ge.s32.totalorder %s1988_s14, 4   ;;  %s2394_s25 = smov %s1860_s26 }
 0x80c   : > { %s2395_s26 = smov %s1864_s27  ;;  %s2396_s27 = smov %s1999_s17 }
 0x80d   : > { %s2397_s28 = smov %s1988_s14  ;;  %26 = sbr.rel (!%p24_p12) target bundleno = 9 (0x9), region = 112 }
 0x812   :  { %1531 = vsyncpa [#allocation8], 1 }
 0x813   :  { %1533 = vsyncpa [#allocation8 + $0x1], 1 }
 0x814   :  { %1534 = vsyncpa [#allocation9], 1 }
 0x815   :  { %1536 = vsyncpa [#allocation9 + $0x1], 1 }

// kernel: tpu_custom_call.1
= control target key start
LH: loop header
LB: loop body
LE: loop exit
PB: predicated region body
PF: predicated region fallthrough
CT: control target
= control target key end

     0   :  { %s2370_s0 = inlined_call_operand.vmem [shape: f32[2,8,32], index: 0, kind: input, shape index: {}]   ;;  %s2371_s1 = inlined_call_operand.vmem [shape: bf16[32,96], index: 1, kind: input, shape index: {}]   ;;  %s2372_s2 = inlined_call_operand.vmem [shape: f32[1,96], index: 2, kind: input, shape index: {}]   ;;  %s2373_s3 = inlined_call_operand.vmem [shape: bf16[32,32], index: 3, kind: input, shape index: {}]   ;;  %s2374_s4 = inlined_call_operand.vmem [shape: f32[1,32], index: 4, kind: input, shape index: {}]   ;;  %s2375_s5 = inlined_call_operand.hbm [shape: bf16[32,64], index: 5, kind: input, shape index: {}]   ;;  %s2376_s6 = inlined_call_operand.vmem [shape: f32[1,64], index: 6, kind: input, shape index: {}]   ;;  %s2377_s7 = inlined_call_operand.vmem [shape: bf16[64,32], index: 7, kind: input, shape index: {}]   ;;  %s2378_s8 = inlined_call_operand.vmem [shape: f32[1,32], index: 8, kind: input, shape index: {}]   ;;  %s2379_s9 = inlined_call_operand.vmem [shape: f32[1,32], index: 9, kind: input, shape index: {}]   ;;  %s2380_s10 = inlined_call_operand.vmem [shape: f32[1,32], index: 10, kind: input, shape index: {}]   ;;  %s2381_s11 = inlined_call_operand.vmem [shape: f32[1,32], index: 11, kind: input, shape index: {}]   ;;  %s2382_s12 = inlined_call_operand.vmem [shape: f32[1,32], index: 12, kind: input, shape index: {}]   ;;  %s2383_s13 = inlined_call_operand.hbm [shape: f32[2,8,32], index: 13, kind: output, shape index: {}]  }
   0x1   :  { %2384 = sst [smem:[#allocation13_spill]] %s2370_s0 }
   0x2   :  { %2385 = sst [smem:[#allocation14_spill]] %s2371_s1 }
   0x3   :  { %2386 = sst [smem:[#allocation15_spill]] %s2372_s2 }
   0x4   :  { %2387 = sst [smem:[#allocation16_spill]] %s2375_s5 }
   0x5   :  { %18 = vsyncpa [#allocation8], 0 }
   0x6   :  { %19 = vsyncpa [#allocation9], 0 }
   0x7   :  { %21 = vsyncpa [#allocation9 + $0x1], 0  ;;  %s1963_s25 = smov 0   ;;  %s1965_s26 = smov 0  }
   0x8   :  { %s1967_s27 = smov 0   ;;  %s1969_s28 = smov 0  }
   0x9 LB: > { %s1984_s29 = sadd.s32 4294967295, %s1868_s28   ;;  %s1584_s30 = sadd.s32 4294967294, %s1868_s28   ;;  %s1868_s28 = sphi %s1969_s28, %s2397_s28   ;;  %s1864_s27 = sphi %s1967_s27, %s2396_s27   ;;  %s1860_s26 = sphi %s1965_s26, %s2395_s26   ;;  %s1856_s25 = sphi %s1963_s25, %s2394_s25  }
   0xa   : > { %s1988_s14 = sadd.s32 1, %s1868_s28   ;;  %s312_s15 = sadd.s32 1, %s1864_s27 }
   0xb   : > { %s309_s16 = ssub.s32 %s1868_s28, %s1988_s14  ;;  %p322_p0 = scmp.ne.s32.totalorder %s1864_s27, %s1860_s26 }
   0xc   : > { %p310_p1 = scmp.eq.s32.totalorder %s309_s16, 0  ;;  %p323_p2 = scmp.eq.s32.totalorder %s1984_s29, 1 }
   0xd   : > { %p328_p3 = scmp.ne.s32.totalorder %s1860_s26, %s1856_s25  ;;  %p329_p4 = scmp.eq.s32.totalorder %s1584_s30, 1 }
   0xe   : > { %s1999_s17 = scalar_select %p310_p1, %s1864_s27, %s312_s15  }
   0xf   : > { %p2001_p5 = por %p323_p2, %p322_p0  ;;  %p2005_p6 = por %p329_p4, %p328_p3 }
  0x10   : > { %p1585_p7 = scmp.ge.s32.totalorder %s1868_s28, 1  ;;  %p336_p8 = scmp.lt.s32.totalorder %s1868_s28, 3 }
  0x11   : > { %p1672_p9 = scmp.eq.s32.totalorder %s1984_s29, 0  ;;  %s2390_s5 = sld [smem:[#allocation16_spill]] }
  0x12   : > { %p337_p10 = pnand %p1585_p7, %p336_p8  ;;  %s1870_s23 = smov [#allocation7]  }
  0x13   : > { %s361_s24 = sshll.u32 %s1870_s23, 4  ;;  %s1871_s30 = smov 64   ;;  %s362_s24 = int_to_ptr.vmem [resolvable:$true] %s361_s24 }
  0x14   : > { %p1664_p11 = pneg %p337_p10  ;;  %s1872_s15 = smov 4  }
  0x15   : > { %405 = sbr.rel (%p337_p10) target bundleno = 2052 (0x804), region = 72 }
  0x16   : > { %p1665_p12 = pnand %p1672_p9, %p1664_p11 }
  0x17   : > { %s359_s22 = sshll.u32 %s2390_s5, 4  ;;  %s360_s22 = int_to_ptr.hbm [resolvable:$true] %s359_s22 }
  0x18   : > { %1667 = dma.hbm_to_vmem [thread:$0]  (!%p1665_p12), %s360_s22, 256, %s362_s24, [#allocation8], %s1871_s30, %s1871_s30, %s1872_s15  }
  0x1a   : > { %1847 = dma.done.wait (%p1672_p9), [#allocation8], 256  }
  0x1b   : > { %1849 = vsyncadd (%p1672_p9), [#allocation8], 4294967040  ;;  %p449_p13 = scmp.lt.s32.totalorder %s1984_s29, 1  ;;  %s2391_s0 = sld [smem:[#allocation13_spill]]  ;;  %vm455_vm0 = vcmask 261120   ;;  %v1873_v2 = vmov 32.0  }
  0x1c   : > { %1741 = vrcp.f32 %v1873_v2  ;;  %s2392_s1 = sld [smem:[#allocation14_spill]]  ;;  %v1733_v25 = vld [vmem:[%s2379_s9] ss:$0 sm:$0xff]  ;;  %s1874_s30 = smov 72   ;;  %v1884_v42 = vmov 1983009808  }
  0x1d   : > { %s450_s16 = scalar_select %p449_p13, %s1984_s29, 1  ;;  %v1734_v28 = vld [vmem:[%s2380_s10] ss:$0 sm:$0xff]  ;;  %v604_v43 = vunpack.c.l.s4 %v1884_v42  ;;  %vm601_vm5 = vcmask 1047556   ;;  %v1885_v62 = vmov 1934713408  }
  0x1e   : > { %s2393_s2 = sld [smem:[#allocation15_spill]]  ;;  %s1875_s15 = smov 120   ;;  %v618_v63 = vunpack.c.l.s4 %v1885_v62  ;;  %vm845_vm6 = vcmask 60416   ;;  %vm863_vm7 = vcmask 64512   ;;  %vm854_vm8 = vcmask 7168  }
  0x1f   : > { %s1591_s20 = sshll.u32 %s450_s16, 3  ;;  %s1876_s16 = smov 96   ;;  %v2065_v54 = vunpack.c.0.s8 %v604_v43  ;;  %vm1083_vm9 = vcmask 1043456   ;;  %vm1329_vm10 = vcmask 130048   ;;  %vm1331_vm11 = vcmask 195584  }
  0x20   : > { %s1878_s21 = smov 80   ;;  %s1879_s23 = smov 88   ;;  %vm1478_vm15 = vcmask 523264  }
  0x21   : > { %s2026_s5 = scalar_lea.vmem %s2391_s0, %s1591_s20  ;;  %s1877_s20 = smov 48  }
  0x22   : > { %v454_v0 = vld [vmem:[%s2026_s5] sm:$0xff]  ;;  %v1742_v3 = vpop.eup %1741  ;;  %v1649_v14 = vld [vmem:[%s2392_s1 + $0x8] sm:$0xff]  ;;  %s1880_s22 = smov 104   ;;  %s1881_s24 = smov 112  }
  0x23   : > { %v456_v1 = vsel %vm455_vm0, %v454_v0, 0.0  ;;  %v460_v4 = vmul.f32 32.0, %v1742_v3  ;;  %vm464_vm1 = vweird.f32 %v1742_v3  ;;  %525 = vmatpush.bf16.msra.mxu0 %v1649_v14  ;;  %v1648_v15 = vld [vmem:[%s2392_s1] sm:$0xff] }
  0x24   : > { %457 = vadd.xlane.f32.xlu0 %v456_v1  ;;  %v1735_v32 = vld [vmem:[%s2393_s2] ss:$0 sm:$0xff] }
  0x25   : > { %v461_v5 = vsub.f32 1.0, %v460_v4 }
  0x27   : > { %v462_v6 = vmul.f32 %v1742_v3, %v461_v5  ;;  %526 = vmatpush.bf16.msra.mxu0 %v1648_v15 }
  0x29   : > { %v463_v7 = vadd.f32 %v1742_v3, %v462_v6 }
  0x2b   : > { %v2030_v8 = vsel %vm464_vm1, %v1742_v3, %v463_v7 }
  0x97   : > { %v458_v9 = vpop.xlane.xlu0 %457 }
  0x98   : > { %v466_v10 = vmul.f32 %v2030_v8, %v458_v9  ;;  %v2071_v9 = vunpack.c.0.s8 %v618_v63 }
  0x9a   : > { %v467_v11 = vsub.f32 %v454_v0, %v466_v10 }
  0x9c   : > { %v468_v12 = vmul.f32 %v467_v11, %v467_v11 }
  0x9e   : > { %v469_v13 = vsel %vm455_vm0, %v468_v12, 0.0 }
  0x9f   : > { %470 = vadd.xlane.f32.xlu0 %v469_v13 }
 0x112   : > { %v471_v16 = vpop.xlane.xlu0 %470 }
 0x113   : > { %v472_v17 = vmul.f32 %v471_v16, %v2030_v8 }
 0x115   : > { %v473_v18 = vadd.f32 1e-05, %v472_v17 }
 0x117   : > { %1743 = vrsqrt.f32 %v473_v18  ;;  %vm480_vm3 = vweird.f32 %v473_v18 }
 0x11d   : > { %v1744_v19 = vpop.eup %1743 }
 0x11e   : > { %v475_v20 = vmul.f32 %v1744_v19, %v473_v18  ;;  %vm481_vm2 = vweird.f32 %v1744_v19 }
 0x11f   : > { %vm482_vm4 = vmor %vm480_vm3, %vm481_vm2 }
 0x120   : > { %v476_v21 = vmul.f32 %v1744_v19, %v475_v20 }
 0x122   : > { %v477_v22 = vmul.f32 0.5, %v476_v21 }
 0x124   : > { %v478_v23 = vsub.f32 1.5, %v477_v22 }
 0x126   : > { %v479_v24 = vmul.f32 %v1744_v19, %v478_v23 }
 0x128   : > { %v483_v26 = vsel %vm482_vm4, %v1744_v19, %v479_v24 }
 0x129   : > { %v484_v27 = vmul.f32 %v483_v26, %v467_v11 }
 0x12b   : > { %v489_v29 = vmul.f32 %v1733_v25, %v484_v27 }
 0x12d   : > { %v494_v30 = vadd.f32 %v1734_v28, %v489_v29 }
 0x12f   : > { %v495_v31 = vpack.c.bf16 %v494_v30, %v494_v30 }
 0x131   : > { %1600 = vmatmul.msk.bf16.vlgmr.msra.gmra.mxu0 %vm455_vm0, %v495_v31 }
 0x1ae   : > { %v528_v33 = vpop.f32.mrf.mxu0 }
 0x1af   : > { %v529_v34 = vadd.f32 %v1735_v32, %v528_v33 }
 0x1b1   : > { %v2051_v35 = vpack.c.bf16 %v529_v34, %v529_v34 }
 0x1b3   : > { %546 = vrot.lane.b32.xlu0 %v2051_v35, %s1874_s30  ;;  %534 = vrot.lane.b32.xlu2 %v2051_v35, %s1875_s15  ;;  %s1882_s30 = smov 56   ;;  %s1883_s15 = smov 64   ;;  %v560_v48 = vshrl.u32 %v2051_v35, 16 }
 0x1b4   : > { %540 = vrot.lane.b32.xlu1 %v2051_v35, %s1876_s16  ;;  %s1887_s16 = smov 40  }
 0x1b6   : > { %v530_v36 = vpop.f32.mrf.mxu0 }
 0x1bb   : > { %552 = vrot.lane.b32.xlu0 %v2051_v35, %s1877_s20  ;;  %544 = vrot.lane.b32.xlu2 %v2051_v35, %s1878_s21  ;;  %s1890_s20 = smov 24   ;;  %s1891_s21 = smov 16  }
 0x1bc   : > { %542 = vrot.lane.b32.xlu1 %v2051_v35, %s1879_s23  ;;  %s1892_s23 = smov 8  }
 0x1c3   : > { %538 = vrot.lane.b32.xlu2 %v2051_v35, %s1880_s22 }
 0x1c4   : > { %536 = vrot.lane.b32.xlu1 %v2051_v35, %s1881_s24 }
 0x1cb   : > { %550 = vrot.lane.b32.xlu2 %v2051_v35, %s1882_s30  ;;  %s446_s30 = sand.u32 1, %s1860_s26  }
 0x1cc   : > { %548 = vrot.lane.b32.xlu1 %v2051_v35, %s1883_s15  ;;  %s1590_s15 = sshll.u32 %s446_s30, 3 }
 0x1cd   : > { %s448_s24 = scalar_lea.vmem [#allocation10], %s1590_s15  ;;  %s1822_s15 = scalar_lea.hbm %s2383_s13, 16 }
 0x1ce   : > { %s1510_s0 = sshll.u32 %s448_s24, 4  ;;  %s1511_s0 = int_to_ptr.vmem [resolvable:$true] %s1510_s0 }
 0x20d   : > { %v535_v37 = vpop.permute.xlu2 %534 }
 0x20e   : > { %v561_v40 = vshrl.u32 %v535_v37, 16  ;;  %v558_v49 = vpack.i.b16 %v535_v37, %v2051_v35 }
 0x210   : > { %v562_v53 = vpack.i.b16 %v561_v40, %v560_v48 }
 0x215   : > { %v545_v39 = vpop.permute.xlu2 %544 }
 0x216   : > { %v584_v55 = vshrl.u32 %v545_v39, 16 }
 0x21d   : > { %v539_v59 = vpop.permute.xlu2 %538 }
 0x21e   : > { %v569_v2 = vshrl.u32 %v539_v59, 16 }
 0x225   : > { %v547_v41 = vpop.permute.xlu0 %546 }
 0x226   : > { %v541_v38 = vpop.permute.xlu1 %540  ;;  %v585_v50 = vshrl.u32 %v547_v41, 16  ;;  %v582_v56 = vpack.i.b16 %v547_v41, %v545_v39 }
 0x227   : > { %v576_v45 = vshrl.u32 %v541_v38, 16 }
 0x228   : > { %v586_v60 = vpack.i.b16 %v585_v50, %v584_v55  ;;  %v607_v3 = vrot.slane %v582_v56, 4 }
 0x22a   : > { %v635_v7 = vrot.slane %v586_v60, 4 }
 0x22e   : > { %v543_v44 = vpop.permute.xlu1 %542 }
 0x22f   : > { %v574_v46 = vpack.i.b16 %v543_v44, %v541_v38  ;;  %v577_v47 = vshrl.u32 %v543_v44, 16 }
 0x231   : > { %v578_v51 = vpack.i.b16 %v577_v47, %v576_v45  ;;  %v600_v52 = vrot.slane %v574_v46, 4 }
 0x233   : > { %v602_v57 = vsel %vm601_vm5, %v600_v52, %v558_v49  ;;  %v629_v58 = vrot.slane %v578_v51, 4 }
 0x234   : > { %v606_v0 = vperm.slane %v602_v57, %v2065_v54 }
 0x235   : > { %v630_v61 = vsel %vm601_vm5, %v629_v58, %v562_v53 }
 0x236   : > { %v537_v1 = vpop.permute.xlu1 %536  ;;  %v634_v6 = vperm.slane %v630_v61, %v2065_v54  ;;  %v615_v12 = vrot.slane %v606_v0, 4 }
 0x237   : > { %v566_v4 = vpack.i.b16 %v539_v59, %v537_v1  ;;  %v568_v5 = vshrl.u32 %v537_v1, 16 }
 0x238   : > { %v643_v15 = vrot.slane %v634_v6, 4 }
 0x239   : > { %v570_v10 = vpack.i.b16 %v569_v2, %v568_v5  ;;  %v608_v11 = vsel %vm601_vm5, %v607_v3, %v566_v4 }
 0x23a   : > { %v612_v13 = vperm.slane %v608_v11, %v2065_v54 }
 0x23b   : > { %v636_v14 = vsel %vm601_vm5, %v635_v7, %v570_v10 }
 0x23c   : > { %v613_v16 = vrot.slane %v612_v13, 4  ;;  %v616_v17 = vsel %vm601_vm5, %v612_v13, %v615_v12  ;;  %v640_v18 = vperm.slane %v636_v14, %v2065_v54 }
 0x23d   : > { %v624_v19 = vperm.slane %v616_v17, %v2071_v9 }
 0x23e   : > { %v614_v20 = vsel %vm601_vm5, %v613_v16, %v606_v0  ;;  %v641_v21 = vrot.slane %v640_v18, 4  ;;  %v644_v22 = vsel %vm601_vm5, %v640_v18, %v643_v15 }
 0x23f   : > { %v620_v23 = vperm.slane %v614_v20, %v2071_v9  ;;  %v627_v24 = vrot.slane %v624_v19, 4  ;;  %v652_v25 = vperm.slane %v644_v22, %v2071_v9 }
 0x240   : > { %v642_v26 = vsel %vm601_vm5, %v641_v21, %v634_v6 }
 0x241   : > { %v625_v27 = vrot.slane %v620_v23, 4  ;;  %v628_v28 = vsel %vm601_vm5, 0, %v627_v24  ;;  %v648_v29 = vperm.slane %v642_v26, %v2071_v9  ;;  %v655_v30 = vrot.slane %v652_v25, 4 }
 0x242   : > { %v709_v31 = vsel %vm601_vm5, %v627_v24, %v620_v23  ;;  %v714_v32 = vrot.slane %v628_v28, 4 }
 0x243   : > { %v626_v33 = vsel %vm601_vm5, 0, %v625_v27  ;;  %v653_v34 = vrot.slane %v648_v29, 4  ;;  %v656_v36 = vsel %vm601_vm5, 0, %v655_v30  ;;  %v713_v37 = vperm.slane %v709_v31, %v2065_v54 }
 0x244   : > { %v715_v38 = vsel %vm601_vm5, %v714_v32, %v626_v33  ;;  %v736_v39 = vsel %vm601_vm5, %v655_v30, %v648_v29  ;;  %v741_v40 = vrot.slane %v656_v36, 4 }
 0x245   : > { %v654_v41 = vsel %vm601_vm5, 0, %v653_v34  ;;  %v719_v42 = vperm.slane %v715_v38, %v2065_v54  ;;  %v722_v43 = vrot.slane %v713_v37, 4  ;;  %v740_v44 = vperm.slane %v736_v39, %v2065_v54 }
 0x246   : > { %v742_v45 = vsel %vm601_vm5, %v741_v40, %v654_v41  ;;  %v1886_v34 = vmov -inf  }
 0x247   : > { %v723_v46 = vsel %vm601_vm5, %v719_v42, %v722_v43  ;;  %v746_v47 = vperm.slane %v742_v45, %v2065_v54  ;;  %v749_v48 = vrot.slane %v740_v44, 4  ;;  %v720_v60 = vrot.slane %v719_v42, 4  ;;  %855 = vst.msk [vmem:[#allocation4] sm:$0xff] %vm854_vm8, %v1886_v34 }
 0x248   : > { %v731_v49 = vperm.slane %v723_v46, %v2071_v9  ;;  %856 = vst.msk [vmem:[#allocation4 + $0x8] sm:$0xff] %vm854_vm8, %v1886_v34 }
 0x249   : > { %v750_v50 = vsel %vm601_vm5, %v746_v47, %v749_v48  ;;  %v747_v55 = vrot.slane %v746_v47, 4  ;;  %v721_v4 = vsel %vm601_vm5, %v720_v60, %v713_v37  ;;  %857 = vst.msk [vmem:[#allocation4 + $0x10] sm:$0xff] %vm854_vm8, %v1886_v34  ;;  %v1888_v47 = vmov 0  }
 0x24a   : > { %v734_v51 = vrot.slane %v731_v49, 4  ;;  %v758_v52 = vperm.slane %v750_v50, %v2071_v9  ;;  %v817_v53 = vshrl.u32 %v731_v49, 16  ;;  %v727_v6 = vperm.slane %v721_v4, %v2071_v9  ;;  %858 = vst.msk [vmem:[#allocation4 + $0x18] sm:$0xff] %vm854_vm8, %v1886_v34  ;;  %1731 = vset.pattern.permute.xlu1 %v1888_v47  ;;  %1732 = vset.pattern.permute.xlu2 %v1888_v47 }
 0x24b   : > { %v748_v2 = vsel %vm601_vm5, %v747_v55, %v740_v44  ;;  %1730 = vset.pattern.permute.xlu0 %v1888_v47  ;;  %v1889_v48 = vmov 0.0  }
 0x24c   : > { %v735_v56 = vsel %vm601_vm5, 0, %v734_v51  ;;  %v761_v57 = vrot.slane %v758_v52, 4  ;;  %v815_v58 = vpack.i.b16 %v758_v52, %v731_v49  ;;  %v818_v59 = vshrl.u32 %v758_v52, 16  ;;  %861 = vst.msk [vmem:[#allocation5 + $0x10] sm:$0xff] %vm854_vm8, %v1889_v48  ;;  %v551_v49 = vpop.permute.xlu2 %550  ;;  %v549_v52 = vpop.permute.xlu1 %548 }
 0x24d   : > { %v825_v0 = vshrl.u32 %v735_v56, 16  ;;  %v754_v5 = vperm.slane %v748_v2, %v2071_v9  ;;  %v732_v15 = vrot.slane %v727_v6, 4  ;;  %v804_v22 = vshrl.u32 %v727_v6, 16  ;;  %859 = vst.msk [vmem:[#allocation5] sm:$0xff] %vm854_vm8, %v1889_v48 }
 0x24e   : > { %v762_v61 = vsel %vm601_vm5, 0, %v761_v57  ;;  %v819_v62 = vpack.i.b16 %v818_v59, %v817_v53  ;;  %846 = vst.msk [vmem:[#allocation2] sm:$0xf] %vm845_vm6, %v815_v58  ;;  %v2150_v50 = vld [vmem:[#allocation4] sm:$0xff]  ;;  %v591_v4 = vshrl.u32 %v549_v52, 16 }
 0x24f   : > { %v823_v63 = vpack.i.b16 %v762_v61, %v735_v56  ;;  %v826_v1 = vshrl.u32 %v762_v61, 16  ;;  %v759_v11 = vrot.slane %v754_v5, 4  ;;  %v805_v18 = vshrl.u32 %v754_v5, 16  ;;  %860 = vst.msk [vmem:[#allocation5 + $0x8] sm:$0xff] %vm854_vm8, %v1889_v48 }
 0x250   : > { %847 = vst.msk [vmem:[#allocation2 + $0x4] sm:$0xf] %vm845_vm6, %v819_v62  ;;  %v803_v21 = vpack.i.b16 %v754_v5, %v727_v6  ;;  %v733_v23 = vsel %vm601_vm5, 0, %v732_v15  ;;  %v2165_v59 = vld [vmem:[#allocation4 + $0x10] sm:$0xff]  ;;  %v592_v5 = vshrl.u32 %v551_v49, 16  ;;  %v590_v6 = vpack.i.b16 %v551_v49, %v549_v52 }
 0x251   : > { %v827_v3 = vpack.i.b16 %v826_v1, %v825_v0  ;;  %848 = vst.msk [vmem:[#allocation2 + $0x8] sm:$0xf] %vm845_vm6, %v823_v63  ;;  %v760_v19 = vsel %vm601_vm5, 0, %v759_v11  ;;  %v806_v25 = vpack.i.b16 %v805_v18, %v804_v22  ;;  %v810_v27 = vshrl.u32 %v733_v23, 16  ;;  %v2160_v56 = vld [vmem:[#allocation4 + $0x18] sm:$0xff]  ;;  %v2174_v63 = vld [vmem:[#allocation4 + $0x8] sm:$0xff] }
 0x252   : > { %v811_v24 = vshrl.u32 %v760_v19, 16  ;;  %v809_v26 = vpack.i.b16 %v760_v19, %v733_v23  ;;  %862 = vst.msk [vmem:[#allocation5 + $0x18] sm:$0xff] %vm854_vm8, %v1889_v48 }
 0x253   : > { %849 = vst.msk [vmem:[#allocation2 + $0xc] sm:$0xf] %vm845_vm6, %v827_v3 }
 0x254   : > { %v812_v28 = vpack.i.b16 %v811_v24, %v810_v27  ;;  %864 = vst.msk [vmem:[#allocation6] sm:$0xff] %vm863_vm7, %v1889_v48 }
 0x255   : > { %v868_v7 = vld [vmem:[#allocation2] sm:$0xf]  ;;  %865 = vst.msk [vmem:[#allocation6 + $0x8] sm:$0xff] %vm863_vm7, %v1889_v48 }
 0x256   : > { %v880_v10 = vsel %vm863_vm7, %v868_v7, 0  ;;  %866 = vst.msk [vmem:[#allocation6 + $0x10] sm:$0xff] %vm863_vm7, %v1889_v48  ;;  %v593_v7 = vpack.i.b16 %v592_v5, %v591_v4 }
 0x257   : > { %889 = vmatpush.bf16.xpose.msra.mxu1 %v880_v10  ;;  %v869_v12 = vld [vmem:[#allocation2 + $0x4] sm:$0xf]  ;;  %867 = vst.msk [vmem:[#allocation6 + $0x18] sm:$0xff] %vm863_vm7, %v1889_v48  ;;  %v661_v10 = vperm.slane %v590_v6, %v2065_v54 }
 0x258   : > { %v899_v13 = vsel %vm863_vm7, %v869_v12, 0  ;;  %v870_v14 = vld [vmem:[#allocation2 + $0x8] sm:$0xf] }
 0x259   : > { %908 = vmatpush.bf16.xpose.msra.mxu2 %v899_v13  ;;  %v918_v16 = vsel %vm863_vm7, %v870_v14, 0  ;;  %v687_v13 = vperm.slane %v593_v7, %v2065_v54 }
 0x25a   : > { %927 = vmatpush.bf16.xpose.msra.mxu3 %v918_v16  ;;  %v871_v17 = vld [vmem:[#allocation2 + $0xc] sm:$0xf]  ;;  %v669_v16 = vrot.slane %v661_v10, 4 }
 0x25b   : > { %v937_v20 = vsel %vm863_vm7, %v871_v17, 0  ;;  %v695_v19 = vrot.slane %v687_v13, 4 }
 0x25c   : > { %946 = vmatpush.bf16.xpose.msrb.mxu0 %v937_v20 }
 0x25e   : > { %1601 = vmatmul.msk.bf16.vlgmr.msra.gmra.mxu1 %vm863_vm7, %v803_v21 }
 0x260   : > { %1602 = vmatmul.msk.bf16.vlgmr.msra.gmra.mxu2 %vm863_vm7, %v806_v25 }
 0x261   : > { %1603 = vmatmul.msk.bf16.vlgmr.msra.gmra.mxu3 %vm863_vm7, %v809_v26 }
 0x263   : > { %1604 = vmatmul.msk.bf16.vlgmr.msrb.gmra.mxu0 %vm863_vm7, %v812_v28 }
 0x2db   : > { %v891_v29 = vpop.f32.mrf.mxu1 }
 0x2dc   : > { %v2121_v30 = vmul.f32 0.35355338, %v891_v29 }
 0x2de   : > { %v960_v31 = vsel %vm863_vm7, %v2121_v30, -inf }
 0x2df   : > { %961 = vmax.xlane.f32.xlu0 %v960_v31 }
 0x2e0   : > { %v948_v32 = vpop.f32.mrf.mxu0 }
 0x2e1   : > { %v2125_v33 = vmul.f32 0.35355338, %v948_v32 }
 0x2e3   : > { %v893_v36 = vpop.f32.mrf.mxu1  ;;  %v910_v37 = vpop.f32.mrf.mxu2  ;;  %v969_v38 = vsel %vm863_vm7, %v2125_v33, -inf }
 0x2e4   : > { %970 = vmax.xlane.f32.xlu2 %v969_v38  ;;  %v929_v39 = vpop.f32.mrf.mxu3  ;;  %v2135_v41 = vmul.f32 0.35355338, %v910_v37 }
 0x2e5   : > { %v2132_v40 = vmul.f32 0.35355338, %v929_v39 }
 0x2e6   : > { %v963_v45 = vsel %vm863_vm7, %v2135_v41, -inf }
 0x2e7   : > { %v966_v42 = vsel %vm863_vm7, %v2132_v40, -inf }
 0x2e8   : > { %v950_v43 = vpop.f32.mrf.mxu0  ;;  %967 = vmax.xlane.f32.xlu1 %v966_v42 }
 0x2eb   : > { %v912_v44 = vpop.f32.mrf.mxu2 }
 0x2ec   : > { %964 = vmax.xlane.f32.xlu2 %v963_v45  ;;  %v931_v46 = vpop.f32.mrf.mxu3 }
 0x301   : > { %554 = vrot.lane.b32.xlu1 %v2051_v35, %s1887_s16  ;;  %v553_v35 = vpop.permute.xlu0 %552  ;;  %s1645_s16 = sshll.u32 %s1984_s29, 3  ;;  %s1498_s29 = scalar_lea.sflag [#allocation9], %s446_s30 }
 0x302   : > { %v597_v12 = vshrl.u32 %v553_v35, 16  ;;  %s1508_s22 = scalar_lea.hbm %s2383_s13, %s1645_s16 }
 0x303   : > { %s1512_s1 = sshll.u32 %s1508_s22, 4  ;;  %s1513_s1 = int_to_ptr.hbm [resolvable:$true] %s1512_s1 }
 0x304   : > { %s1816_s2 = sshra.s32 %s1513_s1, 4  ;;  %s1817_s2 = int_to_ptr.hbm [resolvable:$true] %s1816_s2 }
 0x305   : > { %p1823_p3 = scmp.lt.s32.totalorder %s1817_s2, %s2383_s13 }
 0x352   : > { %v962_v51 = vpop.xlane.xlu0 %961 }
 0x353   : > { %v2153_v53 = vmax.f32 %v2150_v50, %v962_v51 }
 0x355   : > { %v976_v55 = vsub.f32 %v2150_v50, %v2153_v53  ;;  %1165 = vst.msk [vmem:[#allocation4] sm:$0xff] %vm854_vm8, %v2153_v53  ;;  %990 = vperm.xlu1 %1731, %v2153_v53  }
 0x357   : > { %v971_v57 = vpop.xlane.xlu2 %970 }
 0x358   : > { %v2163_v58 = vmax.f32 %v2160_v56, %v971_v57 }
 0x35a   : > { %v979_v60 = vsub.f32 %v2160_v56, %v2163_v58  ;;  %1168 = vst.msk [vmem:[#allocation4 + $0x18] sm:$0xff] %vm854_vm8, %v2163_v58 }
 0x35b   : > { %v968_v61 = vpop.xlane.xlu1 %967 }
 0x35c   : > { %v2172_v62 = vmax.f32 %v2165_v59, %v968_v61 }
 0x35e   : > { %v978_v0 = vsub.f32 %v2165_v59, %v2172_v62  ;;  %1167 = vst.msk [vmem:[#allocation4 + $0x10] sm:$0xff] %vm854_vm8, %v2172_v62  ;;  %1000 = vperm.xlu2 %1732, %v2172_v62  }
 0x35f   : > { %v965_v1 = vpop.xlane.xlu2 %964 }
 0x360   : > { %v2182_v2 = vmax.f32 %v2174_v63, %v965_v1 }
 0x362   : > { %v977_v3 = vsub.f32 %v2174_v63, %v2182_v2  ;;  %1166 = vst.msk [vmem:[#allocation4 + $0x8] sm:$0xff] %vm854_vm8, %v2182_v2  ;;  %995 = vperm.xlu0 %1730, %v2182_v2   ;;  %v1022_v2 = vld [vmem:[#allocation5 + $0x10] sm:$0xff] }
 0x366   : > { %1005 = vperm.xlu2 %1732, %v2163_v58  }
 0x373   : > { %v555_v11 = vpop.permute.xlu1 %554 }
 0x374   : > { %v596_v14 = vpack.i.b16 %v555_v11, %v553_v35  ;;  %v598_v15 = vshrl.u32 %v555_v11, 16 }
 0x376   : > { %v599_v17 = vpack.i.b16 %v598_v15, %v597_v12  ;;  %v666_v18 = vperm.slane %v596_v14, %v2065_v54 }
 0x378   : > { %v667_v20 = vrot.slane %v666_v18, 4  ;;  %v670_v21 = vsel %vm601_vm5, %v666_v18, %v669_v16  ;;  %v692_v22 = vperm.slane %v599_v17, %v2065_v54 }
 0x379   : > { %v678_v23 = vperm.slane %v670_v21, %v2071_v9 }
 0x37a   : > { %v668_v24 = vsel %vm601_vm5, %v667_v20, %v661_v10  ;;  %v693_v25 = vrot.slane %v692_v22, 4  ;;  %v696_v26 = vsel %vm601_vm5, %v692_v22, %v695_v19 }
 0x37b   : > { %v674_v27 = vperm.slane %v668_v24, %v2071_v9  ;;  %v681_v28 = vrot.slane %v678_v23, 4  ;;  %v704_v29 = vperm.slane %v696_v26, %v2071_v9 }
 0x37c   : > { %v694_v31 = vsel %vm601_vm5, %v693_v25, %v687_v13 }
 0x37d   : > { %v679_v32 = vrot.slane %v674_v27, 4  ;;  %v682_v34 = vsel %vm601_vm5, 0, %v681_v28  ;;  %v700_v36 = vperm.slane %v694_v31, %v2071_v9  ;;  %v707_v37 = vrot.slane %v704_v29, 4 }
 0x37e   : > { %v768_v38 = vrot.slane %v682_v34, 4  ;;  %v763_v44 = vsel %vm601_vm5, %v681_v28, %v674_v27 }
 0x37f   : > { %v680_v39 = vsel %vm601_vm5, 0, %v679_v32  ;;  %v705_v42 = vrot.slane %v700_v36, 4  ;;  %v708_v43 = vsel %vm601_vm5, 0, %v707_v37  ;;  %v782_v35 = vsel %vm601_vm5, %v707_v37, %v700_v36 }
 0x380   : > { %v769_v45 = vsel %vm601_vm5, %v768_v38, %v680_v39  ;;  %v787_v46 = vrot.slane %v708_v43, 4  ;;  %v767_v51 = vperm.slane %v763_v44, %v2065_v54  ;;  %v786_v1 = vperm.slane %v782_v35, %v2065_v54 }
 0x381   : > { %v706_v47 = vsel %vm601_vm5, 0, %v705_v42  ;;  %v773_v48 = vperm.slane %v769_v45, %v2065_v54 }
 0x382   : > { %v788_v49 = vsel %vm601_vm5, %v787_v46, %v706_v47 }
 0x383   : > { %v774_v52 = vrot.slane %v773_v48, 4  ;;  %v792_v57 = vperm.slane %v788_v49, %v2065_v54 }
 0x385   : > { %v775_v61 = vsel %vm601_vm5, %v774_v52, %v767_v51  ;;  %v793_v4 = vrot.slane %v792_v57, 4 }
 0x386   : > { %v779_v5 = vperm.slane %v775_v61, %v2071_v9  ;;  %v982_v61 = vmul.f32 1.442695, %v977_v3  ;;  %v1023_v3 = vld [vmem:[#allocation5 + $0x18] sm:$0xff] }
 0x387   : > { %v794_v6 = vsel %vm601_vm5, %v793_v4, %v786_v1 }
 0x388   : > { %v780_v7 = vrot.slane %v779_v5, 4  ;;  %v798_v10 = vperm.slane %v794_v6, %v2071_v9  ;;  %v833_v11 = vshrl.u32 %v779_v5, 16 }
 0x38a   : > { %v781_v12 = vsel %vm601_vm5, 0, %v780_v7  ;;  %v799_v13 = vrot.slane %v798_v10, 4  ;;  %v831_v14 = vpack.i.b16 %v798_v10, %v779_v5  ;;  %v834_v15 = vshrl.u32 %v798_v10, 16 }
 0x38b   : > { %v841_v19 = vshrl.u32 %v781_v12, 16 }
 0x38c   : > { %v800_v16 = vsel %vm601_vm5, 0, %v799_v13  ;;  %v835_v17 = vpack.i.b16 %v834_v15, %v833_v11  ;;  %850 = vst.msk [vmem:[#allocation3] sm:$0xf] %vm845_vm6, %v831_v14  ;;  %v1020_v13 = vld [vmem:[#allocation5] sm:$0xff] }
 0x38d   : > { %v839_v18 = vpack.i.b16 %v800_v16, %v781_v12  ;;  %v842_v20 = vshrl.u32 %v800_v16, 16 }
 0x38e   : > { %851 = vst.msk [vmem:[#allocation3 + $0x4] sm:$0xf] %vm845_vm6, %v835_v17 }
 0x38f   : > { %v843_v21 = vpack.i.b16 %v842_v20, %v841_v19  ;;  %852 = vst.msk [vmem:[#allocation3 + $0x8] sm:$0xf] %vm845_vm6, %v839_v18  ;;  %v1050_v18 = vld [vmem:[#allocation6 + $0x10] sm:$0xff] }
 0x391   : > { %853 = vst.msk [vmem:[#allocation3 + $0xc] sm:$0xf] %vm845_vm6, %v843_v21  ;;  %v1021_v21 = vld [vmem:[#allocation5 + $0x8] sm:$0xff] }
 0x393   : > { %v872_v22 = vld [vmem:[#allocation3] sm:$0xf] }
 0x394   : > { %v1085_v23 = vsel %vm1083_vm9, %v872_v22, 0 }
 0x395   : > { %1094 = vmatpush.bf16.msrb.mxu1 %v1085_v23  ;;  %v873_v24 = vld [vmem:[#allocation3 + $0x4] sm:$0xf] }
 0x396   : > { %v1104_v25 = vsel %vm1083_vm9, %v873_v24, 0  ;;  %v874_v26 = vld [vmem:[#allocation3 + $0x8] sm:$0xf]  ;;  %v1048_v24 = vld [vmem:[#allocation6] sm:$0xff] }
 0x397   : > { %1113 = vmatpush.bf16.msrb.mxu2 %v1104_v25  ;;  %v1123_v27 = vsel %vm1083_vm9, %v874_v26, 0 }
 0x398   : > { %1132 = vmatpush.bf16.msrb.mxu3 %v1123_v27  ;;  %v875_v28 = vld [vmem:[#allocation3 + $0xc] sm:$0xf] }
 0x399   : > { %v1142_v29 = vsel %vm1083_vm9, %v875_v28, 0 }
 0x39a   : > { %1151 = vmatpush.bf16.msra.mxu0 %v1142_v29 }
 0x3b8   : > { %v1001_v31 = vpop.permute.xlu2 %1000 }
 0x3b9   : > { %v1010_v32 = vsub.f32 %v2132_v40, %v1001_v31 }
 0x3bb   : > { %v1016_v34 = vmul.f32 1.442695, %v1010_v32 }
 0x3bd   : > { %1745 = vpow2.f32 %v1016_v34 }
 0x3c0   : > { %v1006_v36 = vpop.permute.xlu2 %1005 }
 0x3c1   : > { %v1011_v37 = vsub.f32 %v2125_v33, %v1006_v36 }
 0x3c3   : > { %v1746_v38 = vpop.eup %1745  ;;  %v1018_v39 = vmul.f32 1.442695, %v1011_v37 }
 0x3c4   : > { %v1034_v42 = vsel %vm863_vm7, %v1746_v38, 0.0  ;;  %v1078_v43 = vpack.c.bf16 %v1746_v38, %v1746_v38 }
 0x3c5   : > { %1747 = vpow2.f32 %v1018_v39  ;;  %1035 = vadd.xlane.f32.xlu1 %v1034_v42 }
 0x3c6   : > { %1607 = vmatmul.msk.bf16.vlgmr.msrb.gmra.mxu3 %vm863_vm7, %v1078_v43  ;;  %v1049_v43 = vld [vmem:[#allocation6 + $0x8] sm:$0xff] }
 0x3c7   : > { %v991_v44 = vpop.permute.xlu1 %990 }
 0x3c8   : > { %v1008_v45 = vsub.f32 %v2121_v30, %v991_v44  ;;  %v980_v30 = vmul.f32 1.442695, %v976_v55  ;;  %v986_v55 = vmul.f32 1.442695, %v979_v60 }
 0x3ca   : > { %v1012_v46 = vmul.f32 1.442695, %v1008_v45 }
 0x3cb   : > { %v1748_v47 = vpop.eup %1747 }
 0x3cc   : > { %v1079_v40 = vpack.c.bf16 %v1748_v47, %v1748_v47  ;;  %1749 = vpow2.f32 %v1012_v46  ;;  %v1037_v48 = vsel %vm863_vm7, %v1748_v47, 0.0 }
 0x3cd   : > { %1038 = vadd.xlane.f32.xlu0 %v1037_v48  ;;  %v1051_v48 = vld [vmem:[#allocation6 + $0x18] sm:$0xff] }
 0x3ce   : > { %1608 = vmatmul.msk.bf16.vlgmr.msra.gmra.mxu0 %vm863_vm7, %v1079_v40 }
 0x3d2   : > { %v1750_v33 = vpop.eup %1749 }
 0x3d3   : > { %v1028_v35 = vsel %vm863_vm7, %v1750_v33, 0.0  ;;  %v1076_v49 = vpack.c.bf16 %v1750_v33, %v1750_v33 }
 0x3d4   : > { %v996_v51 = vpop.permute.xlu0 %995  ;;  %1029 = vadd.xlane.f32.xlu2 %v1028_v35 }
 0x3d5   : > { %v1009_v52 = vsub.f32 %v2135_v41, %v996_v51  ;;  %1605 = vmatmul.msk.bf16.vlgmr.msrb.gmra.mxu1 %vm863_vm7, %v1076_v49  ;;  %v984_v41 = vmul.f32 1.442695, %v978_v0 }
 0x3d7   : > { %v1014_v57 = vmul.f32 1.442695, %v1009_v52 }
 0x3d9   : > { %1751 = vpow2.f32 %v1014_v57 }
 0x3da   : > { %1753 = vpow2.f32 %v980_v30 }
 0x3db   : > { %1755 = vpow2.f32 %v982_v61 }
 0x3dc   : > { %1757 = vpow2.f32 %v984_v41 }
 0x3dd   : > { %1759 = vpow2.f32 %v986_v55 }
 0x3df   : > { %v1752_v1 = vpop.eup %1751 }
 0x3e0   : > { %v1754_v4 = vpop.eup %1753  ;;  %v1031_v5 = vsel %vm863_vm7, %v1752_v1, 0.0  ;;  %v1077_v6 = vpack.c.bf16 %v1752_v1, %v1752_v1 }
 0x3e1   : > { %1032 = vadd.xlane.f32.xlu1 %v1031_v5  ;;  %1054 = vperm.xlu0 %1730, %v1754_v4   ;;  %v1756_v50 = vpop.eup %1755  ;;  %v1024_v56 = vmul.f32 %v1754_v4, %v1020_v13 }
 0x3e2   : > { %1606 = vmatmul.msk.bf16.vlgmr.msrb.gmra.mxu2 %vm863_vm7, %v1077_v6  ;;  %v1758_v53 = vpop.eup %1757  ;;  %v1025_v31 = vmul.f32 %v1756_v50, %v1021_v21 }
 0x3e3   : > { %v1760_v63 = vpop.eup %1759  ;;  %v1026_v59 = vmul.f32 %v1758_v53, %v1022_v2 }
 0x3e4   : > { %v1027_v7 = vmul.f32 %v1760_v63, %v1023_v3 }
 0x3e9   : > { %1059 = vperm.xlu0 %1730, %v1756_v50  }
 0x3ec   : > { %1064 = vperm.xlu2 %1732, %v1758_v53  }
 0x3fa   : > { %1069 = vperm.xlu1 %1731, %v1760_v63  }
 0x438   : > { %v1036_v62 = vpop.xlane.xlu1 %1035 }
 0x439   : > { %v1042_v0 = vadd.f32 %v1036_v62, %v1026_v59 }
 0x43b   : > { %1046 = vst.msk [vmem:[#allocation5 + $0x10] sm:$0xff] %vm854_vm8, %v1042_v0 }
 0x440   : > { %v1039_v10 = vpop.xlane.xlu0 %1038 }
 0x441   : > { %v1043_v11 = vadd.f32 %v1039_v10, %v1027_v7 }
 0x442   : > { %v1175_v12 = vld [vmem:[#allocation5 + $0x10] sm:$0xff] }
 0x443   : > { %1047 = vst.msk [vmem:[#allocation5 + $0x18] sm:$0xff] %vm854_vm8, %v1043_v11  ;;  %1761 = vrcp.f32 %v1175_v12 }
 0x447   : > { %v1030_v58 = vpop.xlane.xlu2 %1029 }
 0x448   : > { %v1040_v60 = vadd.f32 %v1030_v58, %v1024_v56 }
 0x449   : > { %v1762_v14 = vpop.eup %1761  ;;  %v1134_v15 = vpop.f32.mrf.mxu3 }
 0x44a   : > { %1044 = vst.msk [vmem:[#allocation5] sm:$0xff] %vm854_vm8, %v1040_v60  ;;  %1193 = vperm.xlu2 %1732, %v1762_v14   ;;  %v1176_v16 = vld [vmem:[#allocation5 + $0x18] sm:$0xff] }
 0x44b   : > { %v1153_v17 = vpop.f32.mrf.mxu0  ;;  %1763 = vrcp.f32 %v1176_v16 }
 0x44f   : > { %v1065_v19 = vpop.permute.xlu2 %1064 }
 0x450   : > { %v1074_v20 = vmul.f32 %v1065_v19, %v1050_v18 }
 0x451   : > { %v1764_v22 = vpop.eup %1763  ;;  %v1136_v23 = vpop.f32.mrf.mxu3  ;;  %v1173_v25 = vld [vmem:[#allocation5] sm:$0xff] }
 0x452   : > { %v1159_v26 = vadd.f32 %v1134_v15, %v1074_v20  ;;  %1198 = vperm.xlu0 %1730, %v1764_v22   ;;  %v1096_v27 = vpop.f32.mrf.mxu1  ;;  %1765 = vrcp.f32 %v1173_v25 }
 0x453   : > { %v1055_v28 = vpop.permute.xlu0 %1054  ;;  %v1155_v29 = vpop.f32.mrf.mxu0 }
 0x454   : > { %1163 = vst.msk [vmem:[#allocation6 + $0x10] sm:$0xff] %vm863_vm7, %v1159_v26  ;;  %v1072_v32 = vmul.f32 %v1055_v28, %v1048_v24  ;;  %v1033_v34 = vpop.xlane.xlu1 %1032 }
 0x455   : > { %v1041_v36 = vadd.f32 %v1033_v34, %v1025_v31 }
 0x456   : > { %v1157_v37 = vadd.f32 %v1096_v27, %v1072_v32 }
 0x457   : > { %1045 = vst.msk [vmem:[#allocation5 + $0x8] sm:$0xff] %vm854_vm8, %v1041_v36 }
 0x458   : > { %v1766_v38 = vpop.eup %1765  ;;  %1161 = vst.msk [vmem:[#allocation6] sm:$0xff] %vm863_vm7, %v1157_v37 }
 0x459   : > { %1183 = vperm.xlu1 %1731, %v1766_v38  }
 0x45a   : > { %v1098_v39 = vpop.f32.mrf.mxu1 }
 0x45b   : > { %v1060_v44 = vpop.permute.xlu0 %1059  ;;  %v1171_v6 = vld [vmem:[#allocation6 + $0x10] sm:$0xff] }
 0x45c   : > { %v1073_v45 = vmul.f32 %v1060_v44, %v1049_v43 }
 0x45e   : > { %v1174_v42 = vld [vmem:[#allocation5 + $0x8] sm:$0xff] }
 0x45f   : > { %1767 = vrcp.f32 %v1174_v42  ;;  %v1169_v59 = vld [vmem:[#allocation6] sm:$0xff] }
 0x465   : > { %v1768_v46 = vpop.eup %1767  ;;  %v1115_v47 = vpop.f32.mrf.mxu2 }
 0x466   : > { %v1158_v40 = vadd.f32 %v1115_v47, %v1073_v45  ;;  %1188 = vperm.xlu2 %1732, %v1768_v46  }
 0x468   : > { %1162 = vst.msk [vmem:[#allocation6 + $0x8] sm:$0xff] %vm863_vm7, %v1158_v40 }
 0x46c   : > { %v1070_v33 = vpop.permute.xlu1 %1069 }
 0x46d   : > { %v1075_v35 = vmul.f32 %v1070_v33, %v1051_v48  ;;  %v1117_v49 = vpop.f32.mrf.mxu2 }
 0x46f   : > { %v1160_v51 = vadd.f32 %v1153_v17, %v1075_v35  ;;  %v1170_v57 = vld [vmem:[#allocation6 + $0x8] sm:$0xff] }
 0x471   : > { %1164 = vst.msk [vmem:[#allocation6 + $0x18] sm:$0xff] %vm863_vm7, %v1160_v51 }
 0x478   : > { %v1172_v4 = vld [vmem:[#allocation6 + $0x18] sm:$0xff] }
 0x4a4   : > { %v1194_v52 = vpop.permute.xlu2 %1193 }
 0x4a5   : > { %v1203_v50 = vmul.f32 %v1194_v52, %v1171_v6 }
 0x4a7   : > { %v1205_v0 = vrot.slane %v1203_v50, 4 }
 0x4c0   : > { %v1189_v30 = vpop.permute.xlu2 %1188 }
 0x4c1   : > { %v1202_v61 = vmul.f32 %v1189_v30, %v1170_v57 }
 0x4c3   : > { %v1220_v53 = vrot.slane %v1202_v61, 4 }
 0x4c4   : > { %v1199_v1 = vpop.permute.xlu0 %1198 }
 0x4c5   : > { %v1204_v5 = vmul.f32 %v1199_v1, %v1172_v4 }
 0x4c7   : > { %v1218_v41 = vrot.slane %v1204_v5, 4  ;;  %v1221_v63 = vsel %vm601_vm5, %v1204_v5, %v1220_v53 }
 0x4c8   : > { %v1229_v7 = vperm.slane %v1221_v63, %v2065_v54  ;;  %v1651_v63 = vld [vmem:[%s2373_s3 + $0x8] sm:$0xff] }
 0x4c9   : > { %v1219_v55 = vsel %vm601_vm5, %v1218_v41, %v1202_v61  ;;  %1363 = vmatpush.bf16.msra.mxu1 %v1651_v63 }
 0x4ca   : > { %v1225_v2 = vperm.slane %v1219_v55, %v2065_v54  ;;  %v1242_v58 = vrot.slane %v1229_v7, 4 }
 0x4cb   : > { %v1184_v62 = vpop.permute.xlu1 %1183 }
 0x4cc   : > { %v1201_v3 = vmul.f32 %v1184_v62, %v1169_v59  ;;  %v1230_v12 = vrot.slane %v1225_v2, 4 }
 0x4ce   : > { %v1207_v10 = vsel %vm601_vm5, %v1205_v0, %v1201_v3  ;;  %v1208_v11 = vrot.slane %v1201_v3, 4 }
 0x4cf   : > { %v1213_v13 = vperm.slane %v1207_v10, %v2065_v54 }
 0x4d0   : > { %v1209_v56 = vsel %vm601_vm5, %v1203_v50, %v1208_v11  ;;  %v1736_v11 = vld [vmem:[%s2374_s4] ss:$0 sm:$0xff] }
 0x4d1   : > { %v1217_v60 = vperm.slane %v1209_v56, %v2065_v54  ;;  %v1231_v14 = vsel %vm601_vm5, %v1230_v12, %v1213_v13  ;;  %v1232_v15 = vrot.slane %v1213_v13, 4  ;;  %v1771_v56 = vld [vmem:[%s2026_s5] sm:$0xff] }
 0x4d2   : > { %v1237_v16 = vperm.slane %v1231_v14, %v2071_v9 }
 0x4d3   : > { %v1233_v17 = vsel %vm601_vm5, %v1225_v2, %v1232_v15  ;;  %v1243_v18 = vsel %vm601_vm5, %v1242_v58, %v1217_v60  ;;  %v1244_v19 = vrot.slane %v1217_v60, 4 }
 0x4d4   : > { %v1241_v20 = vperm.slane %v1233_v17, %v2071_v9  ;;  %v1249_v21 = vperm.slane %v1243_v18, %v2071_v9  ;;  %v1254_v24 = vrot.slane %v1237_v16, 4 }
 0x4d5   : > { %v1245_v22 = vsel %vm601_vm5, %v1229_v7, %v1244_v19 }
 0x4d6   : > { %v1253_v23 = vperm.slane %v1245_v22, %v2071_v9  ;;  %v1256_v25 = vrot.slane %v1241_v20, 4  ;;  %v1258_v27 = vrot.slane %v1249_v21, 4  ;;  %v1255_v34 = vsel %vm601_vm5, 0.0, %v1254_v24  ;;  %v1653_v20 = vld [vmem:[#allocation7 + $0x8] sm:$0xff]  ;;  %v1657_v22 = vld [vmem:[%s2377_s7 + $0x18] sm:$0xff] }
 0x4d7   : > { %1433 = vmatpush.bf16.msra.mxu2 %v1653_v20  ;;  %1486 = vmatpush.bf16.msra.mxu3 %v1657_v22 }
 0x4d8   : > { %v1257_v26 = vsel %vm601_vm5, 0.0, %v1256_v25  ;;  %v1260_v28 = vrot.slane %v1253_v23, 4  ;;  %v1262_v29 = vsel %vm601_vm5, %v1256_v25, %v1237_v16  ;;  %v1259_v44 = vsel %vm601_vm5, 0.0, %v1258_v27  ;;  %v1656_v25 = vld [vmem:[%s2377_s7 + $0x10] sm:$0xff]  ;;  %v1655_v27 = vld [vmem:[%s2377_s7 + $0x8] sm:$0xff] }
 0x4d9   : > { %v1267_v31 = vrot.slane %v1257_v26, 4  ;;  %v1266_v32 = vperm.slane %v1262_v29, %v2065_v54 }
 0x4da   : > { %v1261_v36 = vsel %vm601_vm5, 0.0, %v1260_v28  ;;  %v1273_v37 = vsel %vm601_vm5, %v1260_v28, %v1249_v21  ;;  %v1652_v21 = vld [vmem:[#allocation7] sm:$0xff] }
 0x4db   : > { %v1268_v38 = vsel %vm601_vm5, %v1267_v31, %v1255_v34  ;;  %v1277_v39 = vperm.slane %v1273_v37, %v2065_v54  ;;  %v1278_v42 = vrot.slane %v1261_v36, 4  ;;  %v1286_v43 = vrot.slane %v1266_v32, 4  ;;  %1434 = vmatpush.bf16.msra.mxu2 %v1652_v21  ;;  %1487 = vmatpush.bf16.msra.mxu3 %v1656_v25  ;;  %v1737_v36 = vld [vmem:[%s2381_s11] ss:$0 sm:$0xff] }
 0x4dc   : > { %v1272_v45 = vperm.slane %v1268_v38, %v2065_v54 }
 0x4dd   : > { %v1279_v46 = vsel %vm601_vm5, %v1278_v42, %v1259_v44  ;;  %v1298_v47 = vrot.slane %v1277_v39, 4 }
 0x4de   : > { %v1283_v40 = vperm.slane %v1279_v46, %v2065_v54  ;;  %v1287_v48 = vsel %vm601_vm5, %v1272_v45, %v1286_v43  ;;  %v1284_v33 = vrot.slane %v1272_v45, 4  ;;  %v1654_v45 = vld [vmem:[%s2377_s7] sm:$0xff] }
 0x4df   : > { %v1295_v35 = vperm.slane %v1287_v48, %v2071_v9  ;;  %1488 = vmatpush.bf16.msra.mxu3 %v1655_v27  ;;  %v1739_v46 = vld [vmem:[%s2376_s6] ss:$0 sm:$0xff] }
 0x4e0   : > { %v1299_v49 = vsel %vm601_vm5, %v1283_v40, %v1298_v47  ;;  %v1285_v51 = vsel %vm601_vm5, %v1284_v33, %v1266_v32  ;;  %v1296_v52 = vrot.slane %v1283_v40, 4 }
 0x4e1   : > { %v1307_v30 = vperm.slane %v1299_v49, %v2071_v9  ;;  %v1314_v57 = vrot.slane %v1295_v35, 4  ;;  %v1291_v61 = vperm.slane %v1285_v51, %v2071_v9  ;;  %v1740_v49 = vld [vmem:[%s2378_s8] ss:$0 sm:$0xff] }
 0x4e2   : > { %v1297_v1 = vsel %vm601_vm5, %v1296_v52, %v1277_v39  ;;  %v1738_v39 = vld [vmem:[%s2382_s12] ss:$0 sm:$0xff] }
 0x4e3   : > { %v1315_v4 = vsel %vm601_vm5, %v1307_v30, %v1314_v57  ;;  %v1312_v54 = vrot.slane %v1307_v30, 4  ;;  %v1303_v5 = vperm.slane %v1297_v1, %v2071_v9  ;;  %v1310_v6 = vrot.slane %v1291_v61, 4  ;;  %v1650_v9 = vld [vmem:[%s2373_s3] sm:$0xff]  ;;  %1489 = vmatpush.bf16.msra.mxu3 %v1654_v45 }
 0x4e4   : > { %1325 = vrot.lane.b32.xlu2 %v1315_v4, %s1890_s20  ;;  %1364 = vmatpush.bf16.msra.mxu1 %v1650_v9  ;;  %s1818_s20 = scalar_lea.hbm %s1817_s2, 8 }
 0x4e5   : > { %v1313_v41 = vsel %vm601_vm5, %v1312_v54, %v1295_v35  ;;  %v1308_v50 = vrot.slane %v1303_v5, 4  ;;  %v1311_v53 = vsel %vm601_vm5, %v1303_v5, %v1310_v6  ;;  %p1819_p0 = scmp.ne.s32.totalorder %s1817_s2, %s1818_s20  ;;  %p1824_p4 = scmp.lt.s32.totalorder %s1822_s15, %s1818_s20 }
 0x4e6   : > { %1321 = vrot.lane.b32.xlu0 %v1313_v41, %s1891_s21  ;;  %1317 = vrot.lane.b32.xlu1 %v1311_v53, %s1892_s23 }
 0x4e7   : > { %v1309_v55 = vsel %vm601_vm5, %v1308_v50, %v1291_v61  ;;  %p1820_p1 = pnand %p1819_p0, %p2001_p5  ;;  %p1825_p7 = por %p1824_p4, %p1823_p3 }
 0x4e9   : > { %p1821_p2 = pneg %p1820_p1 }
 0x4eb   : > { %p1826_p8 = pnand %p1825_p7, %p1821_p2 }
 0x53e   : > { %v1326_v0 = vpop.permute.xlu2 %1325 }
 0x558   : > { %v1322_v2 = vpop.permute.xlu0 %1321  ;;  %v1318_v59 = vpop.permute.xlu1 %1317 }
 0x559   : > { %v1328_v62 = vsel %vm863_vm7, %v1309_v55, %v1318_v59 }
 0x55a   : > { %v1330_v3 = vsel %vm1329_vm10, %v1328_v62, %v1322_v2 }
 0x55b   : > { %v1332_v7 = vsel %vm1331_vm11, %v1330_v3, %v1326_v0 }
 0x55c   : > { %v1333_v10 = vpack.c.bf16 %v1332_v7, %v1332_v7 }
 0x55e   : > { %1617 = vmatmul.msk.bf16.vlgmr.msra.gmra.mxu1 %vm455_vm0, %v1333_v10 }
 0x5db   : > { %v1366_v12 = vpop.f32.mrf.mxu1 }
 0x5dc   : > { %v1367_v13 = vadd.f32 %v1736_v11, %v1366_v12 }
 0x5de   : > { %v1370_v58 = vadd.f32 %v1771_v56, %v1367_v13 }
 0x5e0   : > { %v1371_v60 = vsel %vm455_vm0, %v1370_v58, 0.0 }
 0x5e1   : > { %1372 = vadd.xlane.f32.xlu1 %v1371_v60 }
 0x5e3   : > { %v1368_v14 = vpop.f32.mrf.mxu1 }
 0x654   : > { %v1373_v15 = vpop.xlane.xlu1 %1372 }
 0x655   : > { %v1374_v16 = vmul.f32 %v1373_v15, %v2030_v8 }
 0x657   : > { %v1375_v17 = vsub.f32 %v1370_v58, %v1374_v16 }
 0x659   : > { %v1376_v18 = vmul.f32 %v1375_v17, %v1375_v17 }
 0x65b   : > { %v1377_v19 = vsel %vm455_vm0, %v1376_v18, 0.0 }
 0x65c   : > { %1378 = vadd.xlane.f32.xlu0 %v1377_v19 }
 0x6cf   : > { %v1379_v23 = vpop.xlane.xlu0 %1378 }
 0x6d0   : > { %v1380_v24 = vmul.f32 %v1379_v23, %v2030_v8 }
 0x6d2   : > { %v1381_v26 = vadd.f32 1e-05, %v1380_v24 }
 0x6d4   : > { %1769 = vrsqrt.f32 %v1381_v26  ;;  %vm1388_vm13 = vweird.f32 %v1381_v26 }
 0x6da   : > { %v1770_v28 = vpop.eup %1769 }
 0x6db   : > { %v1383_v29 = vmul.f32 %v1770_v28, %v1381_v26  ;;  %vm1389_vm12 = vweird.f32 %v1770_v28 }
 0x6dc   : > { %vm1390_vm14 = vmor %vm1388_vm13, %vm1389_vm12 }
 0x6dd   : > { %v1384_v31 = vmul.f32 %v1770_v28, %v1383_v29 }
 0x6df   : > { %v1385_v32 = vmul.f32 0.5, %v1384_v31 }
 0x6e1   : > { %v1386_v34 = vsub.f32 1.5, %v1385_v32 }
 0x6e3   : > { %v1387_v8 = vmul.f32 %v1770_v28, %v1386_v34 }
 0x6e5   : > { %v1391_v37 = vsel %vm1390_vm14, %v1770_v28, %v1387_v8 }
 0x6e6   : > { %v1392_v38 = vmul.f32 %v1391_v37, %v1375_v17 }
 0x6e8   : > { %v1397_v42 = vmul.f32 %v1737_v36, %v1392_v38 }
 0x6ea   : > { %v1402_v43 = vadd.f32 %v1738_v39, %v1397_v42 }
 0x6ec   : > { %v1403_v44 = vpack.c.bf16 %v1402_v43, %v1402_v43 }
 0x6ee   : > { %1626 = vmatmul.msk.bf16.vlgmr.msra.gmra.mxu2 %vm455_vm0, %v1403_v44 }
 0x771   : > { %v1436_v47 = vpop.f32.mrf.mxu2 }
 0x772   : > { %v1437_v40 = vadd.f32 %v1739_v46, %v1436_v47 }
 0x774   : > { %v1440_v48 = vmax.f32 %v1437_v40, 0.0 }
 0x776   : > { %v1441_v33 = vpack.c.bf16 %v1440_v48, %v1440_v48 }
 0x778   : > { %1643 = vmatmul.msk.bf16.vlgmr.msra.gmra.mxu3 %vm1478_vm15, %v1441_v33 }
 0x779   : > { %v1438_v35 = vpop.f32.mrf.mxu2 }
 0x7fb   : > { %v1491_v51 = vpop.f32.mrf.mxu3 }
 0x7fc   : > { %v1492_v52 = vadd.f32 %v1740_v49, %v1491_v51 }
 0x7fe   : > { %v1495_v30 = vadd.f32 %v1492_v52, %v1370_v58 }
 0x800   : > { %1496 = vst.msk [vmem:[%s448_s24] sm:$0xff] %vm455_vm0, %v1495_v30 }
 0x801   : > { %1829 = shalt.err (!%p1826_p8)
}
 0x802   : > { %1662 = dma.vmem_to_hbm [thread:$0]  (%p2001_p5), %s1511_s0, 128, %s1513_s1, %s1498_s29  }
 0x803   : > { %v1493_v57 = vpop.f32.mrf.mxu3 }
 0x804 PF: > { %p1674_p9 = scmp.ge.s32.totalorder %s1868_s28, 2  ;;  %s1524_s30 = sand.u32 1, %s1856_s25  }
 0x805   : > { %s1525_s22 = scalar_lea.sflag [#allocation9], %s1524_s30 }
 0x806   : > { %p1669_p10 = pnand %p1674_p9, %p2005_p6 }
 0x808   : > { %p1670_p11 = pneg %p1669_p10 }
 0x80a   : > { %1851 = dma.done.wait (%p1670_p11), %s1525_s22, 128  }
 0x80b   : > { %1853 = vsyncadd (%p1670_p11), %s1525_s22, 4294967168  ;;  %p24_p12 = scmp.ge.s32.totalorder %s1988_s14, 4   ;;  %s2394_s25 = smov %s1860_s26 }
 0x80c   : > { %s2395_s26 = smov %s1864_s27  ;;  %s2396_s27 = smov %s1999_s17 }
 0x80d   : > { %s2397_s28 = smov %s1988_s14  ;;  %26 = sbr.rel (!%p24_p12) target bundleno = 9 (0x9), region = 112 }
 0x812   :  { %1531 = vsyncpa [#allocation8], 1 }
 0x813   :  { %1533 = vsyncpa [#allocation8 + $0x1], 1 }
 0x814   :  { %1534 = vsyncpa [#allocation9], 1 }
 0x815   :  { %1536 = vsyncpa [#allocation9 + $0x1], 1 }

</bundles_post_ra>
